<compile_context>
chip_gen: v7x
topology: tpu7x:2x2x1
jax: 0.10.0
libtpu: 0.0.40
codegen_flags: <defaults>
</compile_context>

<pallas_src>
import functools

import jax
import jax.numpy as jnp
from jax import lax
from jax.experimental import pallas as pl
from jax.experimental.pallas import tpu as pltpu

EPS = 1e-5
LANE = 128                     # lane-dense padded feature width for hidden layers / weights
GROUP = 8                      # BatchNorm statistics group (original per-call mini-batch size)
MATMUL_DTYPE = jnp.bfloat16    # MXU-native on v6e/v7x; BN / elementwise math stays f32


def mlp_kernel(x_ref, w_ref, v_ref, o_ref, *, in_dim, out_dim):
    """Fused MLP forward for one row block (many 8-row BN groups).

    x_ref: (R, in_dim)       activations, MATMUL_DTYPE, R a multiple of GROUP
    w_ref: (4, LANE, LANE)   per-layer weights (in, out), zero-padded, MATMUL_DTYPE
    v_ref: (4, 8, LANE)      per-layer f32 vectors: row 0 = bias, 1 = gamma, 2 = beta (rest 0)
    o_ref: (R, out_dim)      compact f32 output (final ReLU applied)
    """
    rows = x_ref.shape[0]
    ngroups = rows // GROUP
    inv_g = 1.0 / GROUP

    h = x_ref[...]                                   # (R, in_dim) bf16

    for l in range(3):  # fc1..fc3: Linear -> BatchNorm1d(train, per 8-row group) -> ReLU
        wl = w_ref[l]                                # (LANE, LANE) bf16
        w = wl[:in_dim, :] if l == 0 else wl         # layer 1 uses only the real input rows
        vl = v_ref[l]                                # (8, LANE) f32
        y = jnp.dot(h, w, preferred_element_type=jnp.float32) + vl[0:1, :]

        # centered two-pass batch statistics per 8-row group (biased variance)
        yg = y.reshape(ngroups, GROUP, LANE)
        mean = jnp.sum(yg, axis=1, keepdims=True) * inv_g
        cent = yg - mean
        var = jnp.sum(cent * cent, axis=1, keepdims=True) * inv_g
        yn = (cent * lax.rsqrt(var + EPS)).reshape(rows, LANE)

        h = jnp.maximum(yn * vl[1:2, :] + vl[2:3, :], 0.0).astype(MATMUL_DTYPE)

    # fc4: Linear -> ReLU (no batch norm); store only the real out_dim columns
    y = jnp.dot(h, w_ref[3], preferred_element_type=jnp.float32) + v_ref[3][0:1, :]
    o_ref[...] = jnp.maximum(y[:, :out_dim], 0.0).astype(o_ref.dtype)


def mlp_forward(x, w_slab, v_slab, *, in_dim, out_dim, row_block=256):
    """x: (total, in_dim) f32. BN stats are per GROUP-row group (original module semantics)."""
    total = x.shape[0]
    assert x.shape[1] == in_dim
    assert total % row_block == 0 and row_block % GROUP == 0
    num_steps = total // row_block

    kernel = functools.partial(mlp_kernel, in_dim=in_dim, out_dim=out_dim)
    return pl.pallas_call(
        kernel,
        out_shape=jax.ShapeDtypeStruct((total, out_dim), jnp.float32),
        grid_spec=pltpu.PrefetchScalarGridSpec(
            num_scalar_prefetch=0,
            grid=(num_steps,),
            in_specs=[
                # compact x block: full (narrow) minor dim is legal, avoids 8x HBM inflation
                pl.BlockSpec((row_block, in_dim), lambda i: (i, 0)),
                # constant slabs: index_map pinned to block 0 -> stay resident in VMEM
                pl.BlockSpec((4, LANE, LANE), lambda i: (0, 0, 0)),
                pl.BlockSpec((4, 8, LANE), lambda i: (0, 0, 0)),
            ],
            # compact output (minor dim = out_dim): 16x less writeback than padding to 128
            out_specs=pl.BlockSpec((row_block, out_dim), lambda i: (i, 0)),
        ),
        compiler_params=pltpu.CompilerParams(
            # even grid -> clean 2-way split across v7x TensorCores; no-op on v5e/v6e
            dimension_semantics=("parallel",),
        ),
    )(x.astype(MATMUL_DTYPE), w_slab, v_slab)


def init_params(key, input_dim, hidden_dim, output_dim):
    """PyTorch-style init: Linear ~ U(-1/sqrt(fan_in), 1/sqrt(fan_in)); BN gamma=1, beta=0.
    Weights stored as (in_dim, out_dim)."""
    dims = [input_dim, hidden_dim[0], hidden_dim[1], hidden_dim[2], output_dim]
    params = {}
    for i in range(4):
        fan_in, fan_out = dims[i], dims[i + 1]
        key, kw, kb = jax.random.split(key, 3)
        bound = 1.0 / jnp.sqrt(jnp.float32(fan_in))
        params[f"w{i + 1}"] = jax.random.uniform(
            kw, (fan_in, fan_out), jnp.float32, -bound, bound)
        params[f"b{i + 1}"] = jax.random.uniform(
            kb, (1, fan_out), jnp.float32, -bound, bound)
        if i < 3:
            params[f"g{i + 1}"] = jnp.ones((1, fan_out), jnp.float32)
            params[f"beta{i + 1}"] = jnp.zeros((1, fan_out), jnp.float32)
    return params


def pack_params(params, dims):
    """Pack all layer parameters into two lane-dense slabs.
    Padded rows/columns are 0 (bias/gamma/beta padding = 0), so padded lanes stay exactly 0
    through Linear + BN + ReLU — do not break this invariant when editing."""
    w_slab = jnp.zeros((4, LANE, LANE), jnp.float32)
    v_slab = jnp.zeros((4, 8, LANE), jnp.float32)
    for i in range(4):
        fin, fout = dims[i], dims[i + 1]
        w_slab = w_slab.at[i, :fin, :fout].set(params[f"w{i + 1}"])
        v_slab = v_slab.at[i, 0, :fout].set(params[f"b{i + 1}"][0])
        if i < 3:
            v_slab = v_slab.at[i, 1, :fout].set(params[f"g{i + 1}"][0])
            v_slab = v_slab.at[i, 2, :fout].set(params[f"beta{i + 1}"][0])
    return w_slab.astype(MATMUL_DTYPE), v_slab


def mlp_reference(x, params):
    """Pure-JAX reference: BN (training-mode) computed per GROUP-row mini-batch, with the same
    bf16 matmul-operand rounding as the kernel (accumulation in f32, BN math in f32)."""
    ng = x.shape[0] // GROUP
    xg = x.astype(MATMUL_DTYPE).reshape(ng, GROUP, -1)

    def one_group(h):
        for i in range(1, 4):
            y = jnp.dot(h.astype(MATMUL_DTYPE), params[f"w{i}"].astype(MATMUL_DTYPE),
                        preferred_element_type=jnp.float32) + params[f"b{i}"]
            mean = jnp.mean(y, axis=0, keepdims=True)
            cent = y - mean
            var = jnp.mean(cent * cent, axis=0, keepdims=True)
            y = cent * lax.rsqrt(var + EPS)
            y = y * params[f"g{i}"] + params[f"beta{i}"]
            h = jnp.maximum(y, 0.0)
        y = jnp.dot(h.astype(MATMUL_DTYPE), params["w4"].astype(MATMUL_DTYPE),
                    preferred_element_type=jnp.float32) + params["b4"]
        return jnp.maximum(y, 0.0)

    out = jax.vmap(one_group)(xg)
    return out.reshape(x.shape[0], -1)


if __name__ == "__main__":
    # Shapes consistent with the module: state_dim=16, hidden=[32, 32, 32], n_actions=8.
    input_dim, hidden_dim, output_dim = 16, [32, 32, 32], 8
    row_block = 256          # 32 BN groups per grid step; matches the v6e/v7x 256-wide MXU
    num_steps = 2            # even -> both v7x TensorCores get equal work
    total_batch = row_block * num_steps

    key = jax.random.PRNGKey(0)
    key, kx = jax.random.split(key)
    x = jax.random.normal(kx, (total_batch, input_dim), jnp.float32)

    params = init_params(key, input_dim, hidden_dim, output_dim)
    w_slab, v_slab = pack_params(params, [input_dim] + hidden_dim + [output_dim])

    out = mlp_forward(x, w_slab, v_slab, in_dim=input_dim, out_dim=output_dim,
                      row_block=row_block)
    jax.block_until_ready(out)

    ref = mlp_reference(x, params)
    assert out.shape == (total_batch, output_dim)
    max_err = float(jnp.max(jnp.abs(out - ref)))
    assert jnp.allclose(out, ref, atol=2e-2, rtol=2e-2), max_err

    print("KERNEL_OK")
</pallas_src>

<mosaic_0001>
module attributes {stable_mosaic.version = 11 : i64} {
  func.func @mlp_kernel(%arg0: i32, %arg1: memref<256x16xbf16, #tpu.memory_space<vmem>>, %arg2: memref<4x128x128xbf16, #tpu.memory_space<vmem>>, %arg3: memref<4x8x128xf32, #tpu.memory_space<vmem>>, %arg4: memref<256x8xf32, #tpu.memory_space<vmem>>) attributes {dimension_semantics = [#tpu.dimension_semantics<parallel>], iteration_bounds = array<i64: 2>, scalar_prefetch = 0 : i64, scratch_operands = 0 : i64, tpu.core_type = #tpu.core_type<tc>, window_params = [{transform_indices = @transform_0, window_bounds = array<i64: 256, 16>}, {pipeline_mode = #tpu.pipeline_mode<synchronous>, transform_indices = @transform_1, window_bounds = array<i64: 4, 128, 128>}, {pipeline_mode = #tpu.pipeline_mode<synchronous>, transform_indices = @transform_2, window_bounds = array<i64: 4, 8, 128>}, {transform_indices = @transform_3, window_bounds = array<i64: 256, 8>}]} {
    %c0 = arith.constant 0 : index
    %c0_0 = arith.constant 0 : index
    %0 = vector.load %arg1[%c0, %c0_0] : memref<256x16xbf16, #tpu.memory_space<vmem>>, vector<256x16xbf16>
    %c0_1 = arith.constant 0 : index
    %c0_2 = arith.constant 0 : index
    %c0_3 = arith.constant 0 : index
    %1 = vector.load %arg2[%c0_1, %c0_2, %c0_3] : memref<4x128x128xbf16, #tpu.memory_space<vmem>>, vector<1x128x128xbf16>
    %2 = vector.shape_cast %1 : vector<1x128x128xbf16> to vector<128x128xbf16>
    %3 = vector.extract_strided_slice %2 {offsets = [0, 0], sizes = [16, 128], strides = [1, 1]} : vector<128x128xbf16> to vector<16x128xbf16>
    %c0_4 = arith.constant 0 : index
    %c0_5 = arith.constant 0 : index
    %c0_6 = arith.constant 0 : index
    %4 = vector.load %arg3[%c0_4, %c0_5, %c0_6] : memref<4x8x128xf32, #tpu.memory_space<vmem>>, vector<1x8x128xf32>
    %5 = vector.shape_cast %4 : vector<1x8x128xf32> to vector<8x128xf32>
    %cst = arith.constant dense<0.000000e+00> : vector<256x128xf32>
    %6 = tpu.matmul %0, %3, %cst {dimension_numbers = #tpu.dot_dimension_numbers<[1], [0], [0], [1], [0, 0, 1, 1], [], []>} : vector<256x16xbf16>, vector<16x128xbf16>, vector<256x128xf32> -> vector<256x128xf32>
    %7 = vector.extract_strided_slice %5 {offsets = [0, 0], sizes = [1, 128], strides = [1, 1]} : vector<8x128xf32> to vector<1x128xf32>
    %8 = vector.broadcast %7 : vector<1x128xf32> to vector<256x128xf32>
    %9 = arith.addf %6, %8 : vector<256x128xf32>
    %10 = vector.shape_cast %9 : vector<256x128xf32> to vector<32x8x128xf32>
    %cst_7 = arith.constant dense<0.000000e+00> : vector<32x128xf32>
    %11 = vector.multi_reduction <add>, %10, %cst_7 [1] : vector<32x8x128xf32> to vector<32x128xf32>
    %12 = vector.shape_cast %11 : vector<32x128xf32> to vector<32x1x128xf32>
    %cst_8 = arith.constant 1.250000e-01 : f32
    %13 = vector.broadcast %cst_8 : f32 to vector<32x1x128xf32>
    %14 = arith.mulf %12, %13 : vector<32x1x128xf32>
    %15 = vector.broadcast %14 : vector<32x1x128xf32> to vector<32x8x128xf32>
    %16 = arith.subf %10, %15 : vector<32x8x128xf32>
    %17 = arith.mulf %16, %16 : vector<32x8x128xf32>
    %cst_9 = arith.constant dense<0.000000e+00> : vector<32x128xf32>
    %18 = vector.multi_reduction <add>, %17, %cst_9 [1] : vector<32x8x128xf32> to vector<32x128xf32>
    %19 = vector.shape_cast %18 : vector<32x128xf32> to vector<32x1x128xf32>
    %cst_10 = arith.constant 1.250000e-01 : f32
    %20 = vector.broadcast %cst_10 : f32 to vector<32x1x128xf32>
    %21 = arith.mulf %19, %20 : vector<32x1x128xf32>
    %cst_11 = arith.constant 9.99999974E-6 : f32
    %22 = vector.broadcast %cst_11 : f32 to vector<32x1x128xf32>
    %23 = arith.addf %21, %22 : vector<32x1x128xf32>
    %24 = math.rsqrt %23 : vector<32x1x128xf32>
    %25 = vector.broadcast %24 : vector<32x1x128xf32> to vector<32x8x128xf32>
    %26 = arith.mulf %16, %25 : vector<32x8x128xf32>
    %27 = vector.shape_cast %26 : vector<32x8x128xf32> to vector<256x128xf32>
    %28 = vector.extract_strided_slice %5 {offsets = [1, 0], sizes = [1, 128], strides = [1, 1]} : vector<8x128xf32> to vector<1x128xf32>
    %29 = vector.broadcast %28 : vector<1x128xf32> to vector<256x128xf32>
    %30 = arith.mulf %27, %29 : vector<256x128xf32>
    %31 = vector.extract_strided_slice %5 {offsets = [2, 0], sizes = [1, 128], strides = [1, 1]} : vector<8x128xf32> to vector<1x128xf32>
    %32 = vector.broadcast %31 : vector<1x128xf32> to vector<256x128xf32>
    %33 = arith.addf %30, %32 : vector<256x128xf32>
    %cst_12 = arith.constant 0.000000e+00 : f32
    %34 = vector.broadcast %cst_12 : f32 to vector<256x128xf32>
    %35 = arith.maximumf %33, %34 : vector<256x128xf32>
    %36 = arith.truncf %35 : vector<256x128xf32> to vector<256x128xbf16>
    %c1 = arith.constant 1 : index
    %c0_13 = arith.constant 0 : index
    %c0_14 = arith.constant 0 : index
    %37 = vector.load %arg2[%c1, %c0_13, %c0_14] : memref<4x128x128xbf16, #tpu.memory_space<vmem>>, vector<1x128x128xbf16>
    %38 = vector.shape_cast %37 : vector<1x128x128xbf16> to vector<128x128xbf16>
    %c1_15 = arith.constant 1 : index
    %c0_16 = arith.constant 0 : index
    %c0_17 = arith.constant 0 : index
    %39 = vector.load %arg3[%c1_15, %c0_16, %c0_17] : memref<4x8x128xf32, #tpu.memory_space<vmem>>, vector<1x8x128xf32>
    %40 = vector.shape_cast %39 : vector<1x8x128xf32> to vector<8x128xf32>
    %cst_18 = arith.constant dense<0.000000e+00> : vector<256x128xf32>
    %41 = tpu.matmul %36, %38, %cst_18 {dimension_numbers = #tpu.dot_dimension_numbers<[1], [0], [0], [1], [0, 0, 1, 1], [], []>} : vector<256x128xbf16>, vector<128x128xbf16>, vector<256x128xf32> -> vector<256x128xf32>
    %42 = vector.extract_strided_slice %40 {offsets = [0, 0], sizes = [1, 128], strides = [1, 1]} : vector<8x128xf32> to vector<1x128xf32>
    %43 = vector.broadcast %42 : vector<1x128xf32> to vector<256x128xf32>
    %44 = arith.addf %41, %43 : vector<256x128xf32>
    %45 = vector.shape_cast %44 : vector<256x128xf32> to vector<32x8x128xf32>
    %cst_19 = arith.constant dense<0.000000e+00> : vector<32x128xf32>
    %46 = vector.multi_reduction <add>, %45, %cst_19 [1] : vector<32x8x128xf32> to vector<32x128xf32>
    %47 = vector.shape_cast %46 : vector<32x128xf32> to vector<32x1x128xf32>
    %cst_20 = arith.constant 1.250000e-01 : f32
    %48 = vector.broadcast %cst_20 : f32 to vector<32x1x128xf32>
    %49 = arith.mulf %47, %48 : vector<32x1x128xf32>
    %50 = vector.broadcast %49 : vector<32x1x128xf32> to vector<32x8x128xf32>
    %51 = arith.subf %45, %50 : vector<32x8x128xf32>
    %52 = arith.mulf %51, %51 : vector<32x8x128xf32>
    %cst_21 = arith.constant dense<0.000000e+00> : vector<32x128xf32>
    %53 = vector.multi_reduction <add>, %52, %cst_21 [1] : vector<32x8x128xf32> to vector<32x128xf32>
    %54 = vector.shape_cast %53 : vector<32x128xf32> to vector<32x1x128xf32>
    %cst_22 = arith.constant 1.250000e-01 : f32
    %55 = vector.broadcast %cst_22 : f32 to vector<32x1x128xf32>
    %56 = arith.mulf %54, %55 : vector<32x1x128xf32>
    %cst_23 = arith.constant 9.99999974E-6 : f32
    %57 = vector.broadcast %cst_23 : f32 to vector<32x1x128xf32>
    %58 = arith.addf %56, %57 : vector<32x1x128xf32>
    %59 = math.rsqrt %58 : vector<32x1x128xf32>
    %60 = vector.broadcast %59 : vector<32x1x128xf32> to vector<32x8x128xf32>
    %61 = arith.mulf %51, %60 : vector<32x8x128xf32>
    %62 = vector.shape_cast %61 : vector<32x8x128xf32> to vector<256x128xf32>
    %63 = vector.extract_strided_slice %40 {offsets = [1, 0], sizes = [1, 128], strides = [1, 1]} : vector<8x128xf32> to vector<1x128xf32>
    %64 = vector.broadcast %63 : vector<1x128xf32> to vector<256x128xf32>
    %65 = arith.mulf %62, %64 : vector<256x128xf32>
    %66 = vector.extract_strided_slice %40 {offsets = [2, 0], sizes = [1, 128], strides = [1, 1]} : vector<8x128xf32> to vector<1x128xf32>
    %67 = vector.broadcast %66 : vector<1x128xf32> to vector<256x128xf32>
    %68 = arith.addf %65, %67 : vector<256x128xf32>
    %cst_24 = arith.constant 0.000000e+00 : f32
    %69 = vector.broadcast %cst_24 : f32 to vector<256x128xf32>
    %70 = arith.maximumf %68, %69 : vector<256x128xf32>
    %71 = arith.truncf %70 : vector<256x128xf32> to vector<256x128xbf16>
    %c2 = arith.constant 2 : index
    %c0_25 = arith.constant 0 : index
    %c0_26 = arith.constant 0 : index
    %72 = vector.load %arg2[%c2, %c0_25, %c0_26] : memref<4x128x128xbf16, #tpu.memory_space<vmem>>, vector<1x128x128xbf16>
    %73 = vector.shape_cast %72 : vector<1x128x128xbf16> to vector<128x128xbf16>
    %c2_27 = arith.constant 2 : index
    %c0_28 = arith.constant 0 : index
    %c0_29 = arith.constant 0 : index
    %74 = vector.load %arg3[%c2_27, %c0_28, %c0_29] : memref<4x8x128xf32, #tpu.memory_space<vmem>>, vector<1x8x128xf32>
    %75 = vector.shape_cast %74 : vector<1x8x128xf32> to vector<8x128xf32>
    %cst_30 = arith.constant dense<0.000000e+00> : vector<256x128xf32>
    %76 = tpu.matmul %71, %73, %cst_30 {dimension_numbers = #tpu.dot_dimension_numbers<[1], [0], [0], [1], [0, 0, 1, 1], [], []>} : vector<256x128xbf16>, vector<128x128xbf16>, vector<256x128xf32> -> vector<256x128xf32>
    %77 = vector.extract_strided_slice %75 {offsets = [0, 0], sizes = [1, 128], strides = [1, 1]} : vector<8x128xf32> to vector<1x128xf32>
    %78 = vector.broadcast %77 : vector<1x128xf32> to vector<256x128xf32>
    %79 = arith.addf %76, %78 : vector<256x128xf32>
    %80 = vector.shape_cast %79 : vector<256x128xf32> to vector<32x8x128xf32>
    %cst_31 = arith.constant dense<0.000000e+00> : vector<32x128xf32>
    %81 = vector.multi_reduction <add>, %80, %cst_31 [1] : vector<32x8x128xf32> to vector<32x128xf32>
    %82 = vector.shape_cast %81 : vector<32x128xf32> to vector<32x1x128xf32>
    %cst_32 = arith.constant 1.250000e-01 : f32
    %83 = vector.broadcast %cst_32 : f32 to vector<32x1x128xf32>
    %84 = arith.mulf %82, %83 : vector<32x1x128xf32>
    %85 = vector.broadcast %84 : vector<32x1x128xf32> to vector<32x8x128xf32>
    %86 = arith.subf %80, %85 : vector<32x8x128xf32>
    %87 = arith.mulf %86, %86 : vector<32x8x128xf32>
    %cst_33 = arith.constant dense<0.000000e+00> : vector<32x128xf32>
    %88 = vector.multi_reduction <add>, %87, %cst_33 [1] : vector<32x8x128xf32> to vector<32x128xf32>
    %89 = vector.shape_cast %88 : vector<32x128xf32> to vector<32x1x128xf32>
    %cst_34 = arith.constant 1.250000e-01 : f32
    %90 = vector.broadcast %cst_34 : f32 to vector<32x1x128xf32>
    %91 = arith.mulf %89, %90 : vector<32x1x128xf32>
    %cst_35 = arith.constant 9.99999974E-6 : f32
    %92 = vector.broadcast %cst_35 : f32 to vector<32x1x128xf32>
    %93 = arith.addf %91, %92 : vector<32x1x128xf32>
    %94 = math.rsqrt %93 : vector<32x1x128xf32>
    %95 = vector.broadcast %94 : vector<32x1x128xf32> to vector<32x8x128xf32>
    %96 = arith.mulf %86, %95 : vector<32x8x128xf32>
    %97 = vector.shape_cast %96 : vector<32x8x128xf32> to vector<256x128xf32>
    %98 = vector.extract_strided_slice %75 {offsets = [1, 0], sizes = [1, 128], strides = [1, 1]} : vector<8x128xf32> to vector<1x128xf32>
    %99 = vector.broadcast %98 : vector<1x128xf32> to vector<256x128xf32>
    %100 = arith.mulf %97, %99 : vector<256x128xf32>
    %101 = vector.extract_strided_slice %75 {offsets = [2, 0], sizes = [1, 128], strides = [1, 1]} : vector<8x128xf32> to vector<1x128xf32>
    %102 = vector.broadcast %101 : vector<1x128xf32> to vector<256x128xf32>
    %103 = arith.addf %100, %102 : vector<256x128xf32>
    %cst_36 = arith.constant 0.000000e+00 : f32
    %104 = vector.broadcast %cst_36 : f32 to vector<256x128xf32>
    %105 = arith.maximumf %103, %104 : vector<256x128xf32>
    %106 = arith.truncf %105 : vector<256x128xf32> to vector<256x128xbf16>
    %c3 = arith.constant 3 : index
    %c0_37 = arith.constant 0 : index
    %c0_38 = arith.constant 0 : index
    %107 = vector.load %arg2[%c3, %c0_37, %c0_38] : memref<4x128x128xbf16, #tpu.memory_space<vmem>>, vector<1x128x128xbf16>
    %108 = vector.shape_cast %107 : vector<1x128x128xbf16> to vector<128x128xbf16>
    %cst_39 = arith.constant dense<0.000000e+00> : vector<256x128xf32>
    %109 = tpu.matmul %106, %108, %cst_39 {dimension_numbers = #tpu.dot_dimension_numbers<[1], [0], [0], [1], [0, 0, 1, 1], [], []>} : vector<256x128xbf16>, vector<128x128xbf16>, vector<256x128xf32> -> vector<256x128xf32>
    %c3_40 = arith.constant 3 : index
    %c0_41 = arith.constant 0 : index
    %c0_42 = arith.constant 0 : index
    %110 = vector.load %arg3[%c3_40, %c0_41, %c0_42] : memref<4x8x128xf32, #tpu.memory_space<vmem>>, vector<1x8x128xf32>
    %111 = vector.shape_cast %110 : vector<1x8x128xf32> to vector<8x128xf32>
    %112 = vector.extract_strided_slice %111 {offsets = [0, 0], sizes = [1, 128], strides = [1, 1]} : vector<8x128xf32> to vector<1x128xf32>
    %113 = vector.broadcast %112 : vector<1x128xf32> to vector<256x128xf32>
    %114 = arith.addf %109, %113 : vector<256x128xf32>
    %115 = vector.extract_strided_slice %114 {offsets = [0, 0], sizes = [256, 8], strides = [1, 1]} : vector<256x128xf32> to vector<256x8xf32>
    %cst_43 = arith.constant 0.000000e+00 : f32
    %116 = vector.broadcast %cst_43 : f32 to vector<256x8xf32>
    %117 = arith.maximumf %115, %116 : vector<256x8xf32>
    %c0_44 = arith.constant 0 : index
    %c0_45 = arith.constant 0 : index
    %118 = vector.load %arg4[%c0_44, %c0_45] : memref<256x8xf32, #tpu.memory_space<vmem>>, vector<256x8xf32>
    tpu.vector_store %arg4[%c0_44, %c0_45], %117 {strides = array<i32>} : memref<256x8xf32, #tpu.memory_space<vmem>>, vector<256x8xf32>,
    return
  }
  func.func @transform_0(%arg0: i32) -> (i32, i32) {
    %c0_i32 = arith.constant 0 : i32
    %c0_i32_0 = arith.constant 0 : i32
    return %arg0, %c0_i32 : i32, i32
  }
  func.func @transform_1(%arg0: i32) -> (i32, i32, i32) {
    %c0_i32 = arith.constant 0 : i32
    %c0_i32_0 = arith.constant 0 : i32
    %c0_i32_1 = arith.constant 0 : i32
    %c0_i32_2 = arith.constant 0 : i32
    return %c0_i32, %c0_i32_0, %c0_i32_1 : i32, i32, i32
  }
  func.func @transform_2(%arg0: i32) -> (i32, i32, i32) {
    %c0_i32 = arith.constant 0 : i32
    %c0_i32_0 = arith.constant 0 : i32
    %c0_i32_1 = arith.constant 0 : i32
    %c0_i32_2 = arith.constant 0 : i32
    return %c0_i32, %c0_i32_0, %c0_i32_1 : i32, i32, i32
  }
  func.func @transform_3(%arg0: i32) -> (i32, i32) {
    %c0_i32 = arith.constant 0 : i32
    %c0_i32_0 = arith.constant 0 : i32
    return %arg0, %c0_i32 : i32, i32
  }
}

</mosaic_0001>

<bundles_post_ra>
// kernel: tpu_custom_call.1
= control target key start
LH: loop header
LB: loop body
LE: loop exit
PB: predicated region body
PF: predicated region fallthrough
CT: control target
= control target key end

     0   :  { %s4183_s12 = smov 0   ;;  %s6159_s0 = inlined_call_operand.vmem [shape: bf16[512,16], index: 0, kind: input, shape index: {}]   ;;  %s6160_s1 = inlined_call_operand.vmem [shape: bf16[4,128,128], index: 1, kind: input, shape index: {}]   ;;  %s6161_s2 = inlined_call_operand.vmem [shape: f32[4,8,128], index: 2, kind: input, shape index: {}]   ;;  %s6162_s3 = inlined_call_operand.vmem [shape: f32[512,8], index: 3, kind: output, shape index: {}]  }
   0x1 LB: > { %s3511_s13 = sadd.s32 4294967295, %s4161_s12   ;;  %p3515_p0 = scmp.ge.s32.totalorder %s4161_s12, 1  ;;  %s4161_s12 = sphi %s4183_s12, %s13_s12  }
   0x2   : > { %p138_p1 = scmp.lt.s32.totalorder %s4161_s12, 3 }
   0x4   : > { %p139_p2 = pnand %p3515_p0, %p138_p1 }
   0x6   : > { %142 = sbr.rel (%p139_p2) target bundleno = 1427 (0x593), region = 32 }
   0xd   : > { %v3921_v0 = vld [vmem:[%s6160_s1] sm:$0xff]   ;;  %s3516_s16 = sshll.u32 %s3511_s13, 5  ;;  %vm300_vm0 = vcmask 130048   ;;  %v3939_v18 = vld [vmem:[%s6160_s1 + $0x48] sm:$0xff]   ;;  %v3940_v19 = vld [vmem:[%s6160_s1 + $0x50] sm:$0xff]   ;;  %v210_v22 = vlaneseq  ;;  %vm3422_vm1 = vcmask 64512  }
   0xe   : > { %p163_p3 = scmp.lt.s32.totalorder %s3516_s16, 63  ;;  %3719 = vmatprep.subr.bf16.mxu0 %v3921_v0  ;;  %v3938_v17 = vld [vmem:[%s6160_s1 + $0x40] sm:$0xff]   ;;  %v3941_v20 = vld [vmem:[%s6160_s1 + $0x58] sm:$0xff]   ;;  %v3943_v23 = vld [vmem:[%s6160_s1 + $0x68] sm:$0xff]  }
   0xf   : > { %3720 = vmatpush3.bf16.msra.mxu0 %v3921_v0  ;;  %3753 = vmatprep.subr.bf16.mxu1 %v3938_v17  ;;  %v3942_v21 = vld [vmem:[%s6160_s1 + $0x60] sm:$0xff]   ;;  %v4252_v24 = vshrl.u32 %v210_v22, 7  ;;  %v3944_v27 = vld [vmem:[%s6160_s1 + $0x70] sm:$0xff]   ;;  %v3945_v37 = vld [vmem:[%s6160_s1 + $0x78] sm:$0xff]  }
  0x10   : > { %s6192_s16 = smov (!%p163_p3, %s3516_s16), 63  ;;  %3754 = vmatpush3.bf16.msra.mxu1 %v3938_v17  ;;  %v209_v26 = vld [vmem:[%s6161_s2] sm:$0xff] }
  0x11   : > { %s3517_s17 = sshll.u32 %s6192_s16, 2  ;;  %3755 = vmatprep.subr.bf16.mxu1 %v3939_v18  ;;  %v4255_v25 = vsub.s32 0, %v4252_v24  ;;  %s3519_s29 = sshll.u32 %s6192_s16, 3 }
  0x12   : > { %s4200_s20 = scalar_lea.vmem %s6159_s0, %s3517_s17  ;;  %s6059_s5 = scalar_lea.vmem %s6162_s3, %s3519_s29 }
  0x13   : > { %v3922_v1 = vld [vmem:[%s4200_s20] sm:$0xff]   ;;  %v3923_v2 = vld [vmem:[%s4200_s20 + $0x8] sm:$0xff]   ;;  %v3924_v3 = vld [vmem:[%s4200_s20 + $0x10] sm:$0xff]   ;;  %6167 = vst [vmem:[#allocation2_spill] sm:$0xff] %v4255_v25  ;;  %v4264_v28 = vrot.slane %v209_v26, %v4255_v25 }
  0x14   : > { %3721 = vmatprep.mubr.msk.bf16.mxu0 %vm300_vm0, %v3922_v1  ;;  %v3925_v4 = vld [vmem:[%s4200_s20 + $0x18] sm:$0xff]   ;;  %v3926_v5 = vld [vmem:[%s4200_s20 + $0x20] sm:$0xff]   ;;  %v3927_v6 = vld [vmem:[%s4200_s20 + $0x28] sm:$0xff]   ;;  %3756 = vmatpush3.bf16.msra.mxu1 %v3939_v18 }
  0x15   : > { %3722 = vmatmul.mubr.msk.bf16.vlgmr.msra.gmra.mrb[0].mxu0 %vm300_vm0, %v3923_v2  ;;  %v3928_v7 = vld [vmem:[%s4200_s20 + $0x30] sm:$0xff]   ;;  %v3929_v8 = vld [vmem:[%s4200_s20 + $0x38] sm:$0xff]   ;;  %v3930_v9 = vld [vmem:[%s4200_s20 + $0x40] sm:$0xff]   ;;  %3757 = vmatprep.subr.bf16.mxu1 %v3940_v19 }
  0x16   : > { %3725 = vmatprep.mubr.msk.bf16.mxu0 %vm300_vm0, %v3924_v3  ;;  %v3931_v10 = vld [vmem:[%s4200_s20 + $0x48] sm:$0xff]   ;;  %v3932_v11 = vld [vmem:[%s4200_s20 + $0x50] sm:$0xff]   ;;  %v3933_v12 = vld [vmem:[%s4200_s20 + $0x58] sm:$0xff]  }
  0x17   : > { %v3934_v13 = vld [vmem:[%s4200_s20 + $0x60] sm:$0xff]   ;;  %v3935_v14 = vld [vmem:[%s4200_s20 + $0x68] sm:$0xff]   ;;  %v3936_v15 = vld [vmem:[%s4200_s20 + $0x70] sm:$0xff]  }
  0x18   : > { %v3937_v16 = vld [vmem:[%s4200_s20 + $0x78] sm:$0xff]   ;;  %3758 = vmatpush3.bf16.msra.mxu1 %v3940_v19 }
  0x19   : > { %3759 = vmatprep.subr.bf16.mxu1 %v3941_v20 }
  0x1c   : > { %3760 = vmatpush3.bf16.msra.mxu1 %v3941_v20 }
  0x1d   : > { %3726 = vmatmul.mubr.msk.bf16.gmra.mrb[4].mxu0 %vm300_vm0, %v3925_v4  ;;  %3761 = vmatprep.subr.bf16.mxu1 %v3942_v21 }
  0x1e   : > { %3729 = vmatprep.mubr.msk.bf16.mxu0 %vm300_vm0, %v3926_v5 }
  0x20   : > { %3762 = vmatpush3.bf16.msra.mxu1 %v3942_v21 }
  0x21   : > { %3763 = vmatprep.subr.bf16.mxu1 %v3943_v23 }
  0x24   : > { %3764 = vmatpush3.bf16.msra.mxu1 %v3943_v23 }
  0x25   : > { %3730 = vmatmul.mubr.msk.bf16.gmra.mrb[8].mxu0 %vm300_vm0, %v3927_v6  ;;  %3765 = vmatprep.subr.bf16.mxu1 %v3944_v27 }
  0x26   : > { %3733 = vmatprep.mubr.msk.bf16.mxu0 %vm300_vm0, %v3928_v7 }
  0x28   : > { %3766 = vmatpush3.bf16.msra.mxu1 %v3944_v27 }
  0x29   : > { %3767 = vmatprep.subr.bf16.mxu1 %v3945_v37 }
  0x2c   : > { %3768 = vmatpush3.bf16.msra.mxu1 %v3945_v37 }
  0x2d   : > { %3734 = vmatmul.mubr.msk.bf16.gmra.mrb[12].mxu0 %vm300_vm0, %v3929_v8 }
  0x2e   : > { %3737 = vmatprep.mubr.msk.bf16.mxu0 %vm300_vm0, %v3930_v9 }
  0x35   : > { %3738 = vmatmul.mubr.msk.bf16.gmra.mrb[16].mxu0 %vm300_vm0, %v3931_v10 }
  0x36   : > { %3741 = vmatprep.mubr.msk.bf16.mxu0 %vm300_vm0, %v3932_v11 }
  0x3d   : > { %3742 = vmatmul.mubr.msk.bf16.gmra.mrb[20].mxu0 %vm300_vm0, %v3933_v12 }
  0x3e   : > { %3745 = vmatprep.mubr.msk.bf16.mxu0 %vm300_vm0, %v3934_v13 }
  0x45   : > { %3746 = vmatmul.mubr.msk.bf16.gmra.mrb[24].mxu0 %vm300_vm0, %v3935_v14 }
  0x46   : > { %3749 = vmatprep.mubr.msk.bf16.mxu0 %vm300_vm0, %v3936_v15 }
  0x4d   : > { %3750 = vmatmul.mubr.msk.bf16.gmra.mrb[28].mxu0 %vm300_vm0, %v3937_v16 }
  0xe8   : > { %v3723_v29 = vpop.f32.mrb[0].mxu0 }
  0xe9   : > { %v392_v30 = vadd.f32 %v3723_v29, %v4264_v28  ;;  %v383_v31 = vpop.f32.mrb[1].mxu0 }
  0xea   : > { %v384_v32 = vadd.f32 %v383_v31, %v4264_v28  ;;  %v3724_v33 = vpop.f32.mrb[2].mxu0 }
  0xeb   : > { %v522_v34 = vrot.slane %v392_v30, 4  ;;  %v395_v35 = vadd.f32 %v3724_v33, %v4264_v28  ;;  %v386_v36 = vpop.f32.mrb[3].mxu0 }
  0xec   : > { %v510_v38 = vrot.slane %v384_v32, 4  ;;  %v387_v39 = vadd.f32 %v386_v36, %v4264_v28 }
  0xed   : > { %v523_v40 = vadd.f32 %v522_v34, %v392_v30  ;;  %v528_v41 = vrot.slane %v395_v35, 4 }
  0xee   : > { %v511_v42 = vadd.f32 %v510_v38, %v384_v32  ;;  %v516_v43 = vrot.slane %v387_v39, 4 }
  0xef   : > { %v524_v44 = vrot.slane %v523_v40, 2  ;;  %v529_v45 = vadd.f32 %v528_v41, %v395_v35 }
  0xf0   : > { %v512_v46 = vrot.slane %v511_v42, 2  ;;  %v517_v47 = vadd.f32 %v516_v43, %v387_v39  ;;  %v3727_v48 = vpop.f32.mrb[4].mxu0 }
  0xf1   : > { %v525_v49 = vadd.f32 %v524_v44, %v523_v40  ;;  %v530_v50 = vrot.slane %v529_v45, 2  ;;  %v4274_v51 = vadd.f32 %v3727_v48, %v4264_v28  ;;  %v399_v52 = vpop.f32.mrb[5].mxu0 }
  0xf2   : > { %v513_v53 = vadd.f32 %v512_v46, %v511_v42  ;;  %v518_v54 = vrot.slane %v517_v47, 2  ;;  %v4277_v55 = vadd.f32 %v399_v52, %v4264_v28  ;;  %v3728_v56 = vpop.f32.mrb[6].mxu0 }
  0xf3   : > { %v526_v57 = vrot.slane %v525_v49, 1  ;;  %v531_v58 = vadd.f32 %v530_v50, %v529_v45  ;;  %v546_v59 = vrot.slane %v4274_v51, 4  ;;  %v4281_v60 = vadd.f32 %v3728_v56, %v4264_v28  ;;  %v402_v61 = vpop.f32.mrb[7].mxu0 }
  0xf4   : > { %v514_v62 = vrot.slane %v513_v53, 1  ;;  %v519_v63 = vadd.f32 %v518_v54, %v517_v47  ;;  %v534_v0 = vrot.slane %v4277_v55, 4  ;;  %v4285_v1 = vadd.f32 %v402_v61, %v4264_v28 }
  0xf5   : > { %v527_v2 = vadd.f32 %v526_v57, %v525_v49  ;;  %v532_v3 = vrot.slane %v531_v58, 1  ;;  %v547_v4 = vadd.f32 %v546_v59, %v4274_v51  ;;  %v552_v5 = vrot.slane %v4281_v60, 4 }
  0xf6   : > { %v515_v6 = vadd.f32 %v514_v62, %v513_v53  ;;  %v520_v7 = vrot.slane %v519_v63, 1  ;;  %v535_v8 = vadd.f32 %v534_v0, %v4277_v55  ;;  %v540_v9 = vrot.slane %v4285_v1, 4 }
  0xf7   : > { %v704_v10 = vmul.f32 0.125, %v527_v2  ;;  %v533_v11 = vadd.f32 %v532_v3, %v531_v58  ;;  %v548_v12 = vrot.slane %v547_v4, 2  ;;  %v553_v13 = vadd.f32 %v552_v5, %v4281_v60 }
  0xf8   : > { %v702_v14 = vmul.f32 0.125, %v515_v6  ;;  %v521_v15 = vadd.f32 %v520_v7, %v519_v63  ;;  %v536_v16 = vrot.slane %v535_v8, 2  ;;  %v541_v17 = vadd.f32 %v540_v9, %v4285_v1  ;;  %v4293_v18 = vpop.f32.mrb[8].mxu0 }
  0xf9   : > { %v4295_v19 = vsub.f32 %v392_v30, %v704_v10  ;;  %v705_v20 = vmul.f32 0.125, %v533_v11  ;;  %v549_v21 = vadd.f32 %v548_v12, %v547_v4  ;;  %v554_v22 = vrot.slane %v553_v13, 2  ;;  %v4297_v23 = vpop.f32.mrb[9].mxu0 }
  0xfa   : > { %v4299_v26 = vsub.f32 %v384_v32, %v702_v14  ;;  %v703_v27 = vmul.f32 0.125, %v521_v15  ;;  %v537_v29 = vadd.f32 %v536_v16, %v535_v8  ;;  %v542_v31 = vrot.slane %v541_v17, 2  ;;  %v4301_v33 = vpop.f32.mrb[10].mxu0 }
  0xfb   : > { %v768_v34 = vmul.f32 %v4295_v19, %v4295_v19  ;;  %v4305_v36 = vsub.f32 %v395_v35, %v705_v20  ;;  %v550_v37 = vrot.slane %v549_v21, 1  ;;  %v555_v30 = vadd.f32 %v554_v22, %v553_v13  ;;  %v4307_v38 = vpop.f32.mrb[11].mxu0 }
  0xfc   : > { %v766_v40 = vmul.f32 %v4299_v26, %v4299_v26  ;;  %v4311_v41 = vsub.f32 %v387_v39, %v703_v27  ;;  %v538_v32 = vrot.slane %v537_v29, 1  ;;  %v543_v42 = vadd.f32 %v542_v31, %v541_v17 }
  0xfd   : > { %v810_v43 = vrot.slane %v768_v34, 4  ;;  %v769_v44 = vmul.f32 %v4305_v36, %v4305_v36  ;;  %v551_v45 = vadd.f32 %v550_v37, %v549_v21  ;;  %v556_v46 = vrot.slane %v555_v30, 1 }
  0xfe   : > { %v798_v47 = vrot.slane %v766_v40, 4  ;;  %v767_v35 = vmul.f32 %v4311_v41, %v4311_v41  ;;  %v539_v48 = vadd.f32 %v538_v32, %v537_v29  ;;  %v544_v49 = vrot.slane %v543_v42, 1 }
  0xff   : > { %v811_v50 = vadd.f32 %v810_v43, %v768_v34  ;;  %v816_v52 = vrot.slane %v769_v44, 4  ;;  %v708_v53 = vmul.f32 0.125, %v551_v45  ;;  %v557_v54 = vadd.f32 %v556_v46, %v555_v30 }
 0x100   : > { %v799_v39 = vadd.f32 %v798_v47, %v766_v40  ;;  %v804_v56 = vrot.slane %v767_v35, 4  ;;  %v706_v57 = vmul.f32 0.125, %v539_v48  ;;  %v545_v58 = vadd.f32 %v544_v49, %v543_v42  ;;  %v4317_v59 = vpop.f32.mrb[12].mxu0 }
 0x101   : > { %v812_v61 = vrot.slane %v811_v50, 2  ;;  %v817_v62 = vadd.f32 %v816_v52, %v769_v44  ;;  %v4320_v63 = vsub.f32 %v4274_v51, %v708_v53  ;;  %v709_v0 = vmul.f32 0.125, %v557_v54  ;;  %v4322_v2 = vpop.f32.mrb[13].mxu0 }
 0x102   : > { %v800_v3 = vrot.slane %v799_v39, 2  ;;  %v805_v4 = vadd.f32 %v804_v56, %v767_v35  ;;  %v4325_v5 = vsub.f32 %v4277_v55, %v706_v57  ;;  %v707_v6 = vmul.f32 0.125, %v545_v58  ;;  %v4327_v7 = vpop.f32.mrb[14].mxu0 }
 0x103   : > { %v813_v8 = vadd.f32 %v812_v61, %v811_v50  ;;  %v818_v9 = vrot.slane %v817_v62, 2  ;;  %v772_v10 = vmul.f32 %v4320_v63, %v4320_v63  ;;  %v4332_v11 = vsub.f32 %v4281_v60, %v709_v0  ;;  %v4334_v51 = vpop.f32.mrb[15].mxu0 }
 0x104   : > { %v801_v12 = vadd.f32 %v800_v3, %v799_v39  ;;  %v806_v13 = vrot.slane %v805_v4, 2  ;;  %v770_v14 = vmul.f32 %v4325_v5, %v4325_v5  ;;  %v4339_v55 = vsub.f32 %v4285_v1, %v707_v6 }
 0x105   : > { %v814_v15 = vrot.slane %v813_v8, 1  ;;  %v819_v16 = vadd.f32 %v818_v9, %v817_v62  ;;  %v834_v17 = vrot.slane %v772_v10, 4  ;;  %v773_v20 = vmul.f32 %v4332_v11, %v4332_v11 }
 0x106   : > { %v802_v21 = vrot.slane %v801_v12, 1  ;;  %v807_v22 = vadd.f32 %v806_v13, %v805_v4  ;;  %v822_v60 = vrot.slane %v770_v14, 4  ;;  %v771_v27 = vmul.f32 %v4339_v55, %v4339_v55 }
 0x107   : > { %v815_v29 = vadd.f32 %v814_v15, %v813_v8  ;;  %v820_v31 = vrot.slane %v819_v16, 1  ;;  %v835_v34 = vadd.f32 %v834_v17, %v772_v10  ;;  %v840_v37 = vrot.slane %v773_v20, 4 }
 0x108   : > { %v803_v30 = vadd.f32 %v802_v21, %v801_v12  ;;  %v808_v40 = vrot.slane %v807_v22, 1  ;;  %v823_v1 = vadd.f32 %v822_v60, %v770_v14  ;;  %v828_v32 = vrot.slane %v771_v27, 4  ;;  %v4345_v42 = vpop.f32.mrb[16].mxu0 }
 0x109   : > { %v992_v43 = vmul.f32 0.125, %v815_v29  ;;  %v821_v44 = vadd.f32 %v820_v31, %v819_v16  ;;  %v836_v45 = vrot.slane %v835_v34, 2  ;;  %v841_v46 = vadd.f32 %v840_v37, %v773_v20  ;;  %v4347_v47 = vpop.f32.mrb[17].mxu0 }
 0x10a   : > { %v990_v35 = vmul.f32 0.125, %v803_v30  ;;  %v809_v48 = vadd.f32 %v808_v40, %v807_v22  ;;  %v824_v49 = vrot.slane %v823_v1, 2  ;;  %v829_v50 = vadd.f32 %v828_v32, %v771_v27  ;;  %v4349_v52 = vpop.f32.mrb[18].mxu0 }
 0x10b   : > { %v1024_v53 = vadd.f32 1e-05, %v992_v43  ;;  %v993_v54 = vmul.f32 0.125, %v821_v44  ;;  %v837_v39 = vadd.f32 %v836_v45, %v835_v34  ;;  %v842_v56 = vrot.slane %v841_v46, 2  ;;  %v4351_v57 = vpop.f32.mrb[19].mxu0 }
 0x10c   : > { %v1022_v58 = vadd.f32 1e-05, %v990_v35  ;;  %v991_v61 = vmul.f32 0.125, %v809_v48  ;;  %v825_v62 = vadd.f32 %v824_v49, %v823_v1  ;;  %v830_v0 = vrot.slane %v829_v50, 2 }
 0x10d   : > { %3962 = vrsqrt.f32 %v1024_v53  ;;  %v1025_v3 = vadd.f32 1e-05, %v993_v54  ;;  %v838_v4 = vrot.slane %v837_v39, 1  ;;  %v843_v6 = vadd.f32 %v842_v56, %v841_v46 }
 0x10e   : > { %3964 = vrsqrt.f32 %v1022_v58  ;;  %v826_v8 = vrot.slane %v825_v62, 1  ;;  %v831_v9 = vadd.f32 %v830_v0, %v829_v50  ;;  %v1023_v10 = vadd.f32 1e-05, %v991_v61 }
 0x10f   : > { %v839_v12 = vadd.f32 %v838_v4, %v837_v39  ;;  %v844_v13 = vrot.slane %v843_v6, 1  ;;  %v4355_v14 = vadd.f32 %v4293_v18, %v4264_v28  ;;  %3966 = vrsqrt.f32 %v1025_v3 }
 0x110   : > { %v827_v15 = vadd.f32 %v826_v8, %v825_v62  ;;  %v832_v16 = vrot.slane %v831_v9, 1  ;;  %v4359_v17 = vadd.f32 %v4297_v23, %v4264_v28  ;;  %v4361_v20 = vpop.f32.mrb[20].mxu0  ;;  %v4366_v27 = vadd.f32 %v4301_v33, %v4264_v28 }
 0x111   : > { %v996_v21 = vmul.f32 0.125, %v839_v12  ;;  %v845_v22 = vadd.f32 %v844_v13, %v843_v6  ;;  %v570_v60 = vrot.slane %v4355_v14, 4  ;;  %v4368_v29 = vpop.f32.mrb[21].mxu0  ;;  %v4373_v23 = vadd.f32 %v4307_v38, %v4264_v28 }
 0x112   : > { %v994_v18 = vmul.f32 0.125, %v827_v15  ;;  %v833_v31 = vadd.f32 %v832_v16, %v831_v9  ;;  %v558_v34 = vrot.slane %v4359_v17, 4  ;;  %v4375_v37 = vpop.f32.mrb[22].mxu0  ;;  %v576_v32 = vrot.slane %v4366_v27, 4 }
 0x113   : > { %v1028_v30 = vadd.f32 1e-05, %v996_v21  ;;  %v997_v40 = vmul.f32 0.125, %v845_v22  ;;  %v571_v1 = vadd.f32 %v570_v60, %v4355_v14  ;;  %v4379_v33 = vpop.f32.mrb[23].mxu0  ;;  %v564_v46 = vrot.slane %v4373_v23, 4 }
 0x114   : > { %v1026_v43 = vadd.f32 1e-05, %v994_v18  ;;  %v995_v44 = vmul.f32 0.125, %v833_v31  ;;  %v559_v45 = vadd.f32 %v558_v34, %v4359_v17  ;;  %v577_v48 = vadd.f32 %v576_v32, %v4366_v27 }
 0x115   : > { %3968 = vrsqrt.f32 %v1028_v30  ;;  %v1029_v35 = vadd.f32 1e-05, %v997_v40  ;;  %v572_v38 = vrot.slane %v571_v1, 2  ;;  %v565_v50 = vadd.f32 %v564_v46, %v4373_v23 }
 0x116   : > { %3970 = vrsqrt.f32 %v1026_v43  ;;  %v560_v49 = vrot.slane %v559_v45, 2  ;;  %v578_v39 = vrot.slane %v577_v48, 2  ;;  %v4387_v56 = vadd.f32 %v4317_v59, %v4264_v28 }
 0x117   : > { %v3963_v53 = vpop.eup %3962  ;;  %3972 = vrsqrt.f32 %v1023_v10  ;;  %v573_v54 = vadd.f32 %v572_v38, %v571_v1  ;;  %v1027_v61 = vadd.f32 1e-05, %v995_v44  ;;  %v566_v0 = vrot.slane %v565_v50, 2 }
 0x118   : > { %v4389_v58 = vpop.eup %3964  ;;  %3974 = vrsqrt.f32 %v1029_v35  ;;  %v561_v62 = vadd.f32 %v560_v49, %v559_v45  ;;  %v4391_v3 = vpop.f32.mrb[24].mxu0  ;;  %v579_v6 = vadd.f32 %v578_v39, %v577_v48  ;;  %v594_v8 = vrot.slane %v4387_v56, 4 }
 0x119   : > { %v574_v4 = vrot.slane %v573_v54, 1  ;;  %v4396_v9 = vadd.f32 %v4322_v2, %v4264_v28  ;;  %v4398_v10 = vpop.f32.mrb[25].mxu0  ;;  %v3967_v59 = vpop.eup %3966  ;;  %v4401_v12 = vmul.f32 %v3963_v53, %v4295_v19  ;;  %v567_v15 = vadd.f32 %v566_v0, %v565_v50 }
 0x11a   : > { %v562_v13 = vrot.slane %v561_v62, 1  ;;  %v4405_v16 = vadd.f32 %v4327_v7, %v4264_v28  ;;  %v4407_v21 = vpop.f32.mrb[26].mxu0  ;;  %v580_v60 = vrot.slane %v579_v6, 1  ;;  %v595_v18 = vadd.f32 %v594_v8, %v4387_v56 }
 0x11b   : > { %v575_v22 = vadd.f32 %v574_v4, %v573_v54  ;;  %v582_v2 = vrot.slane %v4396_v9, 4  ;;  %v4411_v31 = vpop.f32.mrb[27].mxu0  ;;  %v568_v30 = vrot.slane %v567_v15, 1  ;;  %v4416_v40 = vadd.f32 %v4334_v51, %v4264_v28 }
 0x11c   : > { %v563_v34 = vadd.f32 %v562_v13, %v561_v62  ;;  %v600_v19 = vrot.slane %v4405_v16, 4  ;;  %v581_v1 = vadd.f32 %v580_v60, %v579_v6  ;;  %v596_v32 = vrot.slane %v595_v18, 2 }
 0x11d   : > { %v712_v7 = vmul.f32 0.125, %v575_v22  ;;  %v583_v43 = vadd.f32 %v582_v2, %v4396_v9  ;;  %3976 = vrsqrt.f32 %v1027_v61  ;;  %v569_v45 = vadd.f32 %v568_v30, %v567_v15 }
 0x11e   : > { %v710_v44 = vmul.f32 0.125, %v563_v34  ;;  %v601_v46 = vadd.f32 %v600_v19, %v4405_v16  ;;  %v713_v48 = vmul.f32 0.125, %v581_v1  ;;  %v597_v49 = vadd.f32 %v596_v32, %v595_v18 }
 0x11f   : > { %v3969_v35 = vpop.eup %3968  ;;  %v4421_v38 = vsub.f32 %v4355_v14, %v712_v7  ;;  %v584_v50 = vrot.slane %v583_v43, 2  ;;  %v4424_v51 = vmul.f32 %v3967_v59, %v4305_v36  ;;  %v711_v39 = vmul.f32 0.125, %v569_v45 }
 0x120   : > { %v3971_v53 = vpop.eup %3970  ;;  %v4427_v54 = vsub.f32 %v4359_v17, %v710_v44  ;;  %v602_v61 = vrot.slane %v601_v46, 2  ;;  %v4429_v62 = vpop.f32.mrb[28].mxu0  ;;  %v4436_v4 = vsub.f32 %v4366_v27, %v713_v48  ;;  %v598_v6 = vrot.slane %v597_v49, 1 }
 0x121   : > { %6168 = vst [vmem:[#allocation3_spill] sm:$0xff] %v4424_v51  ;;  %v4431_v0 = vpop.eup %3972  ;;  %v776_v14 = vmul.f32 %v4421_v38, %v4421_v38  ;;  %v588_v8 = vrot.slane %v4416_v40, 4  ;;  %v4439_v36 = vpop.f32.mrb[29].mxu0  ;;  %v4444_v17 = vmul.f32 %v3969_v35, %v4320_v63  ;;  %v4449_v15 = vsub.f32 %v4373_v23, %v711_v39 }
 0x122   : > { %v4441_v59 = vpop.eup %3974  ;;  %v774_v13 = vmul.f32 %v4427_v54, %v4427_v54  ;;  %v585_v22 = vadd.f32 %v584_v50, %v583_v43  ;;  %v4451_v60 = vpop.f32.mrb[30].mxu0  ;;  %v4454_v27 = vmul.f32 %v3971_v53, %v4325_v5  ;;  %v777_v2 = vmul.f32 %v4436_v4, %v4436_v4 }
 0x123   : > { %6169 = vst [vmem:[#allocation4_spill] sm:$0xff] %v4444_v17  ;;  %v858_v18 = vrot.slane %v776_v14, 4  ;;  %v599_v34 = vadd.f32 %v598_v6, %v597_v49  ;;  %v4458_v30 = vpop.f32.mrb[31].mxu0  ;;  %v775_v19 = vmul.f32 %v4449_v15, %v4449_v15  ;;  %v603_v23 = vadd.f32 %v602_v61, %v601_v46 }
 0x124   : > { %6170 = vst [vmem:[#allocation5_spill] sm:$0xff] %v4454_v27  ;;  %v846_v63 = vrot.slane %v774_v13, 4  ;;  %v586_v7 = vrot.slane %v585_v22, 1  ;;  %v864_v32 = vrot.slane %v777_v2, 4  ;;  %v589_v44 = vadd.f32 %v588_v8, %v4416_v40 }
 0x125   : > { %v859_v1 = vadd.f32 %v858_v18, %v776_v14  ;;  %v716_v43 = vmul.f32 0.125, %v599_v34  ;;  %v852_v45 = vrot.slane %v775_v19, 4  ;;  %v604_v48 = vrot.slane %v603_v23, 1 }
 0x126   : > { %v847_v5 = vadd.f32 %v846_v63, %v774_v13  ;;  %v587_v35 = vadd.f32 %v586_v7, %v585_v22  ;;  %v865_v53 = vadd.f32 %v864_v32, %v777_v2  ;;  %v590_v39 = vrot.slane %v589_v44, 2 }
 0x127   : > { %v860_v50 = vrot.slane %v859_v1, 2  ;;  %v4464_v49 = vsub.f32 %v4387_v56, %v716_v43  ;;  %v4466_v6 = vpop.eup %3976  ;;  %v853_v17 = vadd.f32 %v852_v45, %v775_v19  ;;  %v605_v61 = vadd.f32 %v604_v48, %v603_v23 }
 0x128   : > { %v848_v25 = vrot.slane %v847_v5, 2  ;;  %v714_v46 = vmul.f32 0.125, %v587_v35  ;;  %v866_v18 = vrot.slane %v865_v53, 2  ;;  %v591_v13 = vadd.f32 %v590_v39, %v589_v44 }
 0x129   : > { %v861_v14 = vadd.f32 %v860_v50, %v859_v1  ;;  %v780_v8 = vmul.f32 %v4464_v49, %v4464_v49  ;;  %v854_v34 = vrot.slane %v853_v17, 2  ;;  %v717_v56 = vmul.f32 0.125, %v605_v61 }
 0x12a   : > { %v849_v22 = vadd.f32 %v848_v25, %v847_v5  ;;  %v4471_v2 = vsub.f32 %v4396_v9, %v714_v46  ;;  %v867_v7 = vadd.f32 %v866_v18, %v865_v53  ;;  %v592_v43 = vrot.slane %v591_v13, 1 }
 0x12b   : > { %v862_v63 = vrot.slane %v861_v14, 1  ;;  %v882_v32 = vrot.slane %v780_v8, 4  ;;  %v855_v19 = vadd.f32 %v854_v34, %v853_v17  ;;  %v4476_v1 = vsub.f32 %v4405_v16, %v717_v56 }
 0x12c   : > { %v850_v27 = vrot.slane %v849_v22, 1  ;;  %v778_v23 = vmul.f32 %v4471_v2, %v4471_v2  ;;  %v868_v44 = vrot.slane %v867_v7, 1  ;;  %v593_v5 = vadd.f32 %v592_v43, %v591_v13 }
 0x12d   : > { %v863_v45 = vadd.f32 %v862_v63, %v861_v14  ;;  %v883_v25 = vadd.f32 %v882_v32, %v780_v8  ;;  %v856_v9 = vrot.slane %v855_v19, 1  ;;  %v781_v50 = vmul.f32 %v4476_v1, %v4476_v1 }
 0x12e   : > { %v851_v35 = vadd.f32 %v850_v27, %v849_v22  ;;  %v870_v48 = vrot.slane %v778_v23, 4  ;;  %v869_v39 = vadd.f32 %v868_v44, %v867_v7  ;;  %v715_v17 = vmul.f32 0.125, %v593_v5 }
 0x12f   : > { %v1000_v53 = vmul.f32 0.125, %v863_v45  ;;  %v884_v46 = vrot.slane %v883_v25, 2  ;;  %v857_v18 = vadd.f32 %v856_v9, %v855_v19  ;;  %v888_v51 = vrot.slane %v781_v50, 4 }
 0x130   : > { %v998_v61 = vmul.f32 0.125, %v851_v35  ;;  %v871_v34 = vadd.f32 %v870_v48, %v778_v23  ;;  %v1001_v56 = vmul.f32 0.125, %v869_v39  ;;  %v4481_v8 = vsub.f32 %v4416_v40, %v715_v17 }
 0x131   : > { %v1032_v16 = vadd.f32 1e-05, %v1000_v53  ;;  %v885_v14 = vadd.f32 %v884_v46, %v883_v25  ;;  %v999_v13 = vmul.f32 0.125, %v857_v18  ;;  %v889_v63 = vadd.f32 %v888_v51, %v781_v50 }
 0x132   : > { %v1030_v27 = vadd.f32 1e-05, %v998_v61  ;;  %v872_v22 = vrot.slane %v871_v34, 2  ;;  %v1033_v32 = vadd.f32 1e-05, %v1001_v56  ;;  %v779_v7 = vmul.f32 %v4481_v8, %v4481_v8 }
 0x133   : > { %3978 = vrsqrt.f32 %v1032_v16  ;;  %v886_v43 = vrot.slane %v885_v14, 1  ;;  %v1031_v19 = vadd.f32 1e-05, %v999_v13  ;;  %v890_v45 = vrot.slane %v889_v63, 2 }
 0x134   : > { %3980 = vrsqrt.f32 %v1030_v27  ;;  %v873_v23 = vadd.f32 %v872_v22, %v871_v34  ;;  %v876_v25 = vrot.slane %v779_v7, 4  ;;  %v4487_v40 = vadd.f32 %v4345_v42, %v4264_v28 }
 0x135   : > { %3982 = vrsqrt.f32 %v1033_v32  ;;  %v887_v44 = vadd.f32 %v886_v43, %v885_v14  ;;  %v891_v51 = vadd.f32 %v890_v45, %v889_v63  ;;  %v4491_v35 = vadd.f32 %v4347_v47, %v4264_v28 }
 0x136   : > { %3984 = vrsqrt.f32 %v1031_v19  ;;  %v874_v5 = vrot.slane %v873_v23, 1  ;;  %v877_v48 = vadd.f32 %v876_v25, %v779_v7  ;;  %v618_v50 = vrot.slane %v4487_v40, 4 }
 0x137   : > { %v1004_v9 = vmul.f32 0.125, %v887_v44  ;;  %v4496_v53 = vadd.f32 %v4349_v52, %v4264_v28  ;;  %v892_v46 = vrot.slane %v891_v51, 1  ;;  %v606_v42 = vrot.slane %v4491_v35, 4 }
 0x138   : > { %v875_v39 = vadd.f32 %v874_v5, %v873_v23  ;;  %v4501_v17 = vadd.f32 %v4351_v57, %v4264_v28  ;;  %v878_v18 = vrot.slane %v877_v48, 2  ;;  %v619_v47 = vadd.f32 %v618_v50, %v4487_v40 }
 0x139   : > { %v1036_v61 = vadd.f32 1e-05, %v1004_v9  ;;  %v624_v34 = vrot.slane %v4496_v53, 4  ;;  %v893_v56 = vadd.f32 %v892_v46, %v891_v51  ;;  %v607_v14 = vadd.f32 %v606_v42, %v4491_v35 }
 0x13a   : > { %v1002_v16 = vmul.f32 0.125, %v875_v39  ;;  %v612_v52 = vrot.slane %v4501_v17, 4  ;;  %v4509_v27 = vmul.f32 %v4441_v59, %v4332_v11  ;;  %v879_v13 = vadd.f32 %v878_v18, %v877_v48 }
 0x13b   : > { %v620_v22 = vrot.slane %v619_v47, 2  ;;  %v625_v57 = vadd.f32 %v624_v34, %v4496_v53  ;;  %v1005_v32 = vmul.f32 0.125, %v893_v56  ;;  %v608_v43 = vrot.slane %v607_v14, 2 }
 0x13c   : > { %v1034_v63 = vadd.f32 1e-05, %v1002_v16  ;;  %v613_v7 = vadd.f32 %v612_v52, %v4501_v17  ;;  %v4515_v23 = vmul.f32 %v4466_v6, %v4339_v55  ;;  %v880_v45 = vrot.slane %v879_v13, 1 }
 0x13d   : > { %v3979_v19 = vpop.eup %3978  ;;  %v621_v44 = vadd.f32 %v620_v22, %v619_v47  ;;  %v626_v25 = vrot.slane %v625_v57, 2  ;;  %3986 = vrsqrt.f32 %v1036_v61  ;;  %v609_v59 = vadd.f32 %v608_v43, %v607_v14 }
 0x13e   : > { %v3981_v5 = vpop.eup %3980  ;;  %v4518_v11 = vmul.f32 %v3979_v19, %v4421_v38  ;;  %v4522_v51 = vadd.f32 %v4361_v20, %v4264_v28  ;;  %3988 = vrsqrt.f32 %v1034_v63  ;;  %v881_v48 = vadd.f32 %v880_v45, %v879_v13 }
 0x13f   : > { %v3983_v9 = vpop.eup %3982  ;;  %v622_v50 = vrot.slane %v621_v44, 1  ;;  %v627_v39 = vadd.f32 %v626_v25, %v625_v57  ;;  %v4525_v6 = vmul.f32 %v3981_v5, %v4427_v54  ;;  %v1037_v46 = vadd.f32 1e-05, %v1005_v32 }
 0x140   : > { %v3985_v55 = vpop.eup %3984  ;;  %v610_v42 = vrot.slane %v609_v59, 1  ;;  %v614_v18 = vrot.slane %v613_v7, 2  ;;  %v4528_v38 = vmul.f32 %v3983_v9, %v4436_v4  ;;  %v1003_v61 = vmul.f32 0.125, %v881_v48 }
 0x141   : > { %v623_v47 = vadd.f32 %v622_v50, %v621_v44  ;;  %v628_v34 = vrot.slane %v627_v39, 1  ;;  %v642_v56 = vrot.slane %v4522_v51, 4  ;;  %v4533_v14 = vadd.f32 %v4368_v29, %v4264_v28 }
 0x142   : > { %v611_v20 = vadd.f32 %v610_v42, %v609_v59  ;;  %v615_v16 = vadd.f32 %v614_v18, %v613_v7  ;;  %v1035_v52 = vadd.f32 1e-05, %v1003_v61  ;;  %v4537_v22 = vadd.f32 %v4375_v37, %v4264_v28 }
 0x143   : > { %v720_v54 = vmul.f32 0.125, %v623_v47  ;;  %v629_v13 = vadd.f32 %v628_v34, %v627_v39  ;;  %v643_v63 = vadd.f32 %v642_v56, %v4522_v51  ;;  %v630_v32 = vrot.slane %v4533_v14, 4 }
 0x144   : > { %v718_v4 = vmul.f32 0.125, %v611_v20  ;;  %v616_v57 = vrot.slane %v615_v16, 1  ;;  %3990 = vrsqrt.f32 %v1037_v46  ;;  %v648_v29 = vrot.slane %v4537_v22, 4 }
 0x145   : > { %v4542_v43 = vsub.f32 %v4487_v40, %v720_v54  ;;  %v721_v7 = vmul.f32 0.125, %v629_v13  ;;  %v4546_v19 = vmul.f32 %v3985_v55, %v4449_v15  ;;  %v644_v44 = vrot.slane %v643_v63, 2 }
 0x146   : > { %v4549_v45 = vsub.f32 %v4491_v35, %v718_v4  ;;  %v617_v37 = vadd.f32 %v616_v57, %v615_v16  ;;  %v631_v40 = vadd.f32 %v630_v32, %v4533_v14  ;;  %v649_v59 = vadd.f32 %v648_v29, %v4537_v22 }
 0x147   : > { %v784_v25 = vmul.f32 %v4542_v43, %v4542_v43  ;;  %v4554_v5 = vsub.f32 %v4496_v53, %v721_v7  ;;  %v3987_v9 = vpop.eup %3986  ;;  %3992 = vrsqrt.f32 %v1035_v52  ;;  %v645_v35 = vadd.f32 %v644_v44, %v643_v63  ;;  %v3946_v52 = vld [vmem:[%s6160_s1 + $0x80] sm:$0xff]  }
 0x148   : > { %v782_v15 = vmul.f32 %v4549_v45, %v4549_v45  ;;  %v719_v48 = vmul.f32 0.125, %v617_v37  ;;  %v3989_v50 = vpop.eup %3988  ;;  %v632_v46 = vrot.slane %v631_v40, 2  ;;  %v4564_v53 = vadd.f32 %v4379_v33, %v4264_v28  ;;  %3801 = vmatprep.subr.bf16.mxu0 %v3946_v52 }
 0x149   : > { %v906_v39 = vrot.slane %v784_v25, 4  ;;  %v785_v55 = vmul.f32 %v4554_v5, %v4554_v5  ;;  %v646_v61 = vrot.slane %v645_v35, 1  ;;  %v650_v47 = vrot.slane %v649_v59, 2  ;;  %3802 = vmatpush3.bf16.msra.mxu0 %v3946_v52 }
 0x14a   : > { %v894_v42 = vrot.slane %v782_v15, 4  ;;  %v4567_v18 = vsub.f32 %v4501_v17, %v719_v48  ;;  %v4570_v34 = vmul.f32 %v3987_v9, %v4464_v49  ;;  %v633_v56 = vadd.f32 %v632_v46, %v631_v40 }
 0x14b   : > { %v907_v20 = vadd.f32 %v906_v39, %v784_v25  ;;  %v912_v16 = vrot.slane %v785_v55, 4  ;;  %v647_v13 = vadd.f32 %v646_v61, %v645_v35  ;;  %v651_v4 = vadd.f32 %v650_v47, %v649_v59 }
 0x14c   : > { %v895_v54 = vadd.f32 %v894_v42, %v782_v15  ;;  %v783_v33 = vmul.f32 %v4567_v18, %v4567_v18  ;;  %v634_v63 = vrot.slane %v633_v56, 1  ;;  %v636_v32 = vrot.slane %v4564_v53, 4 }
 0x14d   : > { %v908_v17 = vrot.slane %v907_v20, 2  ;;  %v913_v57 = vadd.f32 %v912_v16, %v785_v55  ;;  %v724_v29 = vmul.f32 0.125, %v647_v13  ;;  %v652_v37 = vrot.slane %v651_v4, 1 }
 0x14e   : > { %v896_v49 = vrot.slane %v895_v54, 2  ;;  %v900_v7 = vrot.slane %v783_v33, 4  ;;  %v4578_v44 = vpop.eup %3990  ;;  %v635_v9 = vadd.f32 %v634_v63, %v633_v56  ;;  %v637_v15 = vadd.f32 %v636_v32, %v4564_v53 }
 0x14f   : > { %v909_v25 = vadd.f32 %v908_v17, %v907_v20  ;;  %v914_v40 = vrot.slane %v913_v57, 2  ;;  %v4582_v59 = vmul.f32 %v3989_v50, %v4471_v2  ;;  %v4585_v39 = vsub.f32 %v4522_v51, %v724_v29 }
 0x150   : > { %v897_v48 = vadd.f32 %v896_v49, %v895_v54  ;;  %v901_v35 = vadd.f32 %v900_v7, %v783_v33  ;;  %v722_v42 = vmul.f32 0.125, %v635_v9  ;;  %v653_v61 = vadd.f32 %v652_v37, %v651_v4 }
 0x151   : > { %v910_v55 = vrot.slane %v909_v25, 1  ;;  %v915_v46 = vadd.f32 %v914_v40, %v913_v57  ;;  %v4587_v47 = vpop.eup %3992  ;;  %v788_v56 = vmul.f32 %v4585_v39, %v4585_v39  ;;  %v638_v52 = vrot.slane %v637_v15, 2 }
 0x152   : > { %v898_v16 = vrot.slane %v897_v48, 1  ;;  %v902_v20 = vrot.slane %v901_v35, 2  ;;  %v4592_v50 = vsub.f32 %v4533_v14, %v722_v42  ;;  %v725_v54 = vmul.f32 0.125, %v653_v61 }
 0x153   : > { %v911_v13 = vadd.f32 %v910_v55, %v909_v25  ;;  %v916_v2 = vrot.slane %v915_v46, 1  ;;  %v930_v17 = vrot.slane %v788_v56, 4  ;;  %v639_v57 = vadd.f32 %v638_v52, %v637_v15 }
 0x154   : > { %v899_v51 = vadd.f32 %v898_v16, %v897_v48  ;;  %v903_v33 = vadd.f32 %v902_v20, %v901_v35  ;;  %v786_v32 = vmul.f32 %v4592_v50, %v4592_v50  ;;  %v4597_v49 = vsub.f32 %v4537_v22, %v725_v54 }
 0x155   : > { %v1008_v63 = vmul.f32 0.125, %v911_v13  ;;  %v917_v4 = vadd.f32 %v916_v2, %v915_v46  ;;  %v931_v37 = vadd.f32 %v930_v17, %v788_v56  ;;  %v640_v25 = vrot.slane %v639_v57, 1 }
 0x156   : > { %v1006_v7 = vmul.f32 0.125, %v899_v51  ;;  %v904_v29 = vrot.slane %v903_v33, 1  ;;  %v918_v9 = vrot.slane %v786_v32, 4  ;;  %v789_v48 = vmul.f32 %v4597_v49, %v4597_v49 }
 0x157   : > { %v1040_v40 = vadd.f32 1e-05, %v1008_v63  ;;  %v1009_v14 = vmul.f32 0.125, %v917_v4  ;;  %v932_v55 = vrot.slane %v931_v37, 2  ;;  %v641_v46 = vadd.f32 %v640_v25, %v639_v57 }
 0x158   : > { %v1038_v35 = vadd.f32 1e-05, %v1006_v7  ;;  %v905_v15 = vadd.f32 %v904_v29, %v903_v33  ;;  %v919_v61 = vadd.f32 %v918_v9, %v786_v32  ;;  %v936_v16 = vrot.slane %v789_v48, 4 }
 0x159   : > { %3994 = vrsqrt.f32 %v1040_v40  ;;  %v1041_v42 = vadd.f32 1e-05, %v1009_v14  ;;  %v933_v20 = vadd.f32 %v932_v55, %v931_v37  ;;  %v723_v52 = vmul.f32 0.125, %v641_v46 }
 0x15a   : > { %3996 = vrsqrt.f32 %v1038_v35  ;;  %v1007_v22 = vmul.f32 0.125, %v905_v15  ;;  %v920_v56 = vrot.slane %v919_v61, 2  ;;  %v937_v13 = vadd.f32 %v936_v16, %v789_v48 }
 0x15b   : > { %3998 = vrsqrt.f32 %v1041_v42  ;;  %v4603_v2 = vadd.f32 %v4391_v3, %v4264_v28  ;;  %v934_v51 = vrot.slane %v933_v20, 1  ;;  %v4606_v33 = vsub.f32 %v4564_v53, %v723_v52 }
 0x15c   : > { %v1039_v54 = vadd.f32 1e-05, %v1007_v22  ;;  %v4610_v17 = vadd.f32 %v4398_v10, %v4264_v28  ;;  %v921_v57 = vadd.f32 %v920_v56, %v919_v61  ;;  %v938_v63 = vrot.slane %v937_v13, 2 }
 0x15d   : > { %v666_v4 = vrot.slane %v4603_v2, 4  ;;  %v4615_v32 = vadd.f32 %v4407_v21, %v4264_v28  ;;  %v935_v3 = vadd.f32 %v934_v51, %v933_v20  ;;  %v787_v7 = vmul.f32 %v4606_v33, %v4606_v33 }
 0x15e   : > { %4000 = vrsqrt.f32 %v1039_v54  ;;  %v654_v53 = vrot.slane %v4610_v17, 4  ;;  %v922_v29 = vrot.slane %v921_v57, 1  ;;  %v939_v37 = vadd.f32 %v938_v63, %v937_v13 }
 0x15f   : > { %v667_v10 = vadd.f32 %v666_v4, %v4603_v2  ;;  %v672_v25 = vrot.slane %v4615_v32, 4  ;;  %v1012_v40 = vmul.f32 0.125, %v935_v3  ;;  %v924_v14 = vrot.slane %v787_v7, 4 }
 0x160   : > { %v655_v9 = vadd.f32 %v654_v53, %v4610_v17  ;;  %v4625_v21 = vadd.f32 %v4411_v31, %v4264_v28  ;;  %v923_v48 = vadd.f32 %v922_v29, %v921_v57  ;;  %v940_v35 = vrot.slane %v939_v37, 1 }
 0x161   : > { %v668_v15 = vrot.slane %v667_v10, 2  ;;  %v673_v55 = vadd.f32 %v672_v25, %v4615_v32  ;;  %v1044_v46 = vadd.f32 1e-05, %v1012_v40  ;;  %v925_v42 = vadd.f32 %v924_v14, %v787_v7 }
 0x162   : > { %v656_v61 = vrot.slane %v655_v9, 2  ;;  %v660_v16 = vrot.slane %v4625_v21, 4  ;;  %v1010_v20 = vmul.f32 0.125, %v923_v48  ;;  %v941_v52 = vadd.f32 %v940_v35, %v939_v37 }
 0x163   : > { %v3995_v22 = vpop.eup %3994  ;;  %v669_v56 = vadd.f32 %v668_v15, %v667_v10  ;;  %v674_v13 = vrot.slane %v673_v55, 2  ;;  %v4631_v31 = vmul.f32 %v4578_v44, %v4476_v1  ;;  %v4635_v51 = vmul.f32 %v4587_v47, %v4481_v8 }
 0x164   : > { %v3997_v54 = vpop.eup %3996  ;;  %v926_v57 = vrot.slane %v925_v42, 2  ;;  %v657_v63 = vadd.f32 %v656_v61, %v655_v9  ;;  %4002 = vrsqrt.f32 %v1044_v46  ;;  %v1042_v3 = vadd.f32 1e-05, %v1010_v20 }
 0x165   : > { %v3999_v4 = vpop.eup %3998  ;;  %v1013_v7 = vmul.f32 0.125, %v941_v52  ;;  %v670_v53 = vrot.slane %v669_v56, 1  ;;  %v4638_v29 = vmul.f32 %v3995_v22, %v4542_v43  ;;  %v675_v25 = vadd.f32 %v674_v13, %v673_v55 }
 0x166   : > { %v927_v37 = vadd.f32 %v926_v57, %v925_v42  ;;  %v658_v10 = vrot.slane %v657_v63, 1  ;;  %v4641_v1 = vmul.f32 %v3997_v54, %v4549_v45  ;;  %v4644_v44 = vmul.f32 %v3999_v4, %v4554_v5 }
 0x167   : > { %v671_v8 = vadd.f32 %v670_v53, %v669_v56  ;;  %v661_v47 = vadd.f32 %v660_v16, %v4625_v21  ;;  %v676_v48 = vrot.slane %v675_v25, 1  ;;  %v4649_v43 = vadd.f32 %v4429_v62, %v4264_v28 }
 0x168   : > { %v4001_v40 = vpop.eup %4000  ;;  %v928_v14 = vrot.slane %v927_v37, 1  ;;  %v659_v9 = vadd.f32 %v658_v10, %v657_v63  ;;  %4004 = vrsqrt.f32 %v1042_v3  ;;  %v1045_v35 = vadd.f32 1e-05, %v1013_v7 }
 0x169   : > { %v728_v15 = vmul.f32 0.125, %v671_v8  ;;  %v662_v55 = vrot.slane %v661_v47, 2  ;;  %v677_v42 = vadd.f32 %v676_v48, %v675_v25  ;;  %v690_v5 = vrot.slane %v4649_v43, 4 }
 0x16a   : > { %v929_v45 = vadd.f32 %v928_v14, %v927_v37  ;;  %v726_v46 = vmul.f32 0.125, %v659_v9  ;;  %v4657_v22 = vadd.f32 %v4439_v36, %v4264_v28  ;;  %v4661_v62 = vadd.f32 %v4451_v60, %v4264_v28 }
 0x16b   : > { %v4653_v61 = vsub.f32 %v4603_v2, %v728_v15  ;;  %v663_v16 = vadd.f32 %v662_v55, %v661_v47  ;;  %v729_v56 = vmul.f32 0.125, %v677_v42  ;;  %v691_v13 = vadd.f32 %v690_v5, %v4649_v43 }
 0x16c   : > { %v1011_v20 = vmul.f32 0.125, %v929_v45  ;;  %v4664_v52 = vsub.f32 %v4610_v17, %v726_v46  ;;  %v678_v57 = vrot.slane %v4657_v22, 4  ;;  %v696_v36 = vrot.slane %v4661_v62, 4 }
 0x16d   : > { %v792_v2 = vmul.f32 %v4653_v61, %v4653_v61  ;;  %v664_v54 = vrot.slane %v663_v16, 1  ;;  %v4672_v63 = vmul.f32 %v4001_v40, %v4567_v18  ;;  %v4677_v17 = vsub.f32 %v4615_v32, %v729_v56 }
 0x16e   : > { %v790_v60 = vmul.f32 %v4664_v52, %v4664_v52  ;;  %v692_v4 = vrot.slane %v691_v13, 2  ;;  %v4003_v3 = vpop.eup %4002  ;;  %4006 = vrsqrt.f32 %v1045_v35  ;;  %v679_v37 = vadd.f32 %v678_v57, %v4657_v22 }
 0x16f   : > { %v954_v7 = vrot.slane %v792_v2, 4  ;;  %v665_v53 = vadd.f32 %v664_v54, %v663_v16  ;;  %v1043_v10 = vadd.f32 1e-05, %v1011_v20  ;;  %v793_v8 = vmul.f32 %v4677_v17, %v4677_v17 }
 0x170   : > { %v942_v25 = vrot.slane %v790_v60, 4  ;;  %v693_v18 = vadd.f32 %v692_v4, %v691_v13  ;;  %v680_v14 = vrot.slane %v679_v37, 2  ;;  %v697_v9 = vadd.f32 %v696_v36, %v4661_v62 }
 0x171   : > { %v955_v47 = vadd.f32 %v954_v7, %v792_v2  ;;  %v727_v40 = vmul.f32 0.125, %v665_v53  ;;  %v4684_v32 = vmul.f32 %v4003_v3, %v4585_v39  ;;  %v960_v35 = vrot.slane %v793_v8, 4 }
 0x172   : > { %v943_v48 = vadd.f32 %v942_v25, %v790_v60  ;;  %v694_v15 = vrot.slane %v693_v18, 1  ;;  %v4005_v55 = vpop.eup %4004  ;;  %v681_v42 = vadd.f32 %v680_v14, %v679_v37  ;;  %v698_v5 = vrot.slane %v697_v9, 2 }
 0x173   : > { %v956_v45 = vrot.slane %v955_v47, 2  ;;  %v4687_v46 = vsub.f32 %v4625_v21, %v727_v40  ;;  %4008 = vrsqrt.f32 %v1043_v10  ;;  %v961_v20 = vadd.f32 %v960_v35, %v793_v8 }
 0x174   : > { %v944_v16 = vrot.slane %v943_v48, 2  ;;  %v695_v56 = vadd.f32 %v694_v15, %v693_v18  ;;  %v682_v39 = vrot.slane %v681_v42, 1  ;;  %v699_v54 = vadd.f32 %v698_v5, %v697_v9 }
 0x175   : > { %v957_v13 = vadd.f32 %v956_v45, %v955_v47  ;;  %v791_v2 = vmul.f32 %v4687_v46, %v4687_v46  ;;  %v962_v36 = vrot.slane %v961_v20, 2  ;;  %v4693_v4 = vadd.f32 %v4458_v30, %v4264_v28 }
 0x176   : > { %v945_v57 = vadd.f32 %v944_v16, %v943_v48  ;;  %v732_v60 = vmul.f32 0.125, %v695_v56  ;;  %v683_v7 = vadd.f32 %v682_v39, %v681_v42  ;;  %v700_v53 = vrot.slane %v699_v54, 1 }
 0x177   : > { %v958_v21 = vrot.slane %v957_v13, 1  ;;  %v948_v3 = vrot.slane %v791_v2, 4  ;;  %v963_v10 = vadd.f32 %v962_v36, %v961_v20  ;;  %v684_v8 = vrot.slane %v4693_v4, 4 }
 0x178   : > { %v946_v37 = vrot.slane %v945_v57, 1  ;;  %v4696_v25 = vsub.f32 %v4649_v43, %v732_v60  ;;  %v4007_v18 = vpop.eup %4006  ;;  %v730_v14 = vmul.f32 0.125, %v683_v7  ;;  %v701_v9 = vadd.f32 %v700_v53, %v699_v54 }
 0x179   : > { %v959_v47 = vadd.f32 %v958_v21, %v957_v13  ;;  %v949_v40 = vadd.f32 %v948_v3, %v791_v2  ;;  %v964_v35 = vrot.slane %v963_v10, 1  ;;  %v685_v30 = vadd.f32 %v684_v8, %v4693_v4 }
 0x17a   : > { %v947_v48 = vadd.f32 %v946_v37, %v945_v57  ;;  %v796_v28 = vmul.f32 %v4696_v25, %v4696_v25  ;;  %v4703_v15 = vmul.f32 %v4005_v55, %v4592_v50  ;;  %v4706_v42 = vsub.f32 %v4657_v22, %v730_v14 }
 0x17b   : > { %v1016_v45 = vmul.f32 0.125, %v959_v47  ;;  %v950_v43 = vrot.slane %v949_v40, 2  ;;  %v965_v16 = vadd.f32 %v964_v35, %v963_v10  ;;  %v733_v56 = vmul.f32 0.125, %v701_v9 }
 0x17c   : > { %v1014_v5 = vmul.f32 0.125, %v947_v48  ;;  %v978_v20 = vrot.slane %v796_v28, 4  ;;  %v794_v39 = vmul.f32 %v4706_v42, %v4706_v42  ;;  %v686_v54 = vrot.slane %v685_v30, 2 }
 0x17d   : > { %v1048_v13 = vadd.f32 1e-05, %v1016_v45  ;;  %v951_v2 = vadd.f32 %v950_v43, %v949_v40  ;;  %v4009_v57 = vpop.eup %4008  ;;  %v1017_v60 = vmul.f32 0.125, %v965_v16  ;;  %v4711_v55 = vsub.f32 %v4661_v62, %v733_v56 }
 0x17e   : > { %v1046_v36 = vadd.f32 1e-05, %v1014_v5  ;;  %v979_v50 = vadd.f32 %v978_v20, %v796_v28  ;;  %v966_v21 = vrot.slane %v794_v39, 4  ;;  %v687_v3 = vadd.f32 %v686_v54, %v685_v30 }
 0x17f   : > { %4010 = vrsqrt.f32 %v1048_v13  ;;  %v952_v22 = vrot.slane %v951_v2, 1  ;;  %v1049_v7 = vadd.f32 1e-05, %v1017_v60  ;;  %v797_v37 = vmul.f32 %v4711_v55, %v4711_v55 }
 0x180   : > { %4012 = vrsqrt.f32 %v1046_v36  ;;  %v980_v53 = vrot.slane %v979_v50, 2  ;;  %v4716_v10 = vmul.f32 %v4007_v18, %v4597_v49  ;;  %v967_v47 = vadd.f32 %v966_v21, %v794_v39 }
 0x181   : > { %v953_v8 = vadd.f32 %v952_v22, %v951_v2  ;;  %v688_v40 = vrot.slane %v687_v3, 1  ;;  %4014 = vrsqrt.f32 %v1049_v7  ;;  %v984_v62 = vrot.slane %v797_v37, 4 }
 0x182   : > { %v981_v14 = vadd.f32 %v980_v53, %v979_v50  ;;  %v1086_v9 = vmul.f32 %v4389_v58, %v4299_v26  ;;  %v968_v35 = vrot.slane %v967_v47, 2  ;;  %v4721_v30 = vsub.s32 1, %v4252_v24  ;;  %v4154_v26 = vld [vmem:[%s6161_s2] sm:$0xff] }
 0x183   : > { %v1015_v48 = vmul.f32 0.125, %v953_v8  ;;  %v689_v28 = vadd.f32 %v688_v40, %v687_v3  ;;  %v985_v43 = vadd.f32 %v984_v62, %v797_v37  ;;  %v1087_v49 = vmul.f32 %v4431_v0, %v4311_v41  ;;  %v6173_v3 = vld [vmem:[#allocation3_spill] sm:$0xff] }
 0x184   : > { %6171 = vst [vmem:[#allocation6_spill] sm:$0xff] %v4721_v30  ;;  %v982_v45 = vrot.slane %v981_v14, 1  ;;  %v4726_v18 = vsub.s32 2, %v4252_v24  ;;  %v969_v16 = vadd.f32 %v968_v35, %v967_v47  ;;  %v4732_v58 = vrot.slane %v4154_v26, %v4721_v30 }
 0x185   : > { %v1047_v5 = vadd.f32 1e-05, %v1015_v48  ;;  %v731_v20 = vmul.f32 0.125, %v689_v28  ;;  %v4735_v56 = vmul.f32 %v4009_v57, %v4606_v33  ;;  %v986_v2 = vrot.slane %v985_v43, 2 }
 0x186   : > { %6172 = vst [vmem:[#allocation7_spill] sm:$0xff] %v4726_v18  ;;  %v983_v13 = vadd.f32 %v982_v45, %v981_v14  ;;  %v4738_v41 = vrot.slane %v4154_v26, %v4726_v18  ;;  %v970_v24 = vrot.slane %v969_v16, 1  ;;  %v1122_v39 = vmul.f32 %v4732_v58, %v1086_v9 }
 0x187   : > { %4016 = vrsqrt.f32 %v1047_v5  ;;  %v4741_v0 = vsub.f32 %v4693_v4, %v731_v20  ;;  %v987_v36 = vadd.f32 %v986_v2, %v985_v43  ;;  %v1123_v60 = vmul.f32 %v4732_v58, %v1087_v49  ;;  %v6174_v20 = vld [vmem:[#allocation5_spill] sm:$0xff] }
 0x188   : > { %v1020_v54 = vmul.f32 0.125, %v983_v13  ;;  %v1124_v33 = vmul.f32 %v4732_v58, %v4401_v12  ;;  %v971_v50 = vadd.f32 %v970_v24, %v969_v16  ;;  %v1158_v21 = vadd.f32 %v4738_v41, %v1122_v39 }
 0x189   : > { %v4011_v57 = vpop.eup %4010  ;;  %v795_v22 = vmul.f32 %v4741_v0, %v4741_v0  ;;  %v1125_v4 = vmul.f32 %v4732_v58, %v6173_v3  ;;  %v988_v8 = vrot.slane %v987_v36, 1  ;;  %v1159_v47 = vadd.f32 %v4738_v41, %v1123_v60 }
 0x18a   : > { %v4013_v7 = vpop.eup %4012  ;;  %v4753_v53 = vmul.f32 %v4011_v57, %v4653_v61  ;;  %v1052_v37 = vadd.f32 1e-05, %v1020_v54  ;;  %v1018_v40 = vmul.f32 0.125, %v971_v50  ;;  %v1190_v62 = vmax.f32 %v1158_v21, 0.0  ;;  %v6175_v54 = vld [vmem:[#allocation4_spill] sm:$0xff] }
 0x18b   : > { %v4757_v12 = vmul.f32 %v4013_v7, %v4664_v52  ;;  %v972_v14 = vrot.slane %v795_v22, 4  ;;  %v4015_v9 = vpop.eup %4014  ;;  %v989_v48 = vadd.f32 %v988_v8, %v987_v36  ;;  %v1191_v35 = vmax.f32 %v1159_v47, 0.0 }
 0x18c   : > { %4018 = vrsqrt.f32 %v1052_v37  ;;  %v1160_v28 = vadd.f32 %v4738_v41, %v1124_v33  ;;  %v4761_v45 = vmul.f32 %v4015_v9, %v4677_v17  ;;  %v1050_v61 = vadd.f32 1e-05, %v1018_v40 }
 0x18d   : > { %v973_v43 = vadd.f32 %v972_v14, %v795_v22  ;;  %v1161_v49 = vadd.f32 %v4738_v41, %v1125_v4  ;;  %v1021_v5 = vmul.f32 0.125, %v989_v48  ;;  %v1222_v16 = vpack.c.bf16 %v1191_v35, %v1190_v62 }
 0x18e   : > { %v1192_v52 = vmax.f32 %v1160_v28, 0.0  ;;  %v1126_v26 = vmul.f32 %v4732_v58, %v6174_v20  ;;  %4020 = vrsqrt.f32 %v1050_v61  ;;  %v1127_v24 = vmul.f32 %v4732_v58, %v4515_v23 }
 0x18f   : > { %v974_v13 = vrot.slane %v973_v43, 2  ;;  %v1193_v2 = vmax.f32 %v1161_v49, 0.0  ;;  %v1053_v39 = vadd.f32 1e-05, %v1021_v5  ;;  %3769 = vmatprep.mubr.bf16.mxu1 %v1222_v16  ;;  %v1128_v36 = vmul.f32 %v4732_v58, %v6175_v54 }
 0x190   : > { %v1162_v17 = vadd.f32 %v4738_v41, %v1126_v26  ;;  %v1129_v60 = vmul.f32 %v4732_v58, %v4509_v27  ;;  %v1163_v22 = vadd.f32 %v4738_v41, %v1127_v24  ;;  %v1130_v21 = vmul.f32 %v4732_v58, %v4525_v6 }
 0x191   : > { %v4017_v33 = vpop.eup %4016  ;;  %v975_v57 = vadd.f32 %v974_v13, %v973_v43  ;;  %v1223_v50 = vpack.c.bf16 %v1193_v2, %v1192_v52  ;;  %4022 = vrsqrt.f32 %v1053_v39  ;;  %v1164_v4 = vadd.f32 %v4738_v41, %v1128_v36 }
 0x192   : > { %v4777_v23 = vmul.f32 %v4017_v33, %v4687_v46  ;;  %v1194_v3 = vmax.f32 %v1162_v17, 0.0  ;;  %v1195_v37 = vmax.f32 %v1163_v22, 0.0  ;;  %v1165_v27 = vadd.f32 %v4738_v41, %v1129_v60 }
 0x193   : > { %v976_v7 = vrot.slane %v975_v57, 1  ;;  %3770 = vmatmul.mubr.bf16.vlgmr.msra.gmra.mrb[0].mxu1 %v1223_v50  ;;  %v1131_v8 = vmul.f32 %v4732_v58, %v4546_v19  ;;  %v1196_v47 = vmax.f32 %v1164_v4, 0.0  ;;  %v1166_v40 = vadd.f32 %v4738_v41, %v1130_v21 }
 0x194   : > { %v1132_v6 = vmul.f32 %v4732_v58, %v4518_v11  ;;  %v1133_v46 = vmul.f32 %v4732_v58, %v4528_v38  ;;  %v1224_v62 = vpack.c.bf16 %v1195_v37, %v1194_v3  ;;  %v1197_v9 = vmax.f32 %v1165_v27, 0.0 }
 0x195   : > { %v977_v14 = vadd.f32 %v976_v7, %v975_v57  ;;  %v1167_v48 = vadd.f32 %v4738_v41, %v1131_v8  ;;  %v1198_v28 = vmax.f32 %v1166_v40, 0.0  ;;  %v1134_v43 = vmul.f32 %v4732_v58, %v4582_v59 }
 0x196   : > { %v4019_v35 = vpop.eup %4018  ;;  %v1168_v61 = vadd.f32 %v4738_v41, %v1132_v6  ;;  %v1169_v19 = vadd.f32 %v4738_v41, %v1133_v46  ;;  %3773 = vmatprep.mubr.bf16.mxu1 %v1224_v62  ;;  %v1225_v38 = vpack.c.bf16 %v1197_v9, %v1196_v47  ;;  %v1135_v20 = vmul.f32 %v4732_v58, %v4635_v51 }
 0x197   : > { %v4794_v49 = vmul.f32 %v4019_v35, %v4696_v25  ;;  %v1019_v11 = vmul.f32 0.125, %v977_v14  ;;  %v1199_v5 = vmax.f32 %v1167_v48, 0.0  ;;  %v1170_v26 = vadd.f32 %v4738_v41, %v1134_v43 }
 0x198   : > { %v1200_v16 = vmax.f32 %v1168_v61, 0.0  ;;  %v1201_v52 = vmax.f32 %v1169_v19, 0.0  ;;  %v4021_v13 = vpop.eup %4020  ;;  %v1136_v59 = vmul.f32 %v4732_v58, %v4570_v34  ;;  %v1137_v25 = vmul.f32 %v4732_v58, %v4631_v31 }
 0x199   : > { %v1051_v2 = vadd.f32 1e-05, %v1019_v11  ;;  %v1226_v24 = vpack.c.bf16 %v1199_v5, %v1198_v28  ;;  %v1114_v39 = vmul.f32 %v4021_v13, %v4706_v42  ;;  %v1171_v54 = vadd.f32 %v4738_v41, %v1135_v20 }
 0x19a   : > { %v1227_v17 = vpack.c.bf16 %v1201_v52, %v1200_v16  ;;  %v1202_v36 = vmax.f32 %v1170_v26, 0.0  ;;  %v1172_v51 = vadd.f32 %v4738_v41, %v1136_v59  ;;  %v1173_v60 = vadd.f32 %v4738_v41, %v1137_v25 }
 0x19b   : > { %4024 = vrsqrt.f32 %v1051_v2  ;;  %3774 = vmatmul.mubr.bf16.gmra.mrb[4].mxu1 %v1225_v38  ;;  %v1138_v33 = vmul.f32 %v4732_v58, %v4641_v1  ;;  %v4023_v57 = vpop.eup %4022  ;;  %v1203_v34 = vmax.f32 %v1171_v54, 0.0  ;;  %v1139_v31 = vmul.f32 %v4732_v58, %v4672_v63 }
 0x19c   : > { %3777 = vmatprep.mubr.bf16.mxu1 %v1226_v24  ;;  %v1140_v42 = vmul.f32 %v4732_v58, %v4638_v29  ;;  %v1141_v50 = vmul.f32 %v4732_v58, %v4644_v44  ;;  %v1117_v22 = vmul.f32 %v4023_v57, %v4711_v55  ;;  %v1204_v21 = vmax.f32 %v1172_v51, 0.0 }
 0x19d   : > { %v1205_v3 = vmax.f32 %v1173_v60, 0.0  ;;  %v1174_v4 = vadd.f32 %v4738_v41, %v1138_v33  ;;  %v1228_v7 = vpack.c.bf16 %v1203_v34, %v1202_v36  ;;  %v1175_v1 = vadd.f32 %v4738_v41, %v1139_v31 }
 0x19e   : > { %v1176_v37 = vadd.f32 %v4738_v41, %v1140_v42  ;;  %v1177_v27 = vadd.f32 %v4738_v41, %v1141_v50  ;;  %v1142_v29 = vmul.f32 %v4732_v58, %v4703_v15  ;;  %v1143_v44 = vmul.f32 %v4732_v58, %v4735_v56  ;;  %v3949_v50 = vld [vmem:[%s6160_s1 + $0x98] sm:$0xff]  }
 0x19f   : > { %v1229_v63 = vpack.c.bf16 %v1205_v3, %v1204_v21  ;;  %v1206_v8 = vmax.f32 %v1174_v4, 0.0  ;;  %v1207_v55 = vmax.f32 %v1175_v1, 0.0  ;;  %v1144_v6 = vmul.f32 %v4732_v58, %v4684_v32  ;;  %v3951_v21 = vld [vmem:[%s6160_s1 + $0xa8] sm:$0xff]   ;;  %v3952_v3 = vld [vmem:[%s6160_s1 + $0xb0] sm:$0xff]  }
 0x1a0   : > { %v1208_v47 = vmax.f32 %v1176_v37, 0.0  ;;  %v1209_v40 = vmax.f32 %v1177_v27, 0.0  ;;  %v1178_v46 = vadd.f32 %v4738_v41, %v1142_v29  ;;  %v1179_v14 = vadd.f32 %v4738_v41, %v1143_v44  ;;  %v3569_v4 = vld [vmem:[%s6161_s2 + $0x8] sm:$0xff]  ;;  %v3953_v44 = vld [vmem:[%s6160_s1 + $0xb8] sm:$0xff]  }
 0x1a1   : > { %v1145_v62 = vmul.f32 %v4732_v58, %v4716_v10  ;;  %v1146_v9 = vmul.f32 %v4732_v58, %v4757_v12  ;;  %v1230_v15 = vpack.c.bf16 %v1207_v55, %v1206_v8  ;;  %v1180_v56 = vadd.f32 %v4738_v41, %v1144_v6 }
 0x1a2   : > { %v1231_v48 = vpack.c.bf16 %v1209_v40, %v1208_v47  ;;  %v1147_v35 = vmul.f32 %v4732_v58, %v4777_v23  ;;  %v1210_v28 = vmax.f32 %v1178_v46, 0.0  ;;  %v1211_v32 = vmax.f32 %v1179_v14, 0.0 }
 0x1a3   : > { %3778 = vmatmul.mubr.bf16.gmra.mrb[8].mxu1 %v1227_v17  ;;  %v1181_v61 = vadd.f32 %v4738_v41, %v1145_v62  ;;  %v1182_v19 = vadd.f32 %v4738_v41, %v1146_v9  ;;  %v1212_v43 = vmax.f32 %v1180_v56, 0.0  ;;  %v1148_v12 = vmul.f32 %v4732_v58, %v4753_v53 }
 0x1a4   : > { %3781 = vmatprep.mubr.bf16.mxu1 %v1228_v7  ;;  %v1183_v10 = vadd.f32 %v4738_v41, %v1147_v35  ;;  %v1149_v11 = vmul.f32 %v4732_v58, %v4761_v45  ;;  %v1232_v5 = vpack.c.bf16 %v1211_v32, %v1210_v28  ;;  %v1150_v52 = vmul.f32 %v4732_v58, %v1114_v39  ;;  %v6176_v7 = vld [vmem:[#allocation2_spill] sm:$0xff] }
 0x1a5   : > { %v4025_v38 = vpop.eup %4024  ;;  %v1213_v23 = vmax.f32 %v1181_v61, 0.0  ;;  %v1214_v16 = vmax.f32 %v1182_v19, 0.0  ;;  %v1184_v13 = vadd.f32 %v4738_v41, %v1148_v12  ;;  %v1152_v53 = vmul.f32 %v4732_v58, %v4794_v49 }
 0x1a6   : > { %v1115_v20 = vmul.f32 %v4025_v38, %v4741_v0  ;;  %v1215_v26 = vmax.f32 %v1183_v10, 0.0  ;;  %v1185_v2 = vadd.f32 %v4738_v41, %v1149_v11  ;;  %v1186_v59 = vadd.f32 %v4738_v41, %v1150_v52 }
 0x1a7   : > { %v1233_v24 = vpack.c.bf16 %v1213_v23, %v1212_v43  ;;  %v1153_v45 = vmul.f32 %v4732_v58, %v1117_v22  ;;  %v1216_v17 = vmax.f32 %v1184_v13, 0.0  ;;  %v1188_v0 = vadd.f32 %v4738_v41, %v1152_v53  ;;  %v3950_v22 = vld [vmem:[%s6160_s1 + $0xa0] sm:$0xff]  }
 0x1a8   : > { %v1234_v25 = vpack.c.bf16 %v1215_v26, %v1214_v16  ;;  %v1217_v54 = vmax.f32 %v1185_v2, 0.0  ;;  %v1151_v39 = vmul.f32 %v4732_v58, %v1115_v20  ;;  %v1218_v34 = vmax.f32 %v1186_v59, 0.0  ;;  %v3947_v58 = vld [vmem:[%s6160_s1 + $0x88] sm:$0xff]  }
 0x1a9   : > { %v1189_v36 = vadd.f32 %v4738_v41, %v1153_v45  ;;  %v1220_v33 = vmax.f32 %v1188_v0, 0.0  ;;  %3803 = vmatprep.subr.bf16.mxu0 %v3947_v58  ;;  %v4876_v1 = vrot.slane %v3569_v4, %v6176_v7  ;;  %v4890_v19 = vrot.slane %v3569_v4, %v4721_v30 }
 0x1aa   : > { %v1235_v51 = vpack.c.bf16 %v1217_v54, %v1216_v17  ;;  %v1187_v60 = vadd.f32 %v4738_v41, %v1151_v39  ;;  %3804 = vmatpush3.bf16.msra.mxu0 %v3947_v58  ;;  %v3948_v41 = vld [vmem:[%s6160_s1 + $0x90] sm:$0xff]   ;;  %v4896_v11 = vrot.slane %v3569_v4, %v4726_v18 }
 0x1ab   : > { %3782 = vmatmul.mubr.bf16.gmra.mrb[12].mxu1 %v1229_v63  ;;  %v1221_v57 = vmax.f32 %v1189_v36, 0.0  ;;  %3805 = vmatprep.subr.bf16.mxu0 %v3948_v41 }
 0x1ac   : > { %3785 = vmatprep.mubr.bf16.mxu1 %v1230_v15  ;;  %v1219_v49 = vmax.f32 %v1187_v60, 0.0 }
 0x1ad   : > { %v1237_v31 = vpack.c.bf16 %v1221_v57, %v1220_v33 }
 0x1ae   : > { %v1236_v42 = vpack.c.bf16 %v1219_v49, %v1218_v34  ;;  %3806 = vmatpush3.bf16.msra.mxu0 %v3948_v41 }
 0x1af   : > { %3807 = vmatprep.subr.bf16.mxu0 %v3949_v50 }
 0x1b2   : > { %3808 = vmatpush3.bf16.msra.mxu0 %v3949_v50 }
 0x1b3   : > { %3786 = vmatmul.mubr.bf16.gmra.mrb[16].mxu1 %v1231_v48  ;;  %3809 = vmatprep.subr.bf16.mxu0 %v3950_v22 }
 0x1b4   : > { %3789 = vmatprep.mubr.bf16.mxu1 %v1232_v5 }
 0x1b6   : > { %3810 = vmatpush3.bf16.msra.mxu0 %v3950_v22 }
 0x1b7   : > { %3811 = vmatprep.subr.bf16.mxu0 %v3951_v21 }
 0x1ba   : > { %3812 = vmatpush3.bf16.msra.mxu0 %v3951_v21 }
 0x1bb   : > { %3790 = vmatmul.mubr.bf16.gmra.mrb[20].mxu1 %v1233_v24  ;;  %3813 = vmatprep.subr.bf16.mxu0 %v3952_v3 }
 0x1bc   : > { %3793 = vmatprep.mubr.bf16.mxu1 %v1234_v25 }
 0x1be   : > { %3814 = vmatpush3.bf16.msra.mxu0 %v3952_v3 }
 0x1bf   : > { %3815 = vmatprep.subr.bf16.mxu0 %v3953_v44 }
 0x1c2   : > { %3816 = vmatpush3.bf16.msra.mxu0 %v3953_v44 }
 0x1c3   : > { %3794 = vmatmul.mubr.bf16.gmra.mrb[24].mxu1 %v1235_v51 }
 0x1c4   : > { %3797 = vmatprep.mubr.bf16.mxu1 %v1236_v42 }
 0x1cb   : > { %3798 = vmatmul.mubr.bf16.gmra.mrb[28].mxu1 %v1237_v31 }
 0x266   : > { %v3771_v37 = vpop.f32.mrb[0].mxu1 }
 0x267   : > { %v1352_v27 = vadd.f32 %v3771_v37, %v4876_v1  ;;  %v1343_v63 = vpop.f32.mrb[1].mxu1 }
 0x268   : > { %v1344_v8 = vadd.f32 %v1343_v63, %v4876_v1  ;;  %v3772_v29 = vpop.f32.mrb[2].mxu1 }
 0x269   : > { %v1482_v55 = vrot.slane %v1352_v27, 4  ;;  %v1355_v47 = vadd.f32 %v3772_v29, %v4876_v1  ;;  %v1346_v40 = vpop.f32.mrb[3].mxu1 }
 0x26a   : > { %v1470_v6 = vrot.slane %v1344_v8, 4  ;;  %v4885_v46 = vadd.f32 %v1346_v40, %v4876_v1 }
 0x26b   : > { %v1483_v14 = vadd.f32 %v1482_v55, %v1352_v27  ;;  %v1488_v62 = vrot.slane %v1355_v47, 4 }
 0x26c   : > { %v1471_v9 = vadd.f32 %v1470_v6, %v1344_v8  ;;  %v1476_v15 = vrot.slane %v4885_v46, 4 }
 0x26d   : > { %v1484_v48 = vrot.slane %v1483_v14, 2  ;;  %v1489_v56 = vadd.f32 %v1488_v62, %v1355_v47 }
 0x26e   : > { %v1472_v35 = vrot.slane %v1471_v9, 2  ;;  %v1477_v28 = vadd.f32 %v1476_v15, %v4885_v46  ;;  %v3775_v32 = vpop.f32.mrb[4].mxu1 }
 0x26f   : > { %v1485_v61 = vadd.f32 %v1484_v48, %v1483_v14  ;;  %v1490_v43 = vrot.slane %v1489_v56, 2  ;;  %v4893_v10 = vadd.f32 %v3775_v32, %v4876_v1  ;;  %v1359_v12 = vpop.f32.mrb[5].mxu1 }
 0x270   : > { %v1473_v38 = vadd.f32 %v1472_v35, %v1471_v9  ;;  %v1478_v5 = vrot.slane %v1477_v28, 2  ;;  %v4899_v23 = vadd.f32 %v1359_v12, %v4876_v1  ;;  %v3776_v16 = vpop.f32.mrb[6].mxu1 }
 0x271   : > { %v1486_v52 = vrot.slane %v1485_v61, 1  ;;  %v1491_v20 = vadd.f32 %v1490_v43, %v1489_v56  ;;  %v1506_v26 = vrot.slane %v4893_v10, 4  ;;  %v4903_v13 = vadd.f32 %v3776_v16, %v4876_v1  ;;  %v1362_v2 = vpop.f32.mrb[7].mxu1 }
 0x272   : > { %v1474_v24 = vrot.slane %v1473_v38, 1  ;;  %v1479_v59 = vadd.f32 %v1478_v5, %v1477_v28  ;;  %v1494_v53 = vrot.slane %v4899_v23, 4  ;;  %v4907_v45 = vadd.f32 %v1362_v2, %v4876_v1 }
 0x273   : > { %v1487_v25 = vadd.f32 %v1486_v52, %v1485_v61  ;;  %v1492_v17 = vrot.slane %v1491_v20, 1  ;;  %v1507_v54 = vadd.f32 %v1506_v26, %v4893_v10  ;;  %v1512_v39 = vrot.slane %v4903_v13, 4 }
 0x274   : > { %v1475_v0 = vadd.f32 %v1474_v24, %v1473_v38  ;;  %v1480_v36 = vrot.slane %v1479_v59, 1  ;;  %v1495_v51 = vadd.f32 %v1494_v53, %v4899_v23  ;;  %v1500_v60 = vrot.slane %v4907_v45, 4 }
 0x275   : > { %v1664_v33 = vmul.f32 0.125, %v1487_v25  ;;  %v1493_v57 = vadd.f32 %v1492_v17, %v1491_v20  ;;  %v1508_v34 = vrot.slane %v1507_v54, 2  ;;  %v1513_v49 = vadd.f32 %v1512_v39, %v4903_v13 }
 0x276   : > { %v1662_v31 = vmul.f32 0.125, %v1475_v0  ;;  %v1481_v42 = vadd.f32 %v1480_v36, %v1479_v59  ;;  %v1496_v58 = vrot.slane %v1495_v51, 2  ;;  %v1501_v41 = vadd.f32 %v1500_v60, %v4907_v45  ;;  %v4915_v50 = vpop.f32.mrb[8].mxu1 }
 0x277   : > { %v4917_v22 = vsub.f32 %v1352_v27, %v1664_v33  ;;  %v1665_v21 = vmul.f32 0.125, %v1493_v57  ;;  %v1509_v3 = vadd.f32 %v1508_v34, %v1507_v54  ;;  %v1514_v4 = vrot.slane %v1513_v49, 2  ;;  %v4919_v37 = vpop.f32.mrb[9].mxu1 }
 0x278   : > { %v4921_v63 = vsub.f32 %v1344_v8, %v1662_v31  ;;  %v1663_v29 = vmul.f32 0.125, %v1481_v42  ;;  %v1497_v44 = vadd.f32 %v1496_v58, %v1495_v51  ;;  %v1502_v55 = vrot.slane %v1501_v41, 2  ;;  %v4923_v40 = vpop.f32.mrb[10].mxu1 }
 0x279   : > { %v1728_v6 = vmul.f32 %v4917_v22, %v4917_v22  ;;  %v4927_v14 = vsub.f32 %v1355_v47, %v1665_v21  ;;  %v1510_v62 = vrot.slane %v1509_v3, 1  ;;  %v1515_v27 = vadd.f32 %v1514_v4, %v1513_v49  ;;  %v4929_v9 = vpop.f32.mrb[11].mxu1 }
 0x27a   : > { %v1726_v15 = vmul.f32 %v4921_v63, %v4921_v63  ;;  %v4934_v8 = vsub.f32 %v4885_v46, %v1663_v29  ;;  %v1498_v48 = vrot.slane %v1497_v44, 1  ;;  %v1503_v56 = vadd.f32 %v1502_v55, %v1501_v41 }
 0x27b   : > { %v1770_v35 = vrot.slane %v1728_v6, 4  ;;  %v1729_v28 = vmul.f32 %v4927_v14, %v4927_v14  ;;  %v1511_v32 = vadd.f32 %v1510_v62, %v1509_v3  ;;  %v1516_v61 = vrot.slane %v1515_v27, 1 }
 0x27c   : > { %v1758_v47 = vrot.slane %v1726_v15, 4  ;;  %v1727_v43 = vmul.f32 %v4934_v8, %v4934_v8  ;;  %v1499_v12 = vadd.f32 %v1498_v48, %v1497_v44  ;;  %v1504_v38 = vrot.slane %v1503_v56, 1 }
 0x27d   : > { %v1771_v5 = vadd.f32 %v1770_v35, %v1728_v6  ;;  %v1776_v16 = vrot.slane %v1729_v28, 4  ;;  %v1668_v52 = vmul.f32 0.125, %v1511_v32  ;;  %v1517_v20 = vadd.f32 %v1516_v61, %v1515_v27 }
 0x27e   : > { %v1759_v46 = vadd.f32 %v1758_v47, %v1726_v15  ;;  %v1764_v26 = vrot.slane %v1727_v43, 4  ;;  %v1666_v2 = vmul.f32 0.125, %v1499_v12  ;;  %v1505_v24 = vadd.f32 %v1504_v38, %v1503_v56  ;;  %v4940_v59 = vpop.f32.mrb[12].mxu1 }
 0x27f   : > { %v1772_v53 = vrot.slane %v1771_v5, 2  ;;  %v1777_v25 = vadd.f32 %v1776_v16, %v1729_v28  ;;  %v4943_v17 = vsub.f32 %v4893_v10, %v1668_v52  ;;  %v1669_v54 = vmul.f32 0.125, %v1517_v20  ;;  %v4945_v39 = vpop.f32.mrb[13].mxu1 }
 0x280   : > { %v1760_v0 = vrot.slane %v1759_v46, 2  ;;  %v1765_v36 = vadd.f32 %v1764_v26, %v1727_v43  ;;  %v4948_v51 = vsub.f32 %v4899_v23, %v1666_v2  ;;  %v1667_v60 = vmul.f32 0.125, %v1505_v24  ;;  %v4950_v33 = vpop.f32.mrb[14].mxu1 }
 0x281   : > { %v1773_v57 = vadd.f32 %v1772_v53, %v1771_v5  ;;  %v1778_v34 = vrot.slane %v1777_v25, 2  ;;  %v1732_v49 = vmul.f32 %v4943_v17, %v4943_v17  ;;  %v4955_v31 = vsub.f32 %v4903_v13, %v1669_v54  ;;  %v4957_v10 = vpop.f32.mrb[15].mxu1 }
 0x282   : > { %v1761_v42 = vadd.f32 %v1760_v0, %v1759_v46  ;;  %v1766_v58 = vrot.slane %v1765_v36, 2  ;;  %v1730_v41 = vmul.f32 %v4948_v51, %v4948_v51  ;;  %v4962_v23 = vsub.f32 %v4907_v45, %v1667_v60 }
 0x283   : > { %v1774_v21 = vrot.slane %v1773_v57, 1  ;;  %v1779_v3 = vadd.f32 %v1778_v34, %v1777_v25  ;;  %v1794_v4 = vrot.slane %v1732_v49, 4  ;;  %v1733_v29 = vmul.f32 %v4955_v31, %v4955_v31 }
 0x284   : > { %v1762_v44 = vrot.slane %v1761_v42, 1  ;;  %v1767_v55 = vadd.f32 %v1766_v58, %v1765_v36  ;;  %v1782_v13 = vrot.slane %v1730_v41, 4  ;;  %v1731_v6 = vmul.f32 %v4962_v23, %v4962_v23 }
 0x285   : > { %v1775_v62 = vadd.f32 %v1774_v21, %v1773_v57  ;;  %v1780_v27 = vrot.slane %v1779_v3, 1  ;;  %v1795_v15 = vadd.f32 %v1794_v4, %v1732_v49  ;;  %v1800_v48 = vrot.slane %v1733_v29, 4 }
 0x286   : > { %v1763_v56 = vadd.f32 %v1762_v44, %v1761_v42  ;;  %v1768_v35 = vrot.slane %v1767_v55, 1  ;;  %v1783_v45 = vadd.f32 %v1782_v13, %v1730_v41  ;;  %v1788_v28 = vrot.slane %v1731_v6, 4  ;;  %v4968_v32 = vpop.f32.mrb[16].mxu1 }
 0x287   : > { %v1952_v61 = vmul.f32 0.125, %v1775_v62  ;;  %v1781_v47 = vadd.f32 %v1780_v27, %v1779_v3  ;;  %v1796_v43 = vrot.slane %v1795_v15, 2  ;;  %v1801_v12 = vadd.f32 %v1800_v48, %v1733_v29  ;;  %v4970_v38 = vpop.f32.mrb[17].mxu1 }
 0x288   : > { %v1950_v5 = vmul.f32 0.125, %v1763_v56  ;;  %v1769_v16 = vadd.f32 %v1768_v35, %v1767_v55  ;;  %v1784_v52 = vrot.slane %v1783_v45, 2  ;;  %v1789_v20 = vadd.f32 %v1788_v28, %v1731_v6  ;;  %v4972_v46 = vpop.f32.mrb[18].mxu1 }
 0x289   : > { %v1984_v26 = vadd.f32 1e-05, %v1952_v61  ;;  %v1953_v2 = vmul.f32 0.125, %v1781_v47  ;;  %v1797_v24 = vadd.f32 %v1796_v43, %v1795_v15  ;;  %v1802_v53 = vrot.slane %v1801_v12, 2  ;;  %v4974_v25 = vpop.f32.mrb[19].mxu1 }
 0x28a   : > { %v1982_v54 = vadd.f32 1e-05, %v1950_v5  ;;  %v1951_v0 = vmul.f32 0.125, %v1769_v16  ;;  %v1785_v36 = vadd.f32 %v1784_v52, %v1783_v45  ;;  %v1790_v60 = vrot.slane %v1789_v20, 2 }
 0x28b   : > { %4026 = vrsqrt.f32 %v1984_v26  ;;  %v1985_v57 = vadd.f32 1e-05, %v1953_v2  ;;  %v1798_v34 = vrot.slane %v1797_v24, 1  ;;  %v1803_v49 = vadd.f32 %v1802_v53, %v1801_v12 }
 0x28c   : > { %4028 = vrsqrt.f32 %v1982_v54  ;;  %v1983_v42 = vadd.f32 1e-05, %v1951_v0  ;;  %v1786_v58 = vrot.slane %v1785_v36, 1  ;;  %v1791_v41 = vadd.f32 %v1790_v60, %v1789_v20 }
 0x28d   : > { %4030 = vrsqrt.f32 %v1985_v57  ;;  %v1799_v21 = vadd.f32 %v1798_v34, %v1797_v24  ;;  %v1804_v3 = vrot.slane %v1803_v49, 1  ;;  %v4978_v4 = vadd.f32 %v4915_v50, %v4876_v1 }
 0x28e   : > { %4032 = vrsqrt.f32 %v1983_v42  ;;  %v1787_v29 = vadd.f32 %v1786_v58, %v1785_v36  ;;  %v1792_v44 = vrot.slane %v1791_v41, 1  ;;  %v4982_v55 = vadd.f32 %v4919_v37, %v4876_v1  ;;  %v4984_v13 = vpop.f32.mrb[20].mxu1 }
 0x28f   : > { %v1956_v6 = vmul.f32 0.125, %v1799_v21  ;;  %v1805_v62 = vadd.f32 %v1804_v3, %v1803_v49  ;;  %v1530_v27 = vrot.slane %v4978_v4, 4  ;;  %v4989_v15 = vadd.f32 %v4923_v40, %v4876_v1  ;;  %v4991_v48 = vpop.f32.mrb[21].mxu1 }
 0x290   : > { %v1954_v50 = vmul.f32 0.125, %v1787_v29  ;;  %v1793_v56 = vadd.f32 %v1792_v44, %v1791_v41  ;;  %v1518_v35 = vrot.slane %v4982_v55, 4  ;;  %v4996_v37 = vadd.f32 %v4929_v9, %v4876_v1  ;;  %v4998_v45 = vpop.f32.mrb[22].mxu1 }
 0x291   : > { %v1988_v28 = vadd.f32 1e-05, %v1956_v6  ;;  %v1957_v61 = vmul.f32 0.125, %v1805_v62  ;;  %v1531_v47 = vadd.f32 %v1530_v27, %v4978_v4  ;;  %v1536_v43 = vrot.slane %v4989_v15, 4  ;;  %v5002_v40 = vpop.f32.mrb[23].mxu1 }
 0x292   : > { %v1986_v12 = vadd.f32 1e-05, %v1954_v50  ;;  %v1955_v5 = vmul.f32 0.125, %v1793_v56  ;;  %v1519_v16 = vadd.f32 %v1518_v35, %v4982_v55  ;;  %v1524_v52 = vrot.slane %v4996_v37, 4 }
 0x293   : > { %4034 = vrsqrt.f32 %v1988_v28  ;;  %v1989_v20 = vadd.f32 1e-05, %v1957_v61  ;;  %v1532_v9 = vrot.slane %v1531_v47, 2  ;;  %v1537_v26 = vadd.f32 %v1536_v43, %v4989_v15 }
 0x294   : > { %4036 = vrsqrt.f32 %v1986_v12  ;;  %v1987_v2 = vadd.f32 1e-05, %v1955_v5  ;;  %v1520_v24 = vrot.slane %v1519_v16, 2  ;;  %v1525_v53 = vadd.f32 %v1524_v52, %v4996_v37 }
 0x295   : > { %v4027_v54 = vpop.eup %4026  ;;  %4038 = vrsqrt.f32 %v1989_v20  ;;  %v1533_v0 = vadd.f32 %v1532_v9, %v1531_v47  ;;  %v1538_v36 = vrot.slane %v1537_v26, 2  ;;  %v5010_v60 = vadd.f32 %v4940_v59, %v4876_v1 }
 0x296   : > { %v4029_v57 = vpop.eup %4028  ;;  %v2048_v34 = vmul.f32 %v4027_v54, %v4917_v22  ;;  %4040 = vrsqrt.f32 %v1987_v2  ;;  %v1521_v49 = vadd.f32 %v1520_v24, %v1519_v16  ;;  %v1526_v42 = vrot.slane %v1525_v53, 2  ;;  %v5013_v58 = vpop.f32.mrb[24].mxu1 }
 0x297   : > { %v4031_v41 = vpop.eup %4030  ;;  %v5016_v21 = vmul.f32 %v4029_v57, %v4921_v63  ;;  %v1534_v3 = vrot.slane %v1533_v0, 1  ;;  %v1539_v29 = vadd.f32 %v1538_v36, %v1537_v26  ;;  %v1554_v44 = vrot.slane %v5010_v60, 4  ;;  %v5019_v6 = vpop.f32.mrb[25].mxu1 }
 0x298   : > { %v4033_v59 = vpop.eup %4032  ;;  %v2084_v62 = vmul.f32 %v4890_v19, %v2048_v34  ;;  %v2049_v22 = vmul.f32 %v4031_v41, %v4927_v14  ;;  %v1522_v27 = vrot.slane %v1521_v49, 1  ;;  %v1527_v50 = vadd.f32 %v1526_v42, %v1525_v53  ;;  %v5023_v56 = vpop.f32.mrb[26].mxu1 }
 0x299   : > { %v5026_v35 = vmul.f32 %v4033_v59, %v4934_v8  ;;  %v1535_v63 = vadd.f32 %v1534_v3, %v1533_v0  ;;  %v1540_v28 = vrot.slane %v1539_v29, 1  ;;  %v1555_v61 = vadd.f32 %v1554_v44, %v5010_v60  ;;  %v5029_v47 = vpop.f32.mrb[27].mxu1 }
 0x29a   : > { %v5032_v43 = vadd.f32 %v4896_v11, %v2084_v62  ;;  %v2085_v12 = vmul.f32 %v4890_v19, %v2049_v22  ;;  %v1523_v5 = vadd.f32 %v1522_v27, %v1521_v49  ;;  %v1528_v14 = vrot.slane %v1527_v50, 1 }
 0x29b   : > { %v1672_v16 = vmul.f32 0.125, %v1535_v63  ;;  %v1541_v52 = vadd.f32 %v1540_v28, %v1539_v29  ;;  %v1556_v20 = vrot.slane %v1555_v61, 2  ;;  %v5037_v8 = vadd.f32 %v4945_v39, %v4876_v1 }
 0x29c   : > { %v5041_v26 = vadd.f32 %v4896_v11, %v2085_v12  ;;  %v1670_v2 = vmul.f32 0.125, %v1523_v5  ;;  %v1529_v24 = vadd.f32 %v1528_v14, %v1527_v50 }
 0x29d   : > { %v4035_v53 = vpop.eup %4034  ;;  %v5044_v54 = vsub.f32 %v4978_v4, %v1672_v16  ;;  %v1673_v0 = vmul.f32 0.125, %v1541_v52  ;;  %v1557_v36 = vadd.f32 %v1556_v20, %v1555_v61  ;;  %v1542_v57 = vrot.slane %v5037_v8, 4 }
 0x29e   : > { %v4037_v34 = vpop.eup %4036  ;;  %v5049_v39 = vmul.f32 %v4035_v53, %v4943_v17  ;;  %v5052_v42 = vsub.f32 %v4982_v55, %v1670_v2  ;;  %v1671_v41 = vmul.f32 0.125, %v1529_v24  ;;  %v5054_v3 = vpop.f32.mrb[28].mxu1  ;;  %v5088_v16 = vadd.f32 %v4950_v33, %v4876_v1 }
 0x29f   : > { %v4039_v29 = vpop.eup %4038  ;;  %v5057_v4 = vmul.f32 %v4037_v34, %v4948_v51  ;;  %v1736_v44 = vmul.f32 %v5044_v54, %v5044_v54  ;;  %v5062_v59 = vsub.f32 %v4989_v15, %v1673_v0  ;;  %v1558_v62 = vrot.slane %v1557_v36, 1  ;;  %v5064_v22 = vpop.f32.mrb[29].mxu1 }
 0x2a0   : > { %6177 = vst [vmem:[#allocation3_spill] sm:$0xff] %v5049_v39  ;;  %v4041_v17 = vpop.eup %4040  ;;  %v5067_v55 = vmul.f32 %v4039_v29, %v4955_v31  ;;  %v1734_v27 = vmul.f32 %v5052_v42, %v5052_v42  ;;  %v5072_v50 = vsub.f32 %v4996_v37, %v1671_v41  ;;  %v1543_v51 = vadd.f32 %v1542_v57, %v5037_v8  ;;  %v5075_v63 = vpop.f32.mrb[30].mxu1 }
 0x2a1   : > { %v5078_v15 = vmul.f32 %v4041_v17, %v4962_v23  ;;  %v1818_v28 = vrot.slane %v1736_v44, 4  ;;  %v1737_v61 = vmul.f32 %v5062_v59, %v5062_v59  ;;  %v1559_v12 = vadd.f32 %v1558_v62, %v1557_v36  ;;  %v5082_v31 = vpop.f32.mrb[31].mxu1 }
 0x2a2   : > { %6178 = vst [vmem:[#allocation5_spill] sm:$0xff] %v5067_v55  ;;  %v1806_v5 = vrot.slane %v1734_v27, 4  ;;  %v1735_v14 = vmul.f32 %v5072_v50, %v5072_v50  ;;  %v1544_v37 = vrot.slane %v1543_v51, 2  ;;  %v5092_v2 = vadd.f32 %v4957_v10, %v4876_v1 }
 0x2a3   : > { %v1819_v52 = vadd.f32 %v1818_v28, %v1736_v44  ;;  %v1824_v20 = vrot.slane %v1737_v61, 4  ;;  %v1676_v23 = vmul.f32 0.125, %v1559_v12  ;;  %v1560_v36 = vrot.slane %v5088_v16, 4 }
 0x2a4   : > { %v1807_v24 = vadd.f32 %v1806_v5, %v1734_v27  ;;  %v1812_v53 = vrot.slane %v1735_v14, 4  ;;  %v1545_v0 = vadd.f32 %v1544_v37, %v1543_v51  ;;  %v1548_v33 = vrot.slane %v5092_v2, 4 }
 0x2a5   : > { %v1820_v57 = vrot.slane %v1819_v52, 2  ;;  %v1825_v34 = vadd.f32 %v1824_v20, %v1737_v61  ;;  %v5096_v41 = vsub.f32 %v5010_v60, %v1676_v23  ;;  %v1561_v17 = vadd.f32 %v1560_v36, %v5088_v16 }
 0x2a6   : > { %v1808_v29 = vrot.slane %v1807_v24, 2  ;;  %v1813_v44 = vadd.f32 %v1812_v53, %v1735_v14  ;;  %v1546_v62 = vrot.slane %v1545_v0, 1  ;;  %v1549_v51 = vadd.f32 %v1548_v33, %v5092_v2 }
 0x2a7   : > { %v1821_v28 = vadd.f32 %v1820_v57, %v1819_v52  ;;  %v1826_v10 = vrot.slane %v1825_v34, 2  ;;  %v1740_v27 = vmul.f32 %v5096_v41, %v5096_v41  ;;  %v1562_v37 = vrot.slane %v1561_v17, 2 }
 0x2a8   : > { %v1809_v12 = vadd.f32 %v1808_v29, %v1807_v24  ;;  %v1814_v5 = vrot.slane %v1813_v44, 2  ;;  %v1547_v61 = vadd.f32 %v1546_v62, %v1545_v0  ;;  %v1550_v49 = vrot.slane %v1549_v51, 2 }
 0x2a9   : > { %v1822_v60 = vrot.slane %v1821_v28, 1  ;;  %v1827_v20 = vadd.f32 %v1826_v10, %v1825_v34  ;;  %v1842_v23 = vrot.slane %v1740_v27, 4  ;;  %v1563_v18 = vadd.f32 %v1562_v37, %v1561_v17 }
 0x2aa   : > { %v1810_v9 = vrot.slane %v1809_v12, 1  ;;  %v1815_v14 = vadd.f32 %v1814_v5, %v1813_v44  ;;  %v1674_v53 = vmul.f32 0.125, %v1547_v61  ;;  %v1551_v30 = vadd.f32 %v1550_v49, %v1549_v51 }
 0x2ab   : > { %v1823_v36 = vadd.f32 %v1822_v60, %v1821_v28  ;;  %v1828_v52 = vrot.slane %v1827_v20, 1  ;;  %v1843_v57 = vadd.f32 %v1842_v23, %v1740_v27  ;;  %v1564_v24 = vrot.slane %v1563_v18, 1 }
 0x2ac   : > { %v1811_v7 = vadd.f32 %v1810_v9, %v1809_v12  ;;  %v1816_v55 = vrot.slane %v1815_v14, 1  ;;  %v5104_v33 = vsub.f32 %v5037_v8, %v1674_v53  ;;  %v1552_v34 = vrot.slane %v1551_v30, 1 }
 0x2ad   : > { %v1960_v0 = vmul.f32 0.125, %v1823_v36  ;;  %v1829_v29 = vadd.f32 %v1828_v52, %v1827_v20  ;;  %v1844_v62 = vrot.slane %v1843_v57, 2  ;;  %v1565_v17 = vadd.f32 %v1564_v24, %v1563_v18 }
 0x2ae   : > { %v1958_v10 = vmul.f32 0.125, %v1811_v7  ;;  %v1817_v39 = vadd.f32 %v1816_v55, %v1815_v14  ;;  %v1738_v44 = vmul.f32 %v5104_v33, %v5104_v33  ;;  %v1553_v49 = vadd.f32 %v1552_v34, %v1551_v30 }
 0x2af   : > { %v1992_v28 = vadd.f32 1e-05, %v1960_v0  ;;  %v1961_v5 = vmul.f32 0.125, %v1829_v29  ;;  %v1845_v27 = vadd.f32 %v1844_v62, %v1843_v57  ;;  %v1677_v8 = vmul.f32 0.125, %v1565_v17 }
 0x2b0   : > { %v1990_v9 = vadd.f32 1e-05, %v1958_v10  ;;  %v1959_v51 = vmul.f32 0.125, %v1817_v39  ;;  %v1830_v12 = vrot.slane %v1738_v44, 4  ;;  %v1675_v60 = vmul.f32 0.125, %v1553_v49 }
 0x2b1   : > { %4042 = vrsqrt.f32 %v1992_v28  ;;  %v1993_v61 = vadd.f32 1e-05, %v1961_v5  ;;  %v1846_v37 = vrot.slane %v1845_v27, 1  ;;  %v5109_v55 = vsub.f32 %v5088_v16, %v1677_v8 }
 0x2b2   : > { %4044 = vrsqrt.f32 %v1990_v9  ;;  %v1991_v20 = vadd.f32 1e-05, %v1959_v51  ;;  %v1831_v7 = vadd.f32 %v1830_v12, %v1738_v44  ;;  %v5112_v23 = vsub.f32 %v5092_v2, %v1675_v60 }
 0x2b3   : > { %4046 = vrsqrt.f32 %v1993_v61  ;;  %v1847_v18 = vadd.f32 %v1846_v37, %v1845_v27  ;;  %v5116_v30 = vadd.f32 %v4968_v32, %v4876_v1  ;;  %v1741_v14 = vmul.f32 %v5109_v55, %v5109_v55 }
 0x2b4   : > { %4048 = vrsqrt.f32 %v1991_v20  ;;  %v1832_v39 = vrot.slane %v1831_v7, 2  ;;  %v5122_v53 = vadd.f32 %v4970_v38, %v4876_v1  ;;  %v1739_v36 = vmul.f32 %v5112_v23, %v5112_v23 }
 0x2b5   : > { %v1964_v16 = vmul.f32 0.125, %v1847_v18  ;;  %v1578_v2 = vrot.slane %v5116_v30, 4  ;;  %v5129_v52 = vadd.f32 %v4972_v46, %v4876_v1  ;;  %v1848_v57 = vrot.slane %v1741_v14, 4 }
 0x2b6   : > { %v1833_v32 = vadd.f32 %v1832_v39, %v1831_v7  ;;  %v1566_v24 = vrot.slane %v5122_v53, 4  ;;  %v5134_v0 = vadd.f32 %v4974_v25, %v4876_v1  ;;  %v1836_v29 = vrot.slane %v1739_v36, 4 }
 0x2b7   : > { %v1996_v38 = vadd.f32 1e-05, %v1964_v16  ;;  %v1579_v62 = vadd.f32 %v1578_v2, %v5116_v30  ;;  %v1584_v34 = vrot.slane %v5129_v52, 4  ;;  %v1849_v44 = vadd.f32 %v1848_v57, %v1741_v14 }
 0x2b8   : > { %v1834_v10 = vrot.slane %v1833_v32, 1  ;;  %v1567_v17 = vadd.f32 %v1566_v24, %v5122_v53  ;;  %v1572_v46 = vrot.slane %v5134_v0, 4  ;;  %v1837_v28 = vadd.f32 %v1836_v29, %v1739_v36 }
 0x2b9   : > { %4050 = vrsqrt.f32 %v1996_v38  ;;  %v1580_v5 = vrot.slane %v1579_v62, 2  ;;  %v1585_v27 = vadd.f32 %v1584_v34, %v5129_v52  ;;  %v1850_v25 = vrot.slane %v1849_v44, 2 }
 0x2ba   : > { %v1835_v49 = vadd.f32 %v1834_v10, %v1833_v32  ;;  %v1568_v9 = vrot.slane %v1567_v17, 2  ;;  %v1573_v51 = vadd.f32 %v1572_v46, %v5134_v0  ;;  %v1838_v8 = vrot.slane %v1837_v28, 2 }
 0x2bb   : > { %v4043_v12 = vpop.eup %4042  ;;  %v1581_v61 = vadd.f32 %v1580_v5, %v1579_v62  ;;  %v1586_v37 = vrot.slane %v1585_v27, 2  ;;  %v5144_v60 = vadd.f32 %v4984_v13, %v4876_v1  ;;  %v1851_v39 = vadd.f32 %v1850_v25, %v1849_v44 }
 0x2bc   : > { %v4045_v20 = vpop.eup %4044  ;;  %v5147_v7 = vmul.f32 %v4043_v12, %v5044_v54  ;;  %v1962_v18 = vmul.f32 0.125, %v1835_v49  ;;  %v1569_v14 = vadd.f32 %v1568_v9, %v1567_v17  ;;  %v1839_v2 = vadd.f32 %v1838_v8, %v1837_v28 }
 0x2bd   : > { %v4047_v16 = vpop.eup %4046  ;;  %v5150_v36 = vmul.f32 %v4045_v20, %v5052_v42  ;;  %v1582_v32 = vrot.slane %v1581_v61, 1  ;;  %v1587_v57 = vadd.f32 %v1586_v37, %v1585_v27  ;;  %v1852_v29 = vrot.slane %v1851_v39, 1 }
 0x2be   : > { %v4049_v24 = vpop.eup %4048  ;;  %v5153_v38 = vmul.f32 %v4047_v16, %v5062_v59  ;;  %v1994_v13 = vadd.f32 1e-05, %v1962_v18  ;;  %v1570_v62 = vrot.slane %v1569_v14, 1  ;;  %v1840_v34 = vrot.slane %v1839_v2, 1 }
 0x2bf   : > { %v5156_v54 = vmul.f32 %v4049_v24, %v5072_v50  ;;  %v1583_v10 = vadd.f32 %v1582_v32, %v1581_v61  ;;  %v1588_v44 = vrot.slane %v1587_v57, 1  ;;  %v1853_v17 = vadd.f32 %v1852_v29, %v1851_v39 }
 0x2c0   : > { %4052 = vrsqrt.f32 %v1994_v13  ;;  %v1571_v42 = vadd.f32 %v1570_v62, %v1569_v14  ;;  %v1574_v46 = vrot.slane %v1573_v51, 2  ;;  %v1841_v28 = vadd.f32 %v1840_v34, %v1839_v2 }
 0x2c1   : > { %v1680_v5 = vmul.f32 0.125, %v1583_v10  ;;  %v1589_v27 = vadd.f32 %v1588_v44, %v1587_v57  ;;  %v1602_v49 = vrot.slane %v5144_v60, 4  ;;  %v1965_v59 = vmul.f32 0.125, %v1853_v17 }
 0x2c2   : > { %v1678_v25 = vmul.f32 0.125, %v1571_v42  ;;  %v1575_v9 = vadd.f32 %v1574_v46, %v1573_v51  ;;  %v5161_v12 = vadd.f32 %v4991_v48, %v4876_v1  ;;  %v1963_v8 = vmul.f32 0.125, %v1841_v28 }
 0x2c3   : > { %v4051_v50 = vpop.eup %4050  ;;  %v5164_v61 = vsub.f32 %v5116_v30, %v1680_v5  ;;  %v1681_v37 = vmul.f32 0.125, %v1589_v27  ;;  %v1603_v20 = vadd.f32 %v1602_v49, %v5144_v60  ;;  %v1997_v39 = vadd.f32 1e-05, %v1965_v59 }
 0x2c4   : > { %v5168_v18 = vmul.f32 %v4051_v50, %v5096_v41  ;;  %v5171_v14 = vsub.f32 %v5122_v53, %v1678_v25  ;;  %v1576_v51 = vrot.slane %v1575_v9, 1  ;;  %v1995_v16 = vadd.f32 1e-05, %v1963_v8 }
 0x2c5   : > { %v1744_v48 = vmul.f32 %v5164_v61, %v5164_v61  ;;  %v5176_v2 = vsub.f32 %v5129_v52, %v1681_v37  ;;  %v1604_v30 = vrot.slane %v1603_v20, 2  ;;  %4054 = vrsqrt.f32 %v1997_v39 }
 0x2c6   : > { %v1742_v32 = vmul.f32 %v5171_v14, %v5171_v14  ;;  %v1577_v57 = vadd.f32 %v1576_v51, %v1575_v9  ;;  %v1590_v41 = vrot.slane %v5161_v12, 4  ;;  %4056 = vrsqrt.f32 %v1995_v16 }
 0x2c7   : > { %v1866_v24 = vrot.slane %v1744_v48, 4  ;;  %v1745_v53 = vmul.f32 %v5176_v2, %v5176_v2  ;;  %v1605_v13 = vadd.f32 %v1604_v30, %v1603_v20  ;;  %v5186_v52 = vadd.f32 %v4998_v45, %v4876_v1 }
 0x2c8   : > { %v1854_v29 = vrot.slane %v1742_v32, 4  ;;  %v1679_v62 = vmul.f32 0.125, %v1577_v57  ;;  %v1591_v34 = vadd.f32 %v1590_v41, %v5161_v12  ;;  %v5190_v42 = vadd.f32 %v5002_v40, %v4876_v1 }
 0x2c9   : > { %v1867_v10 = vadd.f32 %v1866_v24, %v1744_v48  ;;  %v1872_v44 = vrot.slane %v1745_v53, 4  ;;  %v1606_v17 = vrot.slane %v1605_v13, 1  ;;  %v1608_v49 = vrot.slane %v5186_v52, 4 }
 0x2ca   : > { %v4053_v46 = vpop.eup %4052  ;;  %v1855_v28 = vadd.f32 %v1854_v29, %v1742_v32  ;;  %v5193_v5 = vsub.f32 %v5134_v0, %v1679_v62  ;;  %v1592_v27 = vrot.slane %v1591_v34, 2  ;;  %v1596_v51 = vrot.slane %v5190_v42, 4 }
 0x2cb   : > { %v5197_v59 = vmul.f32 %v4053_v46, %v5104_v33  ;;  %v1868_v45 = vrot.slane %v1867_v10, 2  ;;  %v1873_v25 = vadd.f32 %v1872_v44, %v1745_v53  ;;  %v1607_v9 = vadd.f32 %v1606_v17, %v1605_v13 }
 0x2cc   : > { %v1856_v50 = vrot.slane %v1855_v28, 2  ;;  %v1743_v8 = vmul.f32 %v5193_v5, %v5193_v5  ;;  %v1593_v40 = vadd.f32 %v1592_v27, %v1591_v34  ;;  %v1609_v37 = vadd.f32 %v1608_v49, %v5186_v52 }
 0x2cd   : > { %v1869_v20 = vadd.f32 %v1868_v45, %v1867_v10  ;;  %v1874_v39 = vrot.slane %v1873_v25, 2  ;;  %v1684_v0 = vmul.f32 0.125, %v1607_v9  ;;  %v1597_v24 = vadd.f32 %v1596_v51, %v5190_v42 }
 0x2ce   : > { %v1857_v16 = vadd.f32 %v1856_v50, %v1855_v28  ;;  %v1860_v48 = vrot.slane %v1743_v8, 4  ;;  %v1594_v30 = vrot.slane %v1593_v40, 1  ;;  %v1610_v33 = vrot.slane %v1609_v37, 2 }
 0x2cf   : > { %v1870_v32 = vrot.slane %v1869_v20, 1  ;;  %v1875_v57 = vadd.f32 %v1874_v39, %v1873_v25  ;;  %v5204_v41 = vsub.f32 %v5144_v60, %v1684_v0  ;;  %v4055_v53 = vpop.eup %4054 }
 0x2d0   : > { %v1858_v13 = vrot.slane %v1857_v16, 1  ;;  %v1861_v29 = vadd.f32 %v1860_v48, %v1743_v8  ;;  %v1595_v62 = vadd.f32 %v1594_v30, %v1593_v40  ;;  %v1611_v34 = vadd.f32 %v1610_v33, %v1609_v37  ;;  %v4057_v10 = vpop.eup %4056 }
 0x2d1   : > { %v5208_v44 = vmul.f32 %v4055_v53, %v5109_v55  ;;  %v1871_v17 = vadd.f32 %v1870_v32, %v1869_v20  ;;  %v1876_v46 = vrot.slane %v1875_v57, 1  ;;  %v1748_v28 = vmul.f32 %v5204_v41, %v5204_v41 }
 0x2d2   : > { %v5213_v27 = vmul.f32 %v4057_v10, %v5112_v23  ;;  %v1859_v60 = vadd.f32 %v1858_v13, %v1857_v16  ;;  %v1862_v49 = vrot.slane %v1861_v29, 2  ;;  %v1682_v45 = vmul.f32 0.125, %v1595_v62 }
 0x2d3   : > { %v1968_v25 = vmul.f32 0.125, %v1871_v17  ;;  %v1877_v9 = vadd.f32 %v1876_v46, %v1875_v57  ;;  %v1890_v50 = vrot.slane %v1748_v28, 4  ;;  %v1612_v8 = vrot.slane %v1611_v34, 1 }
 0x2d4   : > { %v1966_v40 = vmul.f32 0.125, %v1859_v60  ;;  %v1863_v37 = vadd.f32 %v1862_v49, %v1861_v29  ;;  %v5216_v55 = vsub.f32 %v5161_v12, %v1682_v45  ;;  %v1598_v20 = vrot.slane %v1597_v24, 2 }
 0x2d5   : > { %v2000_v39 = vadd.f32 1e-05, %v1968_v25  ;;  %v1969_v0 = vmul.f32 0.125, %v1877_v9  ;;  %v1891_v51 = vadd.f32 %v1890_v50, %v1748_v28  ;;  %v1613_v48 = vadd.f32 %v1612_v8, %v1611_v34 }
 0x2d6   : > { %v1998_v30 = vadd.f32 1e-05, %v1966_v40  ;;  %v1864_v23 = vrot.slane %v1863_v37, 1  ;;  %v1746_v16 = vmul.f32 %v5216_v55, %v5216_v55  ;;  %v1599_v33 = vadd.f32 %v1598_v20, %v1597_v24 }
 0x2d7   : > { %4058 = vrsqrt.f32 %v2000_v39  ;;  %v2001_v32 = vadd.f32 1e-05, %v1969_v0  ;;  %v1892_v57 = vrot.slane %v1891_v51, 2  ;;  %v1685_v53 = vmul.f32 0.125, %v1613_v48 }
 0x2d8   : > { %4060 = vrsqrt.f32 %v1998_v30  ;;  %v1865_v13 = vadd.f32 %v1864_v23, %v1863_v37  ;;  %v1878_v29 = vrot.slane %v1746_v16, 4  ;;  %v1600_v12 = vrot.slane %v1599_v33, 1 }
 0x2d9   : > { %4062 = vrsqrt.f32 %v2001_v32  ;;  %v1893_v62 = vadd.f32 %v1892_v57, %v1891_v51  ;;  %v5221_v10 = vsub.f32 %v5186_v52, %v1685_v53  ;;  %v5225_v34 = vadd.f32 %v5013_v58, %v4876_v1 }
 0x2da   : > { %v1967_v17 = vmul.f32 0.125, %v1865_v13  ;;  %v1879_v46 = vadd.f32 %v1878_v29, %v1746_v16  ;;  %v1601_v24 = vadd.f32 %v1600_v12, %v1599_v33  ;;  %v5229_v28 = vadd.f32 %v5019_v6, %v4876_v1 }
 0x2db   : > { %v1894_v60 = vrot.slane %v1893_v62, 1  ;;  %v1749_v49 = vmul.f32 %v5221_v10, %v5221_v10  ;;  %v1626_v45 = vrot.slane %v5225_v34, 4  ;;  %v5236_v52 = vadd.f32 %v5023_v56, %v4876_v1 }
 0x2dc   : > { %v1999_v25 = vadd.f32 1e-05, %v1967_v17  ;;  %v1880_v58 = vrot.slane %v1879_v46, 2  ;;  %v1683_v9 = vmul.f32 0.125, %v1601_v24  ;;  %v1614_v50 = vrot.slane %v5229_v28, 4 }
 0x2dd   : > { %v1895_v8 = vadd.f32 %v1894_v60, %v1893_v62  ;;  %v1896_v40 = vrot.slane %v1749_v49, 4  ;;  %v1627_v6 = vadd.f32 %v1626_v45, %v5225_v34  ;;  %v1632_v37 = vrot.slane %v5236_v52, 4 }
 0x2de   : > { %4064 = vrsqrt.f32 %v1999_v25  ;;  %v1881_v20 = vadd.f32 %v1880_v58, %v1879_v46  ;;  %v5242_v39 = vsub.f32 %v5190_v42, %v1683_v9  ;;  %v1615_v0 = vadd.f32 %v1614_v50, %v5229_v28 }
 0x2df   : > { %v1972_v56 = vmul.f32 0.125, %v1895_v8  ;;  %v1897_v51 = vadd.f32 %v1896_v40, %v1749_v49  ;;  %v1628_v48 = vrot.slane %v1627_v6, 2  ;;  %v1633_v30 = vadd.f32 %v1632_v37, %v5236_v52 }
 0x2e0   : > { %v1882_v23 = vrot.slane %v1881_v20, 1  ;;  %v1747_v16 = vmul.f32 %v5242_v39, %v5242_v39  ;;  %v1616_v33 = vrot.slane %v1615_v0, 2  ;;  %v5250_v32 = vadd.f32 %v5029_v47, %v4876_v1 }
 0x2e1   : > { %v4059_v57 = vpop.eup %4058  ;;  %v2004_v53 = vadd.f32 1e-05, %v1972_v56  ;;  %v1898_v42 = vrot.slane %v1897_v51, 2  ;;  %v1629_v13 = vadd.f32 %v1628_v48, %v1627_v6  ;;  %v1634_v29 = vrot.slane %v1633_v30, 2 }
 0x2e2   : > { %v4061_v12 = vpop.eup %4060  ;;  %v5253_v62 = vmul.f32 %v4059_v57, %v5164_v61  ;;  %v1883_v17 = vadd.f32 %v1882_v23, %v1881_v20  ;;  %v1884_v46 = vrot.slane %v1747_v16, 4  ;;  %v1617_v24 = vadd.f32 %v1616_v33, %v1615_v0 }
 0x2e3   : > { %v4063_v60 = vpop.eup %4062  ;;  %v5256_v49 = vmul.f32 %v4061_v12, %v5171_v14  ;;  %4066 = vrsqrt.f32 %v2004_v53  ;;  %v1899_v45 = vadd.f32 %v1898_v42, %v1897_v51  ;;  %v1630_v47 = vrot.slane %v1629_v13, 1 }
 0x2e4   : > { %v5259_v25 = vmul.f32 %v4063_v60, %v5176_v2  ;;  %v1970_v58 = vmul.f32 0.125, %v1883_v17  ;;  %v1885_v9 = vadd.f32 %v1884_v46, %v1747_v16  ;;  %v1618_v50 = vrot.slane %v1617_v24, 1 }
 0x2e5   : > { %v1900_v8 = vrot.slane %v1899_v45, 1  ;;  %v1631_v40 = vadd.f32 %v1630_v47, %v1629_v13  ;;  %v1635_v61 = vadd.f32 %v1634_v29, %v1633_v30  ;;  %v1620_v6 = vrot.slane %v5250_v32, 4 }
 0x2e6   : > { %v2002_v37 = vadd.f32 1e-05, %v1970_v58  ;;  %v1886_v20 = vrot.slane %v1885_v9, 2  ;;  %v1619_v0 = vadd.f32 %v1618_v50, %v1617_v24  ;;  %v5264_v14 = vadd.f32 %v5054_v3, %v4876_v1 }
 0x2e7   : > { %v1901_v56 = vadd.f32 %v1900_v8, %v1899_v45  ;;  %v1688_v51 = vmul.f32 0.125, %v1631_v40  ;;  %v1636_v48 = vrot.slane %v1635_v61, 1  ;;  %v1621_v2 = vadd.f32 %v1620_v6, %v5250_v32 }
 0x2e8   : > { %v4065_v23 = vpop.eup %4064  ;;  %4068 = vrsqrt.f32 %v2002_v37  ;;  %v1887_v16 = vadd.f32 %v1886_v20, %v1885_v9  ;;  %v1686_v33 = vmul.f32 0.125, %v1619_v0  ;;  %v1650_v30 = vrot.slane %v5264_v14, 4 }
 0x2e9   : > { %v5269_v57 = vmul.f32 %v4065_v23, %v5193_v5  ;;  %v1973_v53 = vmul.f32 0.125, %v1901_v56  ;;  %v5272_v42 = vsub.f32 %v5225_v34, %v1688_v51  ;;  %v1637_v3 = vadd.f32 %v1636_v48, %v1635_v61 }
 0x2ea   : > { %v1888_v13 = vrot.slane %v1887_v16, 1  ;;  %v5275_v29 = vsub.f32 %v5229_v28, %v1686_v33  ;;  %v1622_v12 = vrot.slane %v1621_v2, 2  ;;  %v1651_v17 = vadd.f32 %v1650_v30, %v5264_v14 }
 0x2eb   : > { %v2005_v46 = vadd.f32 1e-05, %v1973_v53  ;;  %v1752_v24 = vmul.f32 %v5272_v42, %v5272_v42  ;;  %v1689_v60 = vmul.f32 0.125, %v1637_v3  ;;  %v5282_v5 = vadd.f32 %v5064_v22, %v4876_v1 }
 0x2ec   : > { %v1889_v45 = vadd.f32 %v1888_v13, %v1887_v16  ;;  %v1750_v34 = vmul.f32 %v5275_v29, %v5275_v29  ;;  %v1623_v47 = vadd.f32 %v1622_v12, %v1621_v2  ;;  %v1652_v58 = vrot.slane %v1651_v17, 2 }
 0x2ed   : > { %v4067_v28 = vpop.eup %4066  ;;  %4070 = vrsqrt.f32 %v2005_v46  ;;  %v1914_v9 = vrot.slane %v1752_v24, 4  ;;  %v5287_v50 = vsub.f32 %v5236_v52, %v1689_v60  ;;  %v1638_v8 = vrot.slane %v5282_v5, 4 }
 0x2ee   : > { %v5291_v40 = vmul.f32 %v4067_v28, %v5204_v41  ;;  %v1971_v61 = vmul.f32 0.125, %v1889_v45  ;;  %v1902_v22 = vrot.slane %v1750_v34, 4  ;;  %v1624_v6 = vrot.slane %v1623_v47, 1 }
 0x2ef   : > { %v1915_v37 = vadd.f32 %v1914_v9, %v1752_v24  ;;  %v1753_v20 = vmul.f32 %v5287_v50, %v5287_v50  ;;  %v1653_v0 = vadd.f32 %v1652_v58, %v1651_v17  ;;  %v1639_v56 = vadd.f32 %v1638_v8, %v5282_v5 }
 0x2f0   : > { %v2003_v51 = vadd.f32 1e-05, %v1971_v61  ;;  %v1903_v48 = vadd.f32 %v1902_v22, %v1750_v34  ;;  %v1625_v2 = vadd.f32 %v1624_v6, %v1623_v47  ;;  %v5298_v52 = vadd.f32 %v5075_v63, %v4876_v1 }
 0x2f1   : > { %v1916_v23 = vrot.slane %v1915_v37, 2  ;;  %v1920_v41 = vrot.slane %v1753_v20, 4  ;;  %v1654_v16 = vrot.slane %v1653_v0, 1  ;;  %v1640_v33 = vrot.slane %v1639_v56, 2 }
 0x2f2   : > { %v4069_v30 = vpop.eup %4068  ;;  %4072 = vrsqrt.f32 %v2003_v51  ;;  %v1904_v53 = vrot.slane %v1903_v48, 2  ;;  %v1687_v3 = vmul.f32 0.125, %v1625_v2  ;;  %v1656_v13 = vrot.slane %v5298_v52, 4 }
 0x2f3   : > { %v5302_v12 = vmul.f32 %v4069_v30, %v5216_v55  ;;  %v1917_v17 = vadd.f32 %v1916_v23, %v1915_v37  ;;  %v1921_v46 = vadd.f32 %v1920_v41, %v1753_v20  ;;  %v1655_v24 = vadd.f32 %v1654_v16, %v1653_v0 }
 0x2f4   : > { %v1905_v60 = vadd.f32 %v1904_v53, %v1903_v48  ;;  %v5305_v63 = vsub.f32 %v5250_v32, %v1687_v3  ;;  %v1641_v45 = vadd.f32 %v1640_v33, %v1639_v56  ;;  %v1657_v34 = vadd.f32 %v1656_v13, %v5298_v52 }
 0x2f5   : > { %v1918_v47 = vrot.slane %v1917_v17, 1  ;;  %v1922_v58 = vrot.slane %v1921_v46, 2  ;;  %v1692_v28 = vmul.f32 0.125, %v1655_v24  ;;  %v5310_v9 = vadd.f32 %v5082_v31, %v4876_v1 }
 0x2f6   : > { %v1906_v8 = vrot.slane %v1905_v60, 1  ;;  %v1751_v55 = vmul.f32 %v5305_v63, %v5305_v63  ;;  %v1642_v61 = vrot.slane %v1641_v45, 1  ;;  %v1658_v22 = vrot.slane %v1657_v34, 2 }
 0x2f7   : > { %v4071_v6 = vpop.eup %4070  ;;  %v1919_v37 = vadd.f32 %v1918_v47, %v1917_v17  ;;  %v1923_v32 = vadd.f32 %v1922_v58, %v1921_v46  ;;  %v5315_v20 = vsub.f32 %v5264_v14, %v1692_v28  ;;  %v1644_v0 = vrot.slane %v5310_v9, 4 }
 0x2f8   : > { %v5319_v56 = vmul.f32 %v4071_v6, %v5221_v10  ;;  %v1907_v51 = vadd.f32 %v1906_v8, %v1905_v60  ;;  %v1908_v1 = vrot.slane %v1751_v55, 4  ;;  %v1643_v31 = vadd.f32 %v1642_v61, %v1641_v45 }
 0x2f9   : > { %v1976_v48 = vmul.f32 0.125, %v1919_v37  ;;  %v1924_v2 = vrot.slane %v1923_v32, 1  ;;  %v1756_v23 = vmul.f32 %v5315_v20, %v5315_v20  ;;  %v1659_v41 = vadd.f32 %v1658_v22, %v1657_v34 }
 0x2fa   : > { %v1974_v16 = vmul.f32 0.125, %v1907_v51  ;;  %v1909_v33 = vadd.f32 %v1908_v1, %v1751_v55  ;;  %v1690_v30 = vmul.f32 0.125, %v1643_v31  ;;  %v1645_v14 = vadd.f32 %v1644_v0, %v5310_v9 }
 0x2fb   : > { %v2008_v53 = vadd.f32 1e-05, %v1976_v48  ;;  %v1925_v3 = vadd.f32 %v1924_v2, %v1923_v32  ;;  %v1938_v13 = vrot.slane %v1756_v23, 4  ;;  %v1660_v17 = vrot.slane %v1659_v41, 1 }
 0x2fc   : > { %v4073_v10 = vpop.eup %4072  ;;  %v2006_v46 = vadd.f32 1e-05, %v1974_v16  ;;  %v1910_v24 = vrot.slane %v1909_v33, 2  ;;  %v5325_v60 = vsub.f32 %v5282_v5, %v1690_v30  ;;  %v1646_v45 = vrot.slane %v1645_v14, 2 }
 0x2fd   : > { %v5328_v47 = vmul.f32 %v4073_v10, %v5242_v39  ;;  %4074 = vrsqrt.f32 %v2008_v53  ;;  %v1977_v34 = vmul.f32 0.125, %v1925_v3  ;;  %v1939_v58 = vadd.f32 %v1938_v13, %v1756_v23 }
 0x2fe   : > { %4076 = vrsqrt.f32 %v2006_v46  ;;  %v1911_v28 = vadd.f32 %v1910_v24, %v1909_v33  ;;  %v1754_v8 = vmul.f32 %v5325_v60, %v5325_v60  ;;  %v1661_v55 = vadd.f32 %v1660_v17, %v1659_v41 }
 0x2ff   : > { %v2009_v61 = vadd.f32 1e-05, %v1977_v34  ;;  %v1940_v22 = vrot.slane %v1939_v58, 2  ;;  %v1647_v6 = vadd.f32 %v1646_v45, %v1645_v14  ;;  %v2082_v5 = vmul.f32 %v4890_v19, %v5016_v21 }
 0x300   : > { %v1912_v37 = vrot.slane %v1911_v28, 1  ;;  %v1926_v32 = vrot.slane %v1754_v8, 4  ;;  %v1693_v0 = vmul.f32 0.125, %v1661_v55  ;;  %v2083_v39 = vmul.f32 %v4890_v19, %v5026_v35 }
 0x301   : > { %4078 = vrsqrt.f32 %v2009_v61  ;;  %v1941_v51 = vadd.f32 %v1940_v22, %v1939_v58  ;;  %v1648_v1 = vrot.slane %v1647_v6, 1  ;;  %v2118_v31 = vadd.f32 %v4896_v11, %v2082_v5 }
 0x302   : > { %v1913_v48 = vadd.f32 %v1912_v37, %v1911_v28  ;;  %v1927_v2 = vadd.f32 %v1926_v32, %v1754_v8  ;;  %v5338_v23 = vsub.f32 %v5298_v52, %v1693_v0  ;;  %v2119_v41 = vadd.f32 %v4896_v11, %v2083_v39 }
 0x303   : > { %v1942_v16 = vrot.slane %v1941_v51, 1  ;;  %v1649_v21 = vadd.f32 %v1648_v1, %v1647_v6  ;;  %v2150_v33 = vmax.f32 %v2118_v31, 0.0  ;;  %v6179_v30 = vmax.f32 %v5032_v43, 0.0  ;;  %v6181_v1 = vld [vmem:[#allocation3_spill] sm:$0xff] }
 0x304   : > { %v6180_v14 = vmax.f32 %v5041_v26, 0.0  ;;  %v1975_v53 = vmul.f32 0.125, %v1913_v48  ;;  %v1928_v3 = vrot.slane %v1927_v2, 2  ;;  %v1757_v13 = vmul.f32 %v5338_v23, %v5338_v23 }
 0x305   : > { %v2151_v17 = vmax.f32 %v2119_v41, 0.0  ;;  %v1943_v10 = vadd.f32 %v1942_v16, %v1941_v51  ;;  %v1691_v46 = vmul.f32 0.125, %v1649_v21  ;;  %v2086_v52 = vmul.f32 %v4890_v19, %v5057_v4 }
 0x306   : > { %v2183_v35 = vpack.c.bf16 %v6180_v14, %v6179_v30  ;;  %v2087_v24 = vmul.f32 %v4890_v19, %v5078_v15  ;;  %v2007_v45 = vadd.f32 1e-05, %v1975_v53  ;;  %v1929_v34 = vadd.f32 %v1928_v3, %v1927_v2  ;;  %v6182_v2 = vld [vmem:[#allocation5_spill] sm:$0xff] }
 0x307   : > { %v1944_v43 = vrot.slane %v1757_v13, 4  ;;  %v2182_v58 = vpack.c.bf16 %v2151_v17, %v2150_v33  ;;  %v4075_v26 = vpop.eup %4074  ;;  %v1980_v28 = vmul.f32 0.125, %v1943_v10  ;;  %v5352_v8 = vsub.f32 %v5310_v9, %v1691_v46 }
 0x308   : > { %v2122_v55 = vadd.f32 %v4896_v11, %v2086_v52  ;;  %v2123_v61 = vadd.f32 %v4896_v11, %v2087_v24  ;;  %v4077_v22 = vpop.eup %4076  ;;  %v5357_v6 = vmul.f32 %v4075_v26, %v5272_v42  ;;  %4080 = vrsqrt.f32 %v2007_v45 }
 0x309   : > { %v1930_v4 = vrot.slane %v1929_v34, 1  ;;  %v1945_v15 = vadd.f32 %v1944_v43, %v1757_v13  ;;  %3817 = vmatprep.mubr.bf16.mxu0 %v2182_v58  ;;  %v5360_v5 = vmul.f32 %v4077_v22, %v5275_v29  ;;  %v2012_v37 = vadd.f32 1e-05, %v1980_v28 }
 0x30a   : > { %v1755_v9 = vmul.f32 %v5352_v8, %v5352_v8  ;;  %3818 = vmatmul.mubr.bf16.vlgmr.msra.gmra.mrb[32].mxu0 %v2183_v35  ;;  %v2154_v32 = vmax.f32 %v2122_v55, 0.0  ;;  %v2155_v51 = vmax.f32 %v2123_v61, 0.0  ;;  %v2088_v42 = vmul.f32 %v4890_v19, %v6181_v1 }
 0x30b   : > { %v1931_v0 = vadd.f32 %v1930_v4, %v1929_v34  ;;  %v1946_v39 = vrot.slane %v1945_v15, 2  ;;  %v4079_v31 = vpop.eup %4078  ;;  %4082 = vrsqrt.f32 %v2012_v37  ;;  %v2089_v41 = vmul.f32 %v4890_v19, %v6182_v2 }
 0x30c   : > { %v1932_v48 = vrot.slane %v1755_v9, 4  ;;  %v2090_v29 = vmul.f32 %v4890_v19, %v5150_v36  ;;  %v5371_v16 = vmul.f32 %v4079_v31, %v5287_v50  ;;  %v2184_v30 = vpack.c.bf16 %v2155_v51, %v2154_v32 }
 0x30d   : > { %v1978_v21 = vmul.f32 0.125, %v1931_v0  ;;  %v1947_v33 = vadd.f32 %v1946_v39, %v1945_v15  ;;  %v2124_v35 = vadd.f32 %v4896_v11, %v2088_v42  ;;  %v2125_v53 = vadd.f32 %v4896_v11, %v2089_v41 }
 0x30e   : > { %v1933_v14 = vadd.f32 %v1932_v48, %v1755_v9  ;;  %v2091_v3 = vmul.f32 %v4890_v19, %v5156_v54  ;;  %3821 = vmatprep.mubr.bf16.mxu0 %v2184_v30  ;;  %v2126_v10 = vadd.f32 %v4896_v11, %v2090_v29  ;;  %v2092_v36 = vmul.f32 %v4890_v19, %v5147_v7 }
 0x30f   : > { %v2010_v13 = vadd.f32 1e-05, %v1978_v21  ;;  %v1948_v17 = vrot.slane %v1947_v33, 1  ;;  %v2156_v46 = vmax.f32 %v2124_v35, 0.0  ;;  %v2157_v52 = vmax.f32 %v2125_v53, 0.0 }
 0x310   : > { %v1934_v50 = vrot.slane %v1933_v14, 2  ;;  %v2127_v24 = vadd.f32 %v4896_v11, %v2091_v3  ;;  %v2158_v34 = vmax.f32 %v2126_v10, 0.0  ;;  %v2093_v43 = vmul.f32 %v4890_v19, %v5153_v38 }
 0x311   : > { %4084 = vrsqrt.f32 %v2010_v13  ;;  %v1949_v45 = vadd.f32 %v1948_v17, %v1947_v33  ;;  %v2185_v58 = vpack.c.bf16 %v2157_v52, %v2156_v46  ;;  %v2128_v28 = vadd.f32 %v4896_v11, %v2092_v36 }
 0x312   : > { %v1935_v54 = vadd.f32 %v1934_v50, %v1933_v14  ;;  %v2159_v26 = vmax.f32 %v2127_v24, 0.0  ;;  %v4081_v55 = vpop.eup %4080  ;;  %v2129_v7 = vadd.f32 %v4896_v11, %v2093_v43  ;;  %v2094_v22 = vmul.f32 %v4890_v19, %v5197_v59 }
 0x313   : > { %v1981_v61 = vmul.f32 0.125, %v1949_v45  ;;  %v2095_v4 = vmul.f32 %v4890_v19, %v5213_v27  ;;  %v2071_v15 = vmul.f32 %v4081_v55, %v5305_v63  ;;  %3822 = vmatmul.mubr.bf16.gmra.mrb[36].mxu0 %v2185_v58  ;;  %v2160_v9 = vmax.f32 %v2128_v28, 0.0 }
 0x314   : > { %v1936_v37 = vrot.slane %v1935_v54, 1  ;;  %v2186_v38 = vpack.c.bf16 %v2159_v26, %v2158_v34  ;;  %v2161_v0 = vmax.f32 %v2129_v7, 0.0  ;;  %v2130_v39 = vadd.f32 %v4896_v11, %v2094_v22 }
 0x315   : > { %v2013_v32 = vadd.f32 1e-05, %v1981_v61  ;;  %v2131_v51 = vadd.f32 %v4896_v11, %v2095_v4  ;;  %v4083_v1 = vpop.eup %4082  ;;  %v2096_v59 = vmul.f32 %v4890_v19, %v5168_v18  ;;  %v2097_v27 = vmul.f32 %v4890_v19, %v5208_v44 }
 0x316   : > { %v1937_v42 = vadd.f32 %v1936_v37, %v1935_v54  ;;  %3825 = vmatprep.mubr.bf16.mxu0 %v2186_v38  ;;  %v2098_v63 = vmul.f32 %v4890_v19, %v5256_v49  ;;  %v2076_v31 = vmul.f32 %v4083_v1, %v5315_v20  ;;  %v2187_v48 = vpack.c.bf16 %v2161_v0, %v2160_v9 }
 0x317   : > { %4086 = vrsqrt.f32 %v2013_v32  ;;  %v2162_v2 = vmax.f32 %v2130_v39, 0.0  ;;  %v2163_v29 = vmax.f32 %v2131_v51, 0.0  ;;  %v2132_v21 = vadd.f32 %v4896_v11, %v2096_v59 }
 0x318   : > { %v1979_v41 = vmul.f32 0.125, %v1937_v42  ;;  %v2133_v33 = vadd.f32 %v4896_v11, %v2097_v27  ;;  %v2099_v18 = vmul.f32 %v4890_v19, %v5269_v57  ;;  %v2134_v30 = vadd.f32 %v4896_v11, %v2098_v63 }
 0x319   : > { %v2100_v44 = vmul.f32 %v4890_v19, %v5253_v62  ;;  %v2101_v49 = vmul.f32 %v4890_v19, %v5259_v25  ;;  %v2188_v14 = vpack.c.bf16 %v2163_v29, %v2162_v2  ;;  %v2164_v35 = vmax.f32 %v2132_v21, 0.0 }
 0x31a   : > { %v2011_v20 = vadd.f32 1e-05, %v1979_v41  ;;  %v2165_v53 = vmax.f32 %v2133_v33, 0.0  ;;  %v2135_v13 = vadd.f32 %v4896_v11, %v2099_v18  ;;  %v2166_v17 = vmax.f32 %v2134_v30, 0.0 }
 0x31b   : > { %v4085_v3 = vpop.eup %4084  ;;  %v2136_v10 = vadd.f32 %v4896_v11, %v2100_v44  ;;  %v2137_v57 = vadd.f32 %v4896_v11, %v2101_v49  ;;  %3826 = vmatmul.mubr.bf16.gmra.mrb[40].mxu0 %v2187_v48  ;;  %v2102_v25 = vmul.f32 %v4890_v19, %v5302_v12  ;;  %v2103_v24 = vmul.f32 %v4890_v19, %v5328_v47 }
 0x31c   : > { %v2074_v36 = vmul.f32 %v4085_v3, %v5325_v60  ;;  %4088 = vrsqrt.f32 %v2011_v20  ;;  %v2189_v62 = vpack.c.bf16 %v2165_v53, %v2164_v35  ;;  %3829 = vmatprep.mubr.bf16.mxu0 %v2188_v14  ;;  %v2167_v50 = vmax.f32 %v2135_v13, 0.0  ;;  %v3957_v14 = vld [vmem:[%s6160_s1 + $0xd8] sm:$0xff]   ;;  %v3958_v35 = vld [vmem:[%s6160_s1 + $0xe0] sm:$0xff]   ;;  %v3959_v53 = vld [vmem:[%s6160_s1 + $0xe8] sm:$0xff]  }
 0x31d   : > { %v2168_v46 = vmax.f32 %v2136_v10, 0.0  ;;  %v2169_v52 = vmax.f32 %v2137_v57, 0.0  ;;  %v2138_v45 = vadd.f32 %v4896_v11, %v2102_v25  ;;  %v2104_v34 = vmul.f32 %v4890_v19, %v5291_v40  ;;  %v3594_v3 = vld [vmem:[%s6161_s2 + $0x10] sm:$0xff]  ;;  %v6183_v13 = vld [vmem:[#allocation2_spill] sm:$0xff] }
 0x31e   : > { %v2105_v60 = vmul.f32 %v4890_v19, %v5319_v56  ;;  %v2106_v43 = vmul.f32 %v4890_v19, %v5360_v5  ;;  %v2190_v54 = vpack.c.bf16 %v2167_v50, %v2166_v17  ;;  %v2139_v58 = vadd.f32 %v4896_v11, %v2103_v24  ;;  %v3960_v50 = vld [vmem:[%s6160_s1 + $0xf0] sm:$0xff]  }
 0x31f   : > { %v2191_v12 = vpack.c.bf16 %v2169_v52, %v2168_v46  ;;  %v2107_v26 = vmul.f32 %v4890_v19, %v2071_v15  ;;  %v2170_v28 = vmax.f32 %v2138_v45, 0.0  ;;  %v2140_v47 = vadd.f32 %v4896_v11, %v2104_v34 }
 0x320   : > { %v2141_v55 = vadd.f32 %v4896_v11, %v2105_v60  ;;  %v2142_v61 = vadd.f32 %v4896_v11, %v2106_v43  ;;  %v2171_v7 = vmax.f32 %v2139_v58, 0.0  ;;  %v2108_v5 = vmul.f32 %v4890_v19, %v5357_v6 }
 0x321   : > { %v4087_v40 = vpop.eup %4086  ;;  %v2143_v56 = vadd.f32 %v4896_v11, %v2107_v26  ;;  %v2109_v22 = vmul.f32 %v4890_v19, %v5371_v16  ;;  %v2172_v15 = vmax.f32 %v2140_v47, 0.0  ;;  %v2112_v1 = vmul.f32 %v4890_v19, %v2076_v31 }
 0x322   : > { %v2077_v4 = vmul.f32 %v4087_v40, %v5338_v23  ;;  %v2173_v37 = vmax.f32 %v2141_v55, 0.0  ;;  %v2174_v38 = vmax.f32 %v2142_v61, 0.0  ;;  %v2192_v9 = vpack.c.bf16 %v2171_v7, %v2170_v28 }
 0x323   : > { %v2175_v32 = vmax.f32 %v2143_v56, 0.0  ;;  %v2144_v0 = vadd.f32 %v4896_v11, %v2108_v5  ;;  %v2145_v39 = vadd.f32 %v4896_v11, %v2109_v22  ;;  %3830 = vmatmul.mubr.bf16.gmra.mrb[44].mxu0 %v2189_v62  ;;  %v2110_v23 = vmul.f32 %v4890_v19, %v2074_v36  ;;  %v3961_v5 = vld [vmem:[%s6160_s1 + $0xf8] sm:$0xff]  }
 0x324   : > { %v2193_v51 = vpack.c.bf16 %v2173_v37, %v2172_v15  ;;  %v2113_v6 = vmul.f32 %v4890_v19, %v2077_v4  ;;  %3833 = vmatprep.mubr.bf16.mxu0 %v2190_v54  ;;  %v2148_v63 = vadd.f32 %v4896_v11, %v2112_v1  ;;  %v5467_v17 = vrot.slane %v3594_v3, %v6183_v13  ;;  %v6184_v4 = vld [vmem:[#allocation6_spill] sm:$0xff] }
 0x325   : > { %v2194_v42 = vpack.c.bf16 %v2175_v32, %v2174_v38  ;;  %v2176_v16 = vmax.f32 %v2144_v0, 0.0  ;;  %v2177_v59 = vmax.f32 %v2145_v39, 0.0  ;;  %v2146_v33 = vadd.f32 %v4896_v11, %v2110_v23  ;;  %v6185_v32 = vld [vmem:[#allocation7_spill] sm:$0xff] }
 0x326   : > { %v4089_v27 = vpop.eup %4088  ;;  %v2149_v48 = vadd.f32 %v4896_v11, %v2113_v6  ;;  %v2180_v29 = vmax.f32 %v2148_v63, 0.0  ;;  %v5488_v15 = vrot.slane %v3594_v3, %v6184_v4  ;;  %v5494_v0 = vrot.slane %v3594_v3, %v6185_v32 }
 0x327   : > { %v2075_v2 = vmul.f32 %v4089_v27, %v5352_v8  ;;  %v2195_v41 = vpack.c.bf16 %v2177_v59, %v2176_v16  ;;  %v2178_v44 = vmax.f32 %v2146_v33, 0.0  ;;  %v3954_v8 = vld [vmem:[%s6160_s1 + $0xc0] sm:$0xff]  }
 0x328   : > { %v2181_v21 = vmax.f32 %v2149_v48, 0.0  ;;  %3897 = vmatprep.subr.bf16.mxu1 %v3954_v8  ;;  %3849 = vmatprep.subr.bf16.mxu0 %v3954_v8 }
 0x329   : > { %v2111_v31 = vmul.f32 %v4890_v19, %v2075_v2  ;;  %3905 = vmatpush3.bf16.msra.mxu1 %v3954_v8  ;;  %3850 = vmatpush3.bf16.msra.mxu0 %v3954_v8  ;;  %v3955_v19 = vld [vmem:[%s6160_s1 + $0xc8] sm:$0xff]  }
 0x32a   : > { %v2197_v18 = vpack.c.bf16 %v2181_v21, %v2180_v29  ;;  %3898 = vmatprep.subr.bf16.mxu1 %v3955_v19  ;;  %3851 = vmatprep.subr.bf16.mxu0 %v3955_v19 }
 0x32b   : > { %v2147_v30 = vadd.f32 %v4896_v11, %v2111_v31  ;;  %3834 = vmatmul.mubr.bf16.gmra.mrb[48].mxu0 %v2191_v12  ;;  %v3956_v11 = vld [vmem:[%s6160_s1 + $0xd0] sm:$0xff]  }
 0x32c   : > { %3837 = vmatprep.mubr.bf16.mxu0 %v2192_v9 }
 0x32d   : > { %v2179_v49 = vmax.f32 %v2147_v30, 0.0  ;;  %3906 = vmatpush3.bf16.msra.mxu1 %v3955_v19  ;;  %3852 = vmatpush3.bf16.msra.mxu0 %v3955_v19 }
 0x32e   : > { %3899 = vmatprep.subr.bf16.mxu1 %v3956_v11  ;;  %3853 = vmatprep.subr.bf16.mxu0 %v3956_v11 }
 0x32f   : > { %v2196_v20 = vpack.c.bf16 %v2179_v49, %v2178_v44 }
 0x331   : > { %3907 = vmatpush3.bf16.msra.mxu1 %v3956_v11  ;;  %3854 = vmatpush3.bf16.msra.mxu0 %v3956_v11 }
 0x332   : > { %3900 = vmatprep.subr.bf16.mxu1 %v3957_v14  ;;  %3855 = vmatprep.subr.bf16.mxu0 %v3957_v14 }
 0x333   : > { %3838 = vmatmul.mubr.bf16.gmra.mrb[52].mxu0 %v2193_v51 }
 0x334   : > { %3841 = vmatprep.mubr.bf16.mxu0 %v2194_v42 }
 0x335   : > { %3908 = vmatpush3.bf16.msra.mxu1 %v3957_v14  ;;  %3856 = vmatpush3.bf16.msra.mxu0 %v3957_v14 }
 0x336   : > { %3901 = vmatprep.subr.bf16.mxu1 %v3958_v35  ;;  %3857 = vmatprep.subr.bf16.mxu0 %v3958_v35 }
 0x339   : > { %3909 = vmatpush3.bf16.msra.mxu1 %v3958_v35  ;;  %3858 = vmatpush3.bf16.msra.mxu0 %v3958_v35 }
 0x33a   : > { %3902 = vmatprep.subr.bf16.mxu1 %v3959_v53  ;;  %3859 = vmatprep.subr.bf16.mxu0 %v3959_v53 }
 0x33b   : > { %3842 = vmatmul.mubr.bf16.gmra.mrb[56].mxu0 %v2195_v41 }
 0x33c   : > { %3845 = vmatprep.mubr.bf16.mxu0 %v2196_v20 }
 0x33d   : > { %3910 = vmatpush3.bf16.msra.mxu1 %v3959_v53  ;;  %3860 = vmatpush3.bf16.msra.mxu0 %v3959_v53 }
 0x33e   : > { %3903 = vmatprep.subr.bf16.mxu1 %v3960_v50  ;;  %3861 = vmatprep.subr.bf16.mxu0 %v3960_v50 }
 0x341   : > { %3911 = vmatpush3.bf16.msra.mxu1 %v3960_v50  ;;  %3862 = vmatpush3.bf16.msra.mxu0 %v3960_v50 }
 0x342   : > { %3863 = vmatprep.subr.bf16.mxu0 %v3961_v5  ;;  %3904 = vmatprep.subr.bf16.mxu1 %v3961_v5 }
 0x343   : > { %3846 = vmatmul.mubr.bf16.gmra.mrb[60].mxu0 %v2197_v18 }
 0x345   : > { %3864 = vmatpush3.bf16.msra.mxu0 %v3961_v5  ;;  %3912 = vmatpush3.bf16.msra.mxu1 %v3961_v5 }
 0x3dd   : > { %v3819_v10 = vpop.f32.mrb[32].mxu0 }
 0x3de   : > { %v2312_v57 = vadd.f32 %v3819_v10, %v5467_v17  ;;  %v2303_v36 = vpop.f32.mrb[33].mxu0 }
 0x3df   : > { %v2304_v62 = vadd.f32 %v2303_v36, %v5467_v17  ;;  %v3820_v25 = vpop.f32.mrb[34].mxu0 }
 0x3e0   : > { %v2442_v46 = vrot.slane %v2312_v57, 4  ;;  %v5475_v52 = vadd.f32 %v3820_v25, %v5467_v17  ;;  %v2306_v24 = vpop.f32.mrb[35].mxu0 }
 0x3e1   : > { %v2430_v45 = vrot.slane %v2304_v62, 4  ;;  %v5478_v34 = vadd.f32 %v2306_v24, %v5467_v17 }
 0x3e2   : > { %v2443_v60 = vadd.f32 %v2442_v46, %v2312_v57  ;;  %v2448_v43 = vrot.slane %v5475_v52, 4 }
 0x3e3   : > { %v2431_v54 = vadd.f32 %v2430_v45, %v2304_v62  ;;  %v2436_v12 = vrot.slane %v5478_v34, 4 }
 0x3e4   : > { %v2444_v58 = vrot.slane %v2443_v60, 2  ;;  %v2449_v26 = vadd.f32 %v2448_v43, %v5475_v52 }
 0x3e5   : > { %v2432_v28 = vrot.slane %v2431_v54, 2  ;;  %v2437_v47 = vadd.f32 %v2436_v12, %v5478_v34 }
 0x3e6   : > { %v2445_v55 = vadd.f32 %v2444_v58, %v2443_v60  ;;  %v2450_v61 = vrot.slane %v2449_v26, 2  ;;  %v3823_v56 = vpop.f32.mrb[36].mxu0 }
 0x3e7   : > { %v2433_v40 = vadd.f32 %v2432_v28, %v2431_v54  ;;  %v2438_v7 = vrot.slane %v2437_v47, 2  ;;  %v5491_v38 = vadd.f32 %v3823_v56, %v5467_v17  ;;  %v2319_v9 = vpop.f32.mrb[37].mxu0 }
 0x3e8   : > { %v2446_v22 = vrot.slane %v2445_v55, 1  ;;  %v2451_v37 = vadd.f32 %v2450_v61, %v2449_v26  ;;  %v5497_v1 = vadd.f32 %v2319_v9, %v5467_v17  ;;  %v3824_v6 = vpop.f32.mrb[38].mxu0 }
 0x3e9   : > { %v2434_v39 = vrot.slane %v2433_v40, 1  ;;  %v2439_v51 = vadd.f32 %v2438_v7, %v2437_v47  ;;  %v2466_v59 = vrot.slane %v5491_v38, 4  ;;  %v5501_v23 = vadd.f32 %v3824_v6, %v5467_v17  ;;  %v2322_v27 = vpop.f32.mrb[39].mxu0 }
 0x3ea   : > { %v2447_v42 = vadd.f32 %v2446_v22, %v2445_v55  ;;  %v2452_v16 = vrot.slane %v2451_v37, 1  ;;  %v2454_v2 = vrot.slane %v5497_v1, 4  ;;  %v5505_v41 = vadd.f32 %v2322_v27, %v5467_v17 }
 0x3eb   : > { %v2435_v63 = vadd.f32 %v2434_v39, %v2433_v40  ;;  %v2440_v48 = vrot.slane %v2439_v51, 1  ;;  %v2467_v31 = vadd.f32 %v2466_v59, %v5491_v38  ;;  %v2472_v33 = vrot.slane %v5501_v23, 4 }
 0x3ec   : > { %v2624_v29 = vmul.f32 0.125, %v2447_v42  ;;  %v2453_v21 = vadd.f32 %v2452_v16, %v2451_v37  ;;  %v2455_v44 = vadd.f32 %v2454_v2, %v5497_v1  ;;  %v2460_v49 = vrot.slane %v5505_v41, 4 }
 0x3ed   : > { %v2622_v18 = vmul.f32 0.125, %v2435_v63  ;;  %v2441_v30 = vadd.f32 %v2440_v48, %v2439_v51  ;;  %v2468_v19 = vrot.slane %v2467_v31, 2  ;;  %v2473_v11 = vadd.f32 %v2472_v33, %v5501_v23 }
 0x3ee   : > { %v5511_v20 = vsub.f32 %v2312_v57, %v2624_v29  ;;  %v2625_v8 = vmul.f32 0.125, %v2453_v21  ;;  %v2456_v53 = vrot.slane %v2455_v44, 2  ;;  %v2461_v3 = vadd.f32 %v2460_v49, %v5505_v41  ;;  %v5517_v10 = vpop.f32.mrb[40].mxu0 }
 0x3ef   : > { %v5514_v14 = vsub.f32 %v2304_v62, %v2622_v18  ;;  %v2623_v35 = vmul.f32 0.125, %v2441_v30  ;;  %v2469_v57 = vadd.f32 %v2468_v19, %v2467_v31  ;;  %v2474_v50 = vrot.slane %v2473_v11, 2  ;;  %v5524_v46 = vpop.f32.mrb[41].mxu0 }
 0x3f0   : > { %v2688_v36 = vmul.f32 %v5511_v20, %v5511_v20  ;;  %v5522_v25 = vsub.f32 %v5475_v52, %v2625_v8  ;;  %v2457_v45 = vadd.f32 %v2456_v53, %v2455_v44  ;;  %v2462_v60 = vrot.slane %v2461_v3, 2  ;;  %v5531_v43 = vpop.f32.mrb[42].mxu0 }
 0x3f1   : > { %v2686_v62 = vmul.f32 %v5514_v14, %v5514_v14  ;;  %v5529_v24 = vsub.f32 %v5478_v34, %v2623_v35  ;;  %v2470_v52 = vrot.slane %v2469_v57, 1  ;;  %v2475_v58 = vadd.f32 %v2474_v50, %v2473_v11  ;;  %v5535_v26 = vpop.f32.mrb[43].mxu0 }
 0x3f2   : > { %v2730_v54 = vrot.slane %v2688_v36, 4  ;;  %v2689_v12 = vmul.f32 %v5522_v25, %v5522_v25  ;;  %v2458_v55 = vrot.slane %v2457_v45, 1  ;;  %v2463_v61 = vadd.f32 %v2462_v60, %v2461_v3 }
 0x3f3   : > { %v2718_v28 = vrot.slane %v2686_v62, 4  ;;  %v2687_v47 = vmul.f32 %v5529_v24, %v5529_v24  ;;  %v2471_v7 = vadd.f32 %v2470_v52, %v2469_v57  ;;  %v2476_v56 = vrot.slane %v2475_v58, 1 }
 0x3f4   : > { %v2731_v34 = vadd.f32 %v2730_v54, %v2688_v36  ;;  %v2736_v40 = vrot.slane %v2689_v12, 4  ;;  %v2459_v4 = vadd.f32 %v2458_v55, %v2457_v45  ;;  %v2464_v37 = vrot.slane %v2463_v61, 1 }
 0x3f5   : > { %v2719_v5 = vadd.f32 %v2718_v28, %v2686_v62  ;;  %v2724_v22 = vrot.slane %v2687_v47, 4  ;;  %v2628_v39 = vmul.f32 0.125, %v2471_v7  ;;  %v2477_v51 = vadd.f32 %v2476_v56, %v2475_v58 }
 0x3f6   : > { %v2732_v9 = vrot.slane %v2731_v34, 2  ;;  %v2737_v32 = vadd.f32 %v2736_v40, %v2689_v12  ;;  %v2626_v16 = vmul.f32 0.125, %v2459_v4  ;;  %v2465_v59 = vadd.f32 %v2464_v37, %v2463_v61  ;;  %v5539_v27 = vpop.f32.mrb[44].mxu0 }
 0x3f7   : > { %v2720_v6 = vrot.slane %v2719_v5, 2  ;;  %v2725_v42 = vadd.f32 %v2724_v22, %v2687_v47  ;;  %v5542_v2 = vsub.f32 %v5491_v38, %v2628_v39  ;;  %v2629_v29 = vmul.f32 0.125, %v2477_v51  ;;  %v5544_v21 = vpop.f32.mrb[45].mxu0 }
 0x3f8   : > { %v2733_v63 = vadd.f32 %v2732_v9, %v2731_v34  ;;  %v2738_v48 = vrot.slane %v2737_v32, 2  ;;  %v5547_v18 = vsub.f32 %v5497_v1, %v2626_v16  ;;  %v2627_v30 = vmul.f32 0.125, %v2465_v59  ;;  %v5549_v44 = vpop.f32.mrb[46].mxu0 }
 0x3f9   : > { %v2721_v31 = vadd.f32 %v2720_v6, %v2719_v5  ;;  %v2726_v33 = vrot.slane %v2725_v42, 2  ;;  %v2692_v19 = vmul.f32 %v5542_v2, %v5542_v2  ;;  %v5554_v11 = vsub.f32 %v5501_v23, %v2629_v29  ;;  %v5556_v38 = vpop.f32.mrb[47].mxu0 }
 0x3fa   : > { %v2734_v49 = vrot.slane %v2733_v63, 1  ;;  %v2739_v8 = vadd.f32 %v2738_v48, %v2737_v32  ;;  %v2690_v3 = vmul.f32 %v5547_v18, %v5547_v18  ;;  %v5561_v1 = vsub.f32 %v5505_v41, %v2627_v30 }
 0x3fb   : > { %v2722_v35 = vrot.slane %v2721_v31, 1  ;;  %v2727_v53 = vadd.f32 %v2726_v33, %v2725_v42  ;;  %v2754_v50 = vrot.slane %v2692_v19, 4  ;;  %v2693_v62 = vmul.f32 %v5554_v11, %v5554_v11 }
 0x3fc   : > { %v2735_v36 = vadd.f32 %v2734_v49, %v2733_v63  ;;  %v2740_v57 = vrot.slane %v2739_v8, 1  ;;  %v2742_v23 = vrot.slane %v2690_v3, 4  ;;  %v2691_v54 = vmul.f32 %v5561_v1, %v5561_v1 }
 0x3fd   : > { %v2723_v45 = vadd.f32 %v2722_v35, %v2721_v31  ;;  %v2728_v60 = vrot.slane %v2727_v53, 1  ;;  %v2755_v58 = vadd.f32 %v2754_v50, %v2692_v19  ;;  %v2760_v28 = vrot.slane %v2693_v62, 4 }
 0x3fe   : > { %v2912_v12 = vmul.f32 0.125, %v2735_v36  ;;  %v2741_v52 = vadd.f32 %v2740_v57, %v2739_v8  ;;  %v2743_v41 = vadd.f32 %v2742_v23, %v2690_v3  ;;  %v2748_v61 = vrot.slane %v2691_v54, 4  ;;  %v5567_v34 = vpop.f32.mrb[48].mxu0 }
 0x3ff   : > { %v2910_v47 = vmul.f32 0.125, %v2723_v45  ;;  %v2729_v55 = vadd.f32 %v2728_v60, %v2727_v53  ;;  %v2756_v56 = vrot.slane %v2755_v58, 2  ;;  %v2761_v5 = vadd.f32 %v2760_v28, %v2693_v62  ;;  %v5569_v22 = vpop.f32.mrb[49].mxu0 }
 0x400   : > { %v2944_v40 = vadd.f32 1e-05, %v2912_v12  ;;  %v2913_v7 = vmul.f32 0.125, %v2741_v52  ;;  %v2744_v9 = vrot.slane %v2743_v41, 2  ;;  %v2749_v32 = vadd.f32 %v2748_v61, %v2691_v54  ;;  %v5571_v39 = vpop.f32.mrb[50].mxu0 }
 0x401   : > { %v2942_v4 = vadd.f32 1e-05, %v2910_v47  ;;  %v2911_v37 = vmul.f32 0.125, %v2729_v55  ;;  %v2757_v6 = vadd.f32 %v2756_v56, %v2755_v58  ;;  %v2762_v42 = vrot.slane %v2761_v5, 2  ;;  %v5573_v16 = vpop.f32.mrb[51].mxu0 }
 0x402   : > { %4090 = vrsqrt.f32 %v2944_v40  ;;  %v2945_v51 = vadd.f32 1e-05, %v2913_v7  ;;  %v2745_v63 = vadd.f32 %v2744_v9, %v2743_v41  ;;  %v2750_v48 = vrot.slane %v2749_v32, 2 }
 0x403   : > { %4092 = vrsqrt.f32 %v2942_v4  ;;  %v2943_v59 = vadd.f32 1e-05, %v2911_v37  ;;  %v2758_v29 = vrot.slane %v2757_v6, 1  ;;  %v2763_v31 = vadd.f32 %v2762_v42, %v2761_v5 }
 0x404   : > { %4094 = vrsqrt.f32 %v2945_v51  ;;  %v5577_v33 = vadd.f32 %v5517_v10, %v5467_v17  ;;  %v2746_v30 = vrot.slane %v2745_v63, 1  ;;  %v2751_v49 = vadd.f32 %v2750_v48, %v2749_v32 }
 0x405   : > { %4096 = vrsqrt.f32 %v2943_v59  ;;  %v5581_v8 = vadd.f32 %v5524_v46, %v5467_v17  ;;  %v2759_v19 = vadd.f32 %v2758_v29, %v2757_v6  ;;  %v2764_v35 = vrot.slane %v2763_v31, 1 }
 0x406   : > { %v2490_v53 = vrot.slane %v5577_v33, 4  ;;  %v5586_v3 = vadd.f32 %v5531_v43, %v5467_v17  ;;  %v2747_v36 = vadd.f32 %v2746_v30, %v2745_v63  ;;  %v2752_v57 = vrot.slane %v2751_v49, 1  ;;  %v5593_v62 = vpop.f32.mrb[52].mxu0 }
 0x407   : > { %v2478_v10 = vrot.slane %v5581_v8, 4  ;;  %v5591_v50 = vadd.f32 %v5535_v26, %v5467_v17  ;;  %v2916_v46 = vmul.f32 0.125, %v2759_v19  ;;  %v2765_v45 = vadd.f32 %v2764_v35, %v2763_v31  ;;  %v5597_v54 = vpop.f32.mrb[53].mxu0 }
 0x408   : > { %v2491_v60 = vadd.f32 %v2490_v53, %v5577_v33  ;;  %v2496_v23 = vrot.slane %v5586_v3, 4  ;;  %v2914_v43 = vmul.f32 0.125, %v2747_v36  ;;  %v2753_v12 = vadd.f32 %v2752_v57, %v2751_v49  ;;  %v5601_v28 = vpop.f32.mrb[54].mxu0 }
 0x409   : > { %v2479_v52 = vadd.f32 %v2478_v10, %v5581_v8  ;;  %v2484_v58 = vrot.slane %v5591_v50, 4  ;;  %v2948_v26 = vadd.f32 1e-05, %v2916_v46  ;;  %v2917_v47 = vmul.f32 0.125, %v2765_v45  ;;  %v5604_v61 = vpop.f32.mrb[55].mxu0 }
 0x40a   : > { %v2492_v55 = vrot.slane %v2491_v60, 2  ;;  %v2497_v41 = vadd.f32 %v2496_v23, %v5586_v3  ;;  %v2946_v40 = vadd.f32 1e-05, %v2914_v43  ;;  %v2915_v7 = vmul.f32 0.125, %v2753_v12 }
 0x40b   : > { %v2480_v56 = vrot.slane %v2479_v52, 2  ;;  %v2485_v5 = vadd.f32 %v2484_v58, %v5591_v50  ;;  %4098 = vrsqrt.f32 %v2948_v26  ;;  %v2949_v37 = vadd.f32 1e-05, %v2917_v47 }
 0x40c   : > { %v4091_v4 = vpop.eup %4090  ;;  %v2493_v9 = vadd.f32 %v2492_v55, %v2491_v60  ;;  %v2498_v32 = vrot.slane %v2497_v41, 2  ;;  %4100 = vrsqrt.f32 %v2946_v40  ;;  %v2947_v42 = vadd.f32 1e-05, %v2915_v7 }
 0x40d   : > { %v4093_v51 = vpop.eup %4092  ;;  %v3008_v6 = vmul.f32 %v4091_v4, %v5511_v20  ;;  %v2481_v59 = vadd.f32 %v2480_v56, %v2479_v52  ;;  %4102 = vrsqrt.f32 %v2949_v37  ;;  %v2486_v57 = vrot.slane %v2485_v5, 2 }
 0x40e   : > { %v4095_v63 = vpop.eup %4094  ;;  %v2494_v48 = vrot.slane %v2493_v9, 1  ;;  %v2499_v29 = vadd.f32 %v2498_v32, %v2497_v41  ;;  %v5610_v49 = vmul.f32 %v4093_v51, %v5514_v14  ;;  %v5613_v53 = vpop.f32.mrb[56].mxu0  ;;  %4104 = vrsqrt.f32 %v2947_v42 }
 0x40f   : > { %v4097_v31 = vpop.eup %4096  ;;  %v3044_v30 = vmul.f32 %v5488_v15, %v3008_v6  ;;  %v3009_v19 = vmul.f32 %v4095_v63, %v5522_v25  ;;  %v2482_v35 = vrot.slane %v2481_v59, 1  ;;  %v5615_v10 = vpop.f32.mrb[57].mxu0  ;;  %v5623_v14 = vadd.f32 %v5539_v27, %v5467_v17 }
 0x410   : > { %v2495_v20 = vadd.f32 %v2494_v48, %v2493_v9  ;;  %v2500_v36 = vrot.slane %v2499_v29, 1  ;;  %v5625_v25 = vpop.f32.mrb[58].mxu0  ;;  %v2487_v12 = vadd.f32 %v2486_v57, %v2485_v5  ;;  %v5629_v52 = vadd.f32 %v5544_v21, %v5467_v17 }
 0x411   : > { %v5618_v46 = vadd.f32 %v5494_v0, %v3044_v30  ;;  %v3045_v45 = vmul.f32 %v5488_v15, %v3009_v19  ;;  %v2483_v60 = vadd.f32 %v2482_v35, %v2481_v59  ;;  %v5631_v58 = vpop.f32.mrb[59].mxu0  ;;  %v5637_v47 = vmul.f32 %v4097_v31, %v5529_v24 }
 0x412   : > { %v2632_v23 = vmul.f32 0.125, %v2495_v20  ;;  %v2501_v43 = vadd.f32 %v2500_v36, %v2499_v29  ;;  %v2514_v27 = vrot.slane %v5623_v14, 4  ;;  %v2488_v7 = vrot.slane %v2487_v12, 1 }
 0x413   : > { %v5634_v26 = vadd.f32 %v5494_v0, %v3045_v45  ;;  %v2630_v55 = vmul.f32 0.125, %v2483_v60  ;;  %v2502_v56 = vrot.slane %v5629_v52, 4  ;;  %v5651_v24 = vadd.f32 %v5549_v44, %v5467_v17 }
 0x414   : > { %v5641_v41 = vsub.f32 %v5577_v33, %v2632_v23  ;;  %v2633_v40 = vmul.f32 0.125, %v2501_v43  ;;  %v2515_v4 = vadd.f32 %v2514_v27, %v5623_v14  ;;  %v2489_v51 = vadd.f32 %v2488_v7, %v2487_v12 }
 0x415   : > { %v5646_v5 = vsub.f32 %v5581_v8, %v2630_v55  ;;  %v4099_v37 = vpop.eup %4098  ;;  %v2503_v44 = vadd.f32 %v2502_v56, %v5629_v52 }
 0x416   : > { %v2696_v33 = vmul.f32 %v5641_v41, %v5641_v41  ;;  %v5657_v32 = vsub.f32 %v5586_v3, %v2633_v40  ;;  %v4101_v6 = vpop.eup %4100  ;;  %v3012_v8 = vmul.f32 %v4099_v37, %v5542_v2  ;;  %v2516_v59 = vrot.slane %v2515_v4, 2  ;;  %v5663_v63 = vpop.f32.mrb[60].mxu0 }
 0x417   : > { %v2694_v42 = vmul.f32 %v5646_v5, %v5646_v5  ;;  %v4103_v48 = vpop.eup %4102  ;;  %v2631_v30 = vmul.f32 0.125, %v2489_v51  ;;  %v2520_v3 = vrot.slane %v5651_v24, 4  ;;  %v5668_v19 = vpop.f32.mrb[61].mxu0  ;;  %v5675_v60 = vmul.f32 %v4101_v6, %v5547_v18 }
 0x418   : > { %v2778_v29 = vrot.slane %v2696_v33, 4  ;;  %v2697_v31 = vmul.f32 %v5657_v32, %v5657_v32  ;;  %v3048_v2 = vmul.f32 %v5488_v15, %v3012_v8  ;;  %v3013_v35 = vmul.f32 %v4103_v48, %v5554_v11  ;;  %v5672_v57 = vpop.f32.mrb[62].mxu0  ;;  %v4105_v45 = vpop.eup %4104 }
 0x419   : > { %v2766_v20 = vrot.slane %v2694_v42, 4  ;;  %v2517_v36 = vadd.f32 %v2516_v59, %v2515_v4  ;;  %v5678_v12 = vsub.f32 %v5591_v50, %v2631_v30  ;;  %v5680_v55 = vpop.f32.mrb[63].mxu0  ;;  %v2504_v37 = vrot.slane %v2503_v44, 2 }
 0x41a   : > { %v2779_v23 = vadd.f32 %v2778_v29, %v2696_v33  ;;  %v2784_v43 = vrot.slane %v2697_v31, 4  ;;  %v5683_v27 = vadd.f32 %v5494_v0, %v3048_v2  ;;  %v3049_v11 = vmul.f32 %v5488_v15, %v3013_v35 }
 0x41b   : > { %v2767_v40 = vadd.f32 %v2766_v20, %v2694_v42  ;;  %v2518_v7 = vrot.slane %v2517_v36, 1  ;;  %v2695_v18 = vmul.f32 %v5678_v12, %v5678_v12  ;;  %v5690_v50 = vmul.f32 %v4105_v45, %v5561_v1 }
 0x41c   : > { %v2780_v56 = vrot.slane %v2779_v23, 2  ;;  %v2785_v4 = vadd.f32 %v2784_v43, %v2697_v31  ;;  %v2505_v29 = vadd.f32 %v2504_v37, %v2503_v44  ;;  %v5693_v42 = vadd.f32 %v5494_v0, %v3049_v11 }
 0x41d   : > { %v2768_v51 = vrot.slane %v2767_v40, 2  ;;  %v2519_v6 = vadd.f32 %v2518_v7, %v2517_v36  ;;  %v2772_v48 = vrot.slane %v2695_v18, 4  ;;  %v2521_v2 = vadd.f32 %v2520_v3, %v5651_v24 }
 0x41e   : > { %v2781_v8 = vadd.f32 %v2780_v56, %v2779_v23  ;;  %v2786_v59 = vrot.slane %v2785_v4, 2  ;;  %v2506_v33 = vrot.slane %v2505_v29, 1  ;;  %v5701_v45 = vadd.f32 %v5556_v38, %v5467_v17 }
 0x41f   : > { %v2769_v30 = vadd.f32 %v2768_v51, %v2767_v40  ;;  %v2636_v31 = vmul.f32 0.125, %v2519_v6  ;;  %v2773_v43 = vadd.f32 %v2772_v48, %v2695_v18  ;;  %v2522_v36 = vrot.slane %v2521_v2, 2 }
 0x420   : > { %v2782_v35 = vrot.slane %v2781_v8, 1  ;;  %v2787_v20 = vadd.f32 %v2786_v59, %v2785_v4  ;;  %v2507_v40 = vadd.f32 %v2506_v33, %v2505_v29  ;;  %v2508_v4 = vrot.slane %v5701_v45, 4 }
 0x421   : > { %v2770_v9 = vrot.slane %v2769_v30, 1  ;;  %v5697_v1 = vsub.f32 %v5623_v14, %v2636_v31  ;;  %v2774_v11 = vrot.slane %v2773_v43, 2  ;;  %v2523_v56 = vadd.f32 %v2522_v36, %v2521_v2 }
 0x422   : > { %v2783_v44 = vadd.f32 %v2782_v35, %v2781_v8  ;;  %v2788_v23 = vrot.slane %v2787_v20, 1  ;;  %v2634_v51 = vmul.f32 0.125, %v2507_v40  ;;  %v2509_v38 = vadd.f32 %v2508_v4, %v5701_v45 }
 0x423   : > { %v2771_v7 = vadd.f32 %v2770_v9, %v2769_v30  ;;  %v2700_v3 = vmul.f32 %v5697_v1, %v5697_v1  ;;  %v2775_v14 = vadd.f32 %v2774_v11, %v2773_v43  ;;  %v2524_v48 = vrot.slane %v2523_v56, 1 }
 0x424   : > { %v2920_v18 = vmul.f32 0.125, %v2783_v44  ;;  %v2789_v37 = vadd.f32 %v2788_v23, %v2787_v20  ;;  %v5708_v9 = vsub.f32 %v5629_v52, %v2634_v51  ;;  %v2510_v2 = vrot.slane %v2509_v38, 2 }
 0x425   : > { %v2918_v6 = vmul.f32 0.125, %v2771_v7  ;;  %v2802_v59 = vrot.slane %v2700_v3, 4  ;;  %v2776_v35 = vrot.slane %v2775_v14, 1  ;;  %v2525_v30 = vadd.f32 %v2524_v48, %v2523_v56 }
 0x426   : > { %v2952_v8 = vadd.f32 1e-05, %v2920_v18  ;;  %v2921_v31 = vmul.f32 0.125, %v2789_v37  ;;  %v2698_v43 = vmul.f32 %v5708_v9, %v5708_v9  ;;  %v2511_v11 = vadd.f32 %v2510_v2, %v2509_v38 }
 0x427   : > { %v2950_v33 = vadd.f32 1e-05, %v2918_v6  ;;  %v2803_v29 = vadd.f32 %v2802_v59, %v2700_v3  ;;  %v2777_v20 = vadd.f32 %v2776_v35, %v2775_v14  ;;  %v2637_v23 = vmul.f32 0.125, %v2525_v30 }
 0x428   : > { %4106 = vrsqrt.f32 %v2952_v8  ;;  %v2953_v36 = vadd.f32 1e-05, %v2921_v31  ;;  %v2790_v4 = vrot.slane %v2698_v43, 4  ;;  %v5715_v52 = vadd.f32 %v5567_v34, %v5467_v17 }
 0x429   : > { %4108 = vrsqrt.f32 %v2950_v33  ;;  %v2804_v44 = vrot.slane %v2803_v29, 2  ;;  %v2919_v7 = vmul.f32 0.125, %v2777_v20  ;;  %v5718_v56 = vsub.f32 %v5651_v24, %v2637_v23 }
 0x42a   : > { %v2512_v18 = vrot.slane %v2511_v11, 1  ;;  %v5722_v37 = vadd.f32 %v5569_v22, %v5467_v17  ;;  %4110 = vrsqrt.f32 %v2953_v36  ;;  %v2791_v14 = vadd.f32 %v2790_v4, %v2698_v43 }
 0x42b   : > { %v2805_v3 = vadd.f32 %v2804_v44, %v2803_v29  ;;  %v2538_v51 = vrot.slane %v5715_v52, 4  ;;  %v5727_v6 = vadd.f32 %v5571_v39, %v5467_v17  ;;  %v2701_v34 = vmul.f32 %v5718_v56, %v5718_v56 }
 0x42c   : > { %v2513_v48 = vadd.f32 %v2512_v18, %v2511_v11  ;;  %v2526_v24 = vrot.slane %v5722_v37, 4  ;;  %v2951_v38 = vadd.f32 1e-05, %v2919_v7  ;;  %v2792_v8 = vrot.slane %v2791_v14, 2 }
 0x42d   : > { %v2806_v59 = vrot.slane %v2805_v3, 1  ;;  %v2539_v22 = vadd.f32 %v2538_v51, %v5715_v52  ;;  %v2544_v31 = vrot.slane %v5727_v6, 4  ;;  %v2808_v33 = vrot.slane %v2701_v34, 4 }
 0x42e   : > { %v2635_v29 = vmul.f32 0.125, %v2513_v48  ;;  %v2527_v30 = vadd.f32 %v2526_v24, %v5722_v37  ;;  %v2793_v39 = vadd.f32 %v2792_v8, %v2791_v14  ;;  %v5738_v20 = vadd.f32 %v5573_v16, %v5467_v17 }
 0x42f   : > { %v2807_v35 = vadd.f32 %v2806_v59, %v2805_v3  ;;  %v2540_v2 = vrot.slane %v2539_v22, 2  ;;  %v2545_v36 = vadd.f32 %v2544_v31, %v5727_v6  ;;  %v2809_v44 = vadd.f32 %v2808_v33, %v2701_v34 }
 0x430   : > { %v5741_v23 = vsub.f32 %v5701_v45, %v2635_v29  ;;  %v2528_v11 = vrot.slane %v2527_v30, 2  ;;  %4112 = vrsqrt.f32 %v2951_v38  ;;  %v2794_v4 = vrot.slane %v2793_v39, 1 }
 0x431   : > { %v2924_v43 = vmul.f32 0.125, %v2807_v35  ;;  %v2541_v3 = vadd.f32 %v2540_v2, %v2539_v22  ;;  %v2546_v18 = vrot.slane %v2545_v36, 2  ;;  %v2810_v59 = vrot.slane %v2809_v44, 2 }
 0x432   : > { %v4107_v7 = vpop.eup %4106  ;;  %v2699_v48 = vmul.f32 %v5741_v23, %v5741_v23  ;;  %v2532_v16 = vrot.slane %v5738_v20, 4  ;;  %v2795_v34 = vadd.f32 %v2794_v4, %v2793_v39  ;;  %v2529_v8 = vadd.f32 %v2528_v11, %v2527_v30 }
 0x433   : > { %v4109_v51 = vpop.eup %4108  ;;  %v2956_v14 = vadd.f32 1e-05, %v2924_v43  ;;  %v5747_v24 = vmul.f32 %v4107_v7, %v5641_v41  ;;  %v2542_v45 = vrot.slane %v2541_v3, 1  ;;  %v2811_v38 = vadd.f32 %v2810_v59, %v2809_v44 }
 0x434   : > { %v5750_v31 = vmul.f32 %v4109_v51, %v5646_v5  ;;  %v2796_v22 = vrot.slane %v2699_v48, 4  ;;  %v4111_v35 = vpop.eup %4110  ;;  %v2922_v33 = vmul.f32 0.125, %v2795_v34  ;;  %v2530_v2 = vrot.slane %v2529_v8, 1 }
 0x435   : > { %4114 = vrsqrt.f32 %v2956_v14  ;;  %v2543_v29 = vadd.f32 %v2542_v45, %v2541_v3  ;;  %v2547_v43 = vadd.f32 %v2546_v18, %v2545_v36  ;;  %v2812_v40 = vrot.slane %v2811_v38, 1 }
 0x436   : > { %v2797_v21 = vadd.f32 %v2796_v22, %v2699_v48  ;;  %v2533_v13 = vadd.f32 %v2532_v16, %v5738_v20  ;;  %v5755_v41 = vadd.f32 %v5593_v62, %v5467_v17  ;;  %v2954_v30 = vadd.f32 1e-05, %v2922_v33 }
 0x437   : > { %v2640_v39 = vmul.f32 0.125, %v2543_v29  ;;  %v2531_v5 = vadd.f32 %v2530_v2, %v2529_v8  ;;  %v2548_v11 = vrot.slane %v2547_v43, 1  ;;  %v5758_v44 = vmul.f32 %v4111_v35, %v5657_v32 }
 0x438   : > { %v2813_v7 = vadd.f32 %v2812_v40, %v2811_v38  ;;  %v2798_v4 = vrot.slane %v2797_v21, 2  ;;  %v2534_v3 = vrot.slane %v2533_v13, 2  ;;  %4116 = vrsqrt.f32 %v2954_v30 }
 0x439   : > { %v5761_v36 = vsub.f32 %v5715_v52, %v2640_v39  ;;  %v2638_v18 = vmul.f32 0.125, %v2531_v5  ;;  %v2549_v51 = vadd.f32 %v2548_v11, %v2547_v43  ;;  %v2562_v48 = vrot.slane %v5755_v41, 4 }
 0x43a   : > { %v2925_v14 = vmul.f32 0.125, %v2813_v7  ;;  %v2799_v59 = vadd.f32 %v2798_v4, %v2797_v21  ;;  %v2535_v62 = vadd.f32 %v2534_v3, %v2533_v13  ;;  %v4113_v16 = vpop.eup %4112  ;;  %v5771_v45 = vadd.f32 %v5597_v54, %v5467_v17 }
 0x43b   : > { %v2704_v34 = vmul.f32 %v5761_v36, %v5761_v36  ;;  %v5767_v32 = vsub.f32 %v5722_v37, %v2638_v18  ;;  %v2641_v40 = vmul.f32 0.125, %v2549_v51  ;;  %v2563_v21 = vadd.f32 %v2562_v48, %v5755_v41 }
 0x43c   : > { %v2957_v52 = vadd.f32 1e-05, %v2925_v14  ;;  %v2800_v8 = vrot.slane %v2799_v59, 1  ;;  %v2536_v38 = vrot.slane %v2535_v62, 1  ;;  %v2550_v37 = vrot.slane %v5771_v45, 4 }
 0x43d   : > { %v2826_v13 = vrot.slane %v2704_v34, 4  ;;  %v2702_v22 = vmul.f32 %v5767_v32, %v5767_v32  ;;  %v5777_v35 = vsub.f32 %v5727_v6, %v2641_v40  ;;  %v5781_v29 = vmul.f32 %v4113_v16, %v5678_v12 }
 0x43e   : > { %v2801_v54 = vadd.f32 %v2800_v8, %v2799_v59  ;;  %v2537_v2 = vadd.f32 %v2536_v38, %v2535_v62  ;;  %v2564_v43 = vrot.slane %v2563_v21, 2  ;;  %4118 = vrsqrt.f32 %v2957_v52 }
 0x43f   : > { %v4115_v33 = vpop.eup %4114  ;;  %v2827_v30 = vadd.f32 %v2826_v13, %v2704_v34  ;;  %v2814_v39 = vrot.slane %v2702_v22, 4  ;;  %v2705_v5 = vmul.f32 %v5777_v35, %v5777_v35  ;;  %v2551_v6 = vadd.f32 %v2550_v37, %v5771_v45 }
 0x440   : > { %v2923_v11 = vmul.f32 0.125, %v2801_v54  ;;  %v2639_v7 = vmul.f32 0.125, %v2537_v2  ;;  %v2565_v4 = vadd.f32 %v2564_v43, %v2563_v21  ;;  %v5788_v12 = vadd.f32 %v5601_v28, %v5467_v17 }
 0x441   : > { %v2828_v3 = vrot.slane %v2827_v30, 2  ;;  %v2815_v18 = vadd.f32 %v2814_v39, %v2702_v22  ;;  %v2832_v51 = vrot.slane %v2705_v5, 4  ;;  %v5791_v14 = vmul.f32 %v4115_v33, %v5697_v1 }
 0x442   : > { %v5794_v59 = vsub.f32 %v5738_v20, %v2639_v7  ;;  %v2566_v62 = vrot.slane %v2565_v4, 1  ;;  %v2552_v48 = vrot.slane %v2551_v6, 2  ;;  %v4117_v16 = vpop.eup %4116  ;;  %v2568_v8 = vrot.slane %v5788_v12, 4 }
 0x443   : > { %v2829_v34 = vadd.f32 %v2828_v3, %v2827_v30  ;;  %v2816_v40 = vrot.slane %v2815_v18, 2  ;;  %v2833_v52 = vadd.f32 %v2832_v51, %v2705_v5  ;;  %v5798_v38 = vmul.f32 %v4117_v16, %v5708_v9 }
 0x444   : > { %v2955_v21 = vadd.f32 1e-05, %v2923_v11  ;;  %v2703_v28 = vmul.f32 %v5794_v59, %v5794_v59  ;;  %v2567_v1 = vadd.f32 %v2566_v62, %v2565_v4  ;;  %v2553_v37 = vadd.f32 %v2552_v48, %v2551_v6 }
 0x445   : > { %v2830_v13 = vrot.slane %v2829_v34, 1  ;;  %v2817_v22 = vadd.f32 %v2816_v40, %v2815_v18  ;;  %v2834_v20 = vrot.slane %v2833_v52, 2  ;;  %v2569_v2 = vadd.f32 %v2568_v8, %v5788_v12 }
 0x446   : > { %v2820_v33 = vrot.slane %v2703_v28, 4  ;;  %v2644_v54 = vmul.f32 0.125, %v2567_v1  ;;  %v5805_v43 = vadd.f32 %v5604_v61, %v5467_v17  ;;  %v2554_v5 = vrot.slane %v2553_v37, 1 }
 0x447   : > { %v2831_v30 = vadd.f32 %v2830_v13, %v2829_v34  ;;  %v2818_v9 = vrot.slane %v2817_v22, 1  ;;  %v2835_v39 = vadd.f32 %v2834_v20, %v2833_v52  ;;  %v2570_v4 = vrot.slane %v2569_v2, 2 }
 0x448   : > { %v2821_v11 = vadd.f32 %v2820_v33, %v2703_v28  ;;  %v5808_v7 = vsub.f32 %v5755_v41, %v2644_v54  ;;  %v2556_v3 = vrot.slane %v5805_v43, 4  ;;  %v4119_v6 = vpop.eup %4118  ;;  %4120 = vrsqrt.f32 %v2955_v21 }
 0x449   : > { %v2928_v18 = vmul.f32 0.125, %v2831_v30  ;;  %v2819_v51 = vadd.f32 %v2818_v9, %v2817_v22  ;;  %v2836_v62 = vrot.slane %v2835_v39, 1  ;;  %v2555_v16 = vadd.f32 %v2554_v5, %v2553_v37 }
 0x44a   : > { %v2822_v48 = vrot.slane %v2821_v11, 2  ;;  %v2708_v61 = vmul.f32 %v5808_v7, %v5808_v7  ;;  %v2571_v34 = vadd.f32 %v2570_v4, %v2569_v2  ;;  %v2557_v41 = vadd.f32 %v2556_v3, %v5805_v43 }
 0x44b   : > { %v2960_v40 = vadd.f32 1e-05, %v2928_v18  ;;  %v2926_v52 = vmul.f32 0.125, %v2819_v51  ;;  %v2837_v8 = vadd.f32 %v2836_v62, %v2835_v39  ;;  %v2642_v13 = vmul.f32 0.125, %v2555_v16 }
 0x44c   : > { %v2823_v28 = vadd.f32 %v2822_v48, %v2821_v11  ;;  %v2850_v1 = vrot.slane %v2708_v61, 4  ;;  %v2572_v20 = vrot.slane %v2571_v34, 1  ;;  %v2558_v22 = vrot.slane %v2557_v41, 2 }
 0x44d   : > { %4122 = vrsqrt.f32 %v2960_v40  ;;  %v2958_v21 = vadd.f32 1e-05, %v2926_v52  ;;  %v2929_v33 = vmul.f32 0.125, %v2837_v8  ;;  %v5815_v9 = vsub.f32 %v5771_v45, %v2642_v13 }
 0x44e   : > { %v2824_v54 = vrot.slane %v2823_v28, 1  ;;  %v2851_v30 = vadd.f32 %v2850_v1, %v2708_v61  ;;  %v2573_v37 = vadd.f32 %v2572_v20, %v2571_v34  ;;  %v5818_v2 = vmul.f32 %v4119_v6, %v5718_v56 }
 0x44f   : > { %4124 = vrsqrt.f32 %v2958_v21  ;;  %v2961_v39 = vadd.f32 1e-05, %v2929_v33  ;;  %v2559_v5 = vadd.f32 %v2558_v22, %v2557_v41  ;;  %v2706_v3 = vmul.f32 %v5815_v9, %v5815_v9 }
 0x450   : > { %v2825_v11 = vadd.f32 %v2824_v54, %v2823_v28  ;;  %v2852_v4 = vrot.slane %v2851_v30, 2  ;;  %v2645_v18 = vmul.f32 0.125, %v2573_v37  ;;  %v5824_v62 = vadd.f32 %v5613_v53, %v5467_v17 }
 0x451   : > { %4126 = vrsqrt.f32 %v2961_v39  ;;  %v2560_v51 = vrot.slane %v2559_v5, 1  ;;  %v5828_v45 = vadd.f32 %v5615_v10, %v5467_v17  ;;  %v2838_v48 = vrot.slane %v2706_v3, 4 }
 0x452   : > { %v2927_v56 = vmul.f32 0.125, %v2825_v11  ;;  %v2853_v6 = vadd.f32 %v2852_v4, %v2851_v30  ;;  %v5831_v61 = vsub.f32 %v5788_v12, %v2645_v18  ;;  %v4121_v16 = vpop.eup %4120  ;;  %v2586_v40 = vrot.slane %v5824_v62, 4 }
 0x453   : > { %v2561_v34 = vadd.f32 %v2560_v51, %v2559_v5  ;;  %v2574_v52 = vrot.slane %v5828_v45, 4  ;;  %v5837_v53 = vadd.f32 %v5625_v25, %v5467_v17  ;;  %v2839_v10 = vadd.f32 %v2838_v48, %v2706_v3 }
 0x454   : > { %v2959_v8 = vadd.f32 1e-05, %v2927_v56  ;;  %v2854_v41 = vrot.slane %v2853_v6, 1  ;;  %v2709_v28 = vmul.f32 %v5831_v61, %v5831_v61  ;;  %v2587_v12 = vadd.f32 %v2586_v40, %v5824_v62 }
 0x455   : > { %v2643_v1 = vmul.f32 0.125, %v2561_v34  ;;  %v2575_v13 = vadd.f32 %v2574_v52, %v5828_v45  ;;  %v2592_v20 = vrot.slane %v5837_v53, 4  ;;  %v5845_v21 = vmul.f32 %v4121_v16, %v5741_v23 }
 0x456   : > { %v2855_v33 = vadd.f32 %v2854_v41, %v2853_v6  ;;  %v2840_v22 = vrot.slane %v2839_v10, 2  ;;  %v2856_v25 = vrot.slane %v2709_v28, 4  ;;  %v2588_v37 = vrot.slane %v2587_v12, 2 }
 0x457   : > { %v4123_v54 = vpop.eup %4122  ;;  %v5848_v30 = vsub.f32 %v5805_v43, %v2643_v1  ;;  %v2576_v39 = vrot.slane %v2575_v13, 2  ;;  %v2593_v5 = vadd.f32 %v2592_v20, %v5837_v53  ;;  %4128 = vrsqrt.f32 %v2959_v8 }
 0x458   : > { %v2932_v11 = vmul.f32 0.125, %v2855_v33  ;;  %v2841_v4 = vadd.f32 %v2840_v22, %v2839_v10  ;;  %v2857_v3 = vadd.f32 %v2856_v25, %v2709_v28  ;;  %v2589_v51 = vadd.f32 %v2588_v37, %v2587_v12 }
 0x459   : > { %v4125_v18 = vpop.eup %4124  ;;  %v2707_v23 = vmul.f32 %v5848_v30, %v5848_v30  ;;  %v2577_v56 = vadd.f32 %v2576_v39, %v2575_v13  ;;  %v2594_v6 = vrot.slane %v2593_v5, 2  ;;  %v5854_v48 = vmul.f32 %v4123_v54, %v5761_v36 }
 0x45a   : > { %v2964_v43 = vadd.f32 1e-05, %v2932_v11  ;;  %v2842_v16 = vrot.slane %v2841_v4, 1  ;;  %v2858_v34 = vrot.slane %v2857_v3, 2  ;;  %v2590_v41 = vrot.slane %v2589_v51, 1 }
 0x45b   : > { %v4127_v40 = vpop.eup %4126  ;;  %v2844_v52 = vrot.slane %v2707_v23, 4  ;;  %v2578_v8 = vrot.slane %v2577_v56, 1  ;;  %v2595_v1 = vadd.f32 %v2594_v6, %v2593_v5  ;;  %v5857_v10 = vmul.f32 %v4125_v18, %v5767_v32 }
 0x45c   : > { %4130 = vrsqrt.f32 %v2964_v43  ;;  %v2843_v28 = vadd.f32 %v2842_v16, %v2841_v4  ;;  %v2859_v20 = vadd.f32 %v2858_v34, %v2857_v3  ;;  %v2591_v13 = vadd.f32 %v2590_v41, %v2589_v51 }
 0x45d   : > { %v2845_v12 = vadd.f32 %v2844_v52, %v2707_v23  ;;  %v2579_v33 = vadd.f32 %v2578_v8, %v2577_v56  ;;  %v2596_v22 = vrot.slane %v2595_v1, 1  ;;  %v5861_v54 = vadd.f32 %v5631_v58, %v5467_v17 }
 0x45e   : > { %v2930_v36 = vmul.f32 0.125, %v2843_v28  ;;  %v2860_v25 = vrot.slane %v2859_v20, 1  ;;  %v5865_v37 = vadd.f32 %v5663_v63, %v5467_v17  ;;  %v2648_v32 = vmul.f32 0.125, %v2591_v13 }
 0x45f   : > { %v2846_v39 = vrot.slane %v2845_v12, 2  ;;  %v2646_v5 = vmul.f32 0.125, %v2579_v33  ;;  %v2597_v11 = vadd.f32 %v2596_v22, %v2595_v1  ;;  %v2580_v18 = vrot.slane %v5861_v54, 4 }
 0x460   : > { %v2962_v4 = vadd.f32 1e-05, %v2930_v36  ;;  %v2861_v3 = vadd.f32 %v2860_v25, %v2859_v20  ;;  %v2610_v23 = vrot.slane %v5865_v37, 4  ;;  %v5870_v51 = vmul.f32 %v4127_v40, %v5777_v35 }
 0x461   : > { %v2847_v56 = vadd.f32 %v2846_v39, %v2845_v12  ;;  %v5873_v58 = vsub.f32 %v5824_v62, %v2648_v32  ;;  %v5876_v63 = vsub.f32 %v5828_v45, %v2646_v5  ;;  %v4129_v6 = vpop.eup %4128  ;;  %v2649_v16 = vmul.f32 0.125, %v2597_v11 }
 0x462   : > { %4132 = vrsqrt.f32 %v2962_v4  ;;  %v2933_v43 = vmul.f32 0.125, %v2861_v3  ;;  %v2581_v34 = vadd.f32 %v2580_v18, %v5861_v54  ;;  %v2611_v40 = vadd.f32 %v2610_v23, %v5865_v37 }
 0x463   : > { %v2848_v52 = vrot.slane %v2847_v56, 1  ;;  %v2712_v41 = vmul.f32 %v5873_v58, %v5873_v58  ;;  %v2710_v35 = vmul.f32 %v5876_v63, %v5876_v63  ;;  %v5885_v8 = vsub.f32 %v5837_v53, %v2649_v16 }
 0x464   : > { %v2965_v62 = vadd.f32 1e-05, %v2933_v43  ;;  %v2582_v45 = vrot.slane %v2581_v34, 2  ;;  %v5889_v1 = vadd.f32 %v5668_v19, %v5467_v17  ;;  %v2612_v13 = vrot.slane %v2611_v40, 2 }
 0x465   : > { %v2849_v28 = vadd.f32 %v2848_v52, %v2847_v56  ;;  %v2874_v20 = vrot.slane %v2712_v41, 4  ;;  %v2862_v12 = vrot.slane %v2710_v35, 4  ;;  %v5892_v22 = vmul.f32 %v4129_v6, %v5794_v59 }
 0x466   : > { %v4131_v33 = vpop.eup %4130  ;;  %v2713_v36 = vmul.f32 %v5885_v8, %v5885_v8  ;;  %v2583_v25 = vadd.f32 %v2582_v45, %v2581_v34  ;;  %v2598_v53 = vrot.slane %v5889_v1, 4  ;;  %4134 = vrsqrt.f32 %v2965_v62 }
 0x467   : > { %v2931_v39 = vmul.f32 0.125, %v2849_v28  ;;  %v2875_v32 = vadd.f32 %v2874_v20, %v2712_v41  ;;  %v2863_v5 = vadd.f32 %v2862_v12, %v2710_v35  ;;  %v2613_v4 = vadd.f32 %v2612_v13, %v2611_v40 }
 0x468   : > { %v2880_v19 = vrot.slane %v2713_v36, 4  ;;  %v2584_v11 = vrot.slane %v2583_v25, 1  ;;  %v2599_v3 = vadd.f32 %v2598_v53, %v5889_v1  ;;  %v5900_v59 = vadd.f32 %v5672_v57, %v5467_v17 }
 0x469   : > { %v2963_v18 = vadd.f32 1e-05, %v2931_v39  ;;  %v2876_v23 = vrot.slane %v2875_v32, 2  ;;  %v2864_v56 = vrot.slane %v2863_v5, 2  ;;  %v2614_v16 = vrot.slane %v2613_v4, 1 }
 0x46a   : > { %v2881_v6 = vadd.f32 %v2880_v19, %v2713_v36  ;;  %v2585_v43 = vadd.f32 %v2584_v11, %v2583_v25  ;;  %v2600_v34 = vrot.slane %v2599_v3, 2  ;;  %v5903_v52 = vmul.f32 %v4131_v33, %v5808_v7 }
 0x46b   : > { %v2877_v41 = vadd.f32 %v2876_v23, %v2875_v32  ;;  %v2865_v35 = vadd.f32 %v2864_v56, %v2863_v5  ;;  %v2616_v40 = vrot.slane %v5900_v59, 4  ;;  %v2615_v20 = vadd.f32 %v2614_v16, %v2613_v4 }
 0x46c   : > { %v4133_v62 = vpop.eup %4132  ;;  %v2882_v45 = vrot.slane %v2881_v6, 2  ;;  %v2647_v28 = vmul.f32 0.125, %v2585_v43  ;;  %v2601_v12 = vadd.f32 %v2600_v34, %v2599_v3  ;;  %4136 = vrsqrt.f32 %v2963_v18 }
 0x46d   : > { %v2878_v13 = vrot.slane %v2877_v41, 1  ;;  %v2866_v57 = vrot.slane %v2865_v35, 1  ;;  %v2617_v36 = vadd.f32 %v2616_v40, %v5900_v59  ;;  %v2652_v7 = vmul.f32 0.125, %v2615_v20 }
 0x46e   : > { %v2883_v25 = vadd.f32 %v2882_v45, %v2881_v6  ;;  %v5908_v53 = vsub.f32 %v5861_v54, %v2647_v28  ;;  %v2602_v33 = vrot.slane %v2601_v12, 1  ;;  %v5912_v19 = vadd.f32 %v5680_v55, %v5467_v17 }
 0x46f   : > { %v2879_v39 = vadd.f32 %v2878_v13, %v2877_v41  ;;  %v2867_v32 = vadd.f32 %v2866_v57, %v2865_v35  ;;  %v2618_v5 = vrot.slane %v2617_v36, 2  ;;  %v5917_v3 = vsub.f32 %v5865_v37, %v2652_v7 }
 0x470   : > { %v2884_v11 = vrot.slane %v2883_v25, 1  ;;  %v2711_v4 = vmul.f32 %v5908_v53, %v5908_v53  ;;  %v2603_v18 = vadd.f32 %v2602_v33, %v2601_v12  ;;  %v4135_v23 = vpop.eup %4134  ;;  %v5920_v54 = vmul.f32 %v4133_v62, %v5815_v9 }
 0x471   : > { %v2936_v56 = vmul.f32 0.125, %v2879_v39  ;;  %v2934_v6 = vmul.f32 0.125, %v2867_v32  ;;  %v2619_v43 = vadd.f32 %v2618_v5, %v2617_v36  ;;  %v2716_v17 = vmul.f32 %v5917_v3, %v5917_v3 }
 0x472   : > { %v2885_v16 = vadd.f32 %v2884_v11, %v2883_v25  ;;  %v2868_v34 = vrot.slane %v2711_v4, 4  ;;  %v2650_v55 = vmul.f32 0.125, %v2603_v18  ;;  %v2604_v37 = vrot.slane %v5912_v19, 4 }
 0x473   : > { %v2968_v41 = vadd.f32 1e-05, %v2936_v56  ;;  %v2966_v35 = vadd.f32 1e-05, %v2934_v6  ;;  %v2620_v40 = vrot.slane %v2619_v43, 1  ;;  %v2898_v20 = vrot.slane %v2716_v17, 4 }
 0x474   : > { %v2937_v45 = vmul.f32 0.125, %v2885_v16  ;;  %v2869_v28 = vadd.f32 %v2868_v34, %v2711_v4  ;;  %v5926_v9 = vsub.f32 %v5889_v1, %v2650_v55  ;;  %v2605_v12 = vadd.f32 %v2604_v37, %v5912_v19 }
 0x475   : > { %4138 = vrsqrt.f32 %v2968_v41  ;;  %v2621_v62 = vadd.f32 %v2620_v40, %v2619_v43  ;;  %v3042_v13 = vmul.f32 %v5488_v15, %v5610_v49  ;;  %v5932_v57 = vmul.f32 %v4135_v23, %v5831_v61 }
 0x476   : > { %4140 = vrsqrt.f32 %v2966_v35  ;;  %v2969_v36 = vadd.f32 1e-05, %v2937_v45  ;;  %v2870_v25 = vrot.slane %v2869_v28, 2  ;;  %v4137_v7 = vpop.eup %4136  ;;  %v2899_v33 = vadd.f32 %v2898_v20, %v2716_v17 }
 0x477   : > { %v2714_v39 = vmul.f32 %v5926_v9, %v5926_v9  ;;  %v2653_v1 = vmul.f32 0.125, %v2621_v62  ;;  %v2606_v32 = vrot.slane %v2605_v12, 2  ;;  %v3043_v11 = vmul.f32 %v5488_v15, %v5637_v47 }
 0x478   : > { %4142 = vrsqrt.f32 %v2969_v36  ;;  %v2871_v5 = vadd.f32 %v2870_v25, %v2869_v28  ;;  %v3078_v49 = vadd.f32 %v5494_v0, %v3042_v13  ;;  %v2900_v4 = vrot.slane %v2899_v33, 2 }
 0x479   : > { %v2886_v61 = vrot.slane %v2714_v39, 4  ;;  %v5940_v18 = vsub.f32 %v5900_v59, %v2653_v1  ;;  %v2607_v23 = vadd.f32 %v2606_v32, %v2605_v12  ;;  %v3079_v6 = vadd.f32 %v5494_v0, %v3043_v11 }
 0x47a   : > { %v2872_v56 = vrot.slane %v2871_v5, 1  ;;  %v3110_v43 = vmax.f32 %v3078_v49, 0.0  ;;  %v6186_v16 = vmax.f32 %v5618_v46, 0.0  ;;  %v6187_v34 = vmax.f32 %v5634_v26, 0.0 }
 0x47b   : > { %v2901_v55 = vadd.f32 %v2900_v4, %v2899_v33  ;;  %v2887_v41 = vadd.f32 %v2886_v61, %v2714_v39  ;;  %v2717_v47 = vmul.f32 %v5940_v18, %v5940_v18  ;;  %v2608_v35 = vrot.slane %v2607_v23, 1 }
 0x47c   : > { %v3143_v17 = vpack.c.bf16 %v6187_v34, %v6186_v16  ;;  %v2873_v40 = vadd.f32 %v2872_v56, %v2871_v5  ;;  %v3111_v37 = vmax.f32 %v3079_v6, 0.0  ;;  %v3046_v59 = vmul.f32 %v5488_v15, %v5675_v60 }
 0x47d   : > { %v3047_v45 = vmul.f32 %v5488_v15, %v5690_v50  ;;  %v2902_v28 = vrot.slane %v2901_v55, 1  ;;  %v2888_v20 = vrot.slane %v2887_v41, 2  ;;  %v2904_v46 = vrot.slane %v2717_v47, 4 }
 0x47e   : > { %v2609_v62 = vadd.f32 %v2608_v35, %v2607_v23  ;;  %v2935_v26 = vmul.f32 0.125, %v2873_v40  ;;  %v3142_v12 = vpack.c.bf16 %v3111_v37, %v3110_v43  ;;  %v3082_v13 = vadd.f32 %v5494_v0, %v3046_v59 }
 0x47f   : > { %v3083_v36 = vadd.f32 %v5494_v0, %v3047_v45  ;;  %v4139_v25 = vpop.eup %4138  ;;  %v2903_v33 = vadd.f32 %v2902_v28, %v2901_v55  ;;  %v2889_v39 = vadd.f32 %v2888_v20, %v2887_v41  ;;  %v2905_v1 = vadd.f32 %v2904_v46, %v2717_v47 }
 0x480   : > { %v2651_v32 = vmul.f32 0.125, %v2609_v62  ;;  %v4141_v5 = vpop.eup %4140  ;;  %v5956_v60 = vmul.f32 %v4137_v7, %v5848_v30  ;;  %v2967_v50 = vadd.f32 1e-05, %v2935_v26  ;;  %3865 = vmatprep.mubr.bf16.mxu0 %v3142_v12  ;;  %v3114_v11 = vmax.f32 %v3082_v13, 0.0 }
 0x481   : > { %v3115_v49 = vmax.f32 %v3083_v36, 0.0  ;;  %v5959_v4 = vmul.f32 %v4139_v25, %v5873_v58  ;;  %v2940_v61 = vmul.f32 0.125, %v2903_v33  ;;  %v2890_v23 = vrot.slane %v2889_v39, 1  ;;  %3866 = vmatmul.mubr.bf16.vlgmr.msra.gmra.mrb[64].mxu0 %v3143_v17 }
 0x482   : > { %v2906_v56 = vrot.slane %v2905_v1, 2  ;;  %v4143_v6 = vpop.eup %4142  ;;  %v5962_v43 = vmul.f32 %v4141_v5, %v5876_v63  ;;  %v5965_v16 = vsub.f32 %v5912_v19, %v2651_v32  ;;  %v6188_v7 = vmax.f32 %v5683_v27, 0.0 }
 0x483   : > { %v3144_v30 = vpack.c.bf16 %v3115_v49, %v3114_v11  ;;  %v6189_v34 = vmax.f32 %v5693_v42, 0.0  ;;  %4144 = vrsqrt.f32 %v2967_v50  ;;  %v2972_v58 = vadd.f32 1e-05, %v2940_v61 }
 0x484   : > { %v2891_v41 = vadd.f32 %v2890_v23, %v2889_v39  ;;  %v2907_v47 = vadd.f32 %v2906_v56, %v2905_v1  ;;  %v2715_v17 = vmul.f32 %v5965_v16, %v5965_v16  ;;  %v3050_v63 = vmul.f32 %v5488_v15, %v5750_v31 }
 0x485   : > { %v3145_v55 = vpack.c.bf16 %v6189_v34, %v6188_v7  ;;  %3869 = vmatprep.mubr.bf16.mxu1 %v3144_v30  ;;  %v3051_v19 = vmul.f32 %v5488_v15, %v5781_v29  ;;  %v3052_v27 = vmul.f32 %v5488_v15, %v5747_v24  ;;  %v5980_v42 = vmul.f32 %v4143_v6, %v5885_v8 }
 0x486   : > { %v2938_v35 = vmul.f32 0.125, %v2891_v41  ;;  %v2908_v40 = vrot.slane %v2907_v47, 1  ;;  %v3053_v37 = vmul.f32 %v5488_v15, %v5758_v44  ;;  %v2892_v59 = vrot.slane %v2715_v17, 4 }
 0x487   : > { %3870 = vmatmul.mubr.bf16.vlgmr.msra.gmra.mrb[32].mxu1 %v3145_v55  ;;  %v3086_v45 = vadd.f32 %v5494_v0, %v3050_v63  ;;  %v3087_v31 = vadd.f32 %v5494_v0, %v3051_v19  ;;  %v3088_v28 = vadd.f32 %v5494_v0, %v3052_v27  ;;  %4146 = vrsqrt.f32 %v2972_v58 }
 0x488   : > { %v2909_v29 = vadd.f32 %v2908_v40, %v2907_v47  ;;  %v3089_v24 = vadd.f32 %v5494_v0, %v3053_v37  ;;  %v3054_v8 = vmul.f32 %v5488_v15, %v5798_v38  ;;  %v2970_v20 = vadd.f32 1e-05, %v2938_v35 }
 0x489   : > { %v2893_v46 = vadd.f32 %v2892_v59, %v2715_v17  ;;  %v3118_v62 = vmax.f32 %v3086_v45, 0.0  ;;  %v3119_v26 = vmax.f32 %v3087_v31, 0.0  ;;  %v3120_v44 = vmax.f32 %v3088_v28, 0.0 }
 0x48a   : > { %v2941_v12 = vmul.f32 0.125, %v2909_v29  ;;  %v3121_v13 = vmax.f32 %v3089_v24, 0.0  ;;  %v3055_v36 = vmul.f32 %v5488_v15, %v5845_v21  ;;  %v3090_v39 = vadd.f32 %v5494_v0, %v3054_v8 }
 0x48b   : > { %v2894_v25 = vrot.slane %v2893_v46, 2  ;;  %v3146_v33 = vpack.c.bf16 %v3119_v26, %v3118_v62  ;;  %v3056_v1 = vmul.f32 %v5488_v15, %v5791_v14  ;;  %v3057_v50 = vmul.f32 %v5488_v15, %v5818_v2 }
 0x48c   : > { %v2973_v32 = vadd.f32 1e-05, %v2941_v12  ;;  %v3147_v5 = vpack.c.bf16 %v3121_v13, %v3120_v44  ;;  %v3091_v38 = vadd.f32 %v5494_v0, %v3055_v36  ;;  %4148 = vrsqrt.f32 %v2970_v20 }
 0x48d   : > { %v2895_v11 = vadd.f32 %v2894_v25, %v2893_v46  ;;  %3873 = vmatprep.mubr.bf16.mxu1 %v3146_v33  ;;  %v3092_v49 = vadd.f32 %v5494_v0, %v3056_v1  ;;  %v3058_v21 = vmul.f32 %v5488_v15, %v5857_v10  ;;  %v4145_v61 = vpop.eup %4144  ;;  %v3122_v23 = vmax.f32 %v3090_v39, 0.0 }
 0x48e   : > { %4150 = vrsqrt.f32 %v2973_v32  ;;  %v3123_v14 = vmax.f32 %v3091_v38, 0.0  ;;  %v3093_v56 = vadd.f32 %v5494_v0, %v3057_v50  ;;  %v3059_v2 = vmul.f32 %v5488_v15, %v5892_v22 }
 0x48f   : > { %3874 = vmatmul.mubr.bf16.gmra.mrb[36].mxu1 %v3147_v5  ;;  %v2896_v6 = vrot.slane %v2895_v11, 1  ;;  %v3124_v30 = vmax.f32 %v3092_v49, 0.0  ;;  %v3094_v7 = vadd.f32 %v5494_v0, %v3058_v21  ;;  %v3060_v58 = vmul.f32 %v5488_v15, %v5854_v48 }
 0x490   : > { %v3148_v34 = vpack.c.bf16 %v3123_v14, %v3122_v23  ;;  %v3125_v55 = vmax.f32 %v3093_v56, 0.0  ;;  %v3061_v10 = vmul.f32 %v5488_v15, %v5870_v51  ;;  %v3031_v41 = vmul.f32 %v4145_v61, %v5908_v53 }
 0x491   : > { %v2897_v47 = vadd.f32 %v2896_v6, %v2895_v11  ;;  %v3095_v17 = vadd.f32 %v5494_v0, %v3059_v2  ;;  %v3126_v63 = vmax.f32 %v3094_v7, 0.0  ;;  %v4147_v19 = vpop.eup %4146  ;;  %v3096_v22 = vadd.f32 %v5494_v0, %v3060_v58 }
 0x492   : > { %3877 = vmatprep.mubr.bf16.mxu1 %v3148_v34  ;;  %v3149_v27 = vpack.c.bf16 %v3125_v55, %v3124_v30  ;;  %v3097_v35 = vadd.f32 %v5494_v0, %v3061_v10  ;;  %v3062_v40 = vmul.f32 %v5488_v15, %v5920_v54  ;;  %v3063_v51 = vmul.f32 %v5488_v15, %v5956_v60 }
 0x493   : > { %v2939_v48 = vmul.f32 0.125, %v2897_v47  ;;  %v3127_v37 = vmax.f32 %v3095_v17, 0.0  ;;  %v3064_v53 = vmul.f32 %v5488_v15, %v5903_v52  ;;  %v3128_v59 = vmax.f32 %v3096_v22, 0.0 }
 0x494   : > { %v3129_v45 = vmax.f32 %v3097_v35, 0.0  ;;  %v3098_v31 = vadd.f32 %v5494_v0, %v3062_v40  ;;  %v3065_v28 = vmul.f32 %v5488_v15, %v5932_v57  ;;  %v3036_v29 = vmul.f32 %v4147_v19, %v5917_v3  ;;  %v6190_v19 = vld [vmem:[#allocation2_spill] sm:$0xff] }
 0x495   : > { %v2971_v24 = vadd.f32 1e-05, %v2939_v48  ;;  %v3150_v8 = vpack.c.bf16 %v3127_v37, %v3126_v63  ;;  %v3099_v54 = vadd.f32 %v5494_v0, %v3063_v51  ;;  %v3100_v60 = vadd.f32 %v5494_v0, %v3064_v53  ;;  %v3619_v63 = vld [vmem:[%s6161_s2 + $0x18] sm:$0xff] }
 0x496   : > { %v3151_v20 = vpack.c.bf16 %v3129_v45, %v3128_v59  ;;  %v3130_v46 = vmax.f32 %v3098_v31, 0.0  ;;  %v3101_v52 = vadd.f32 %v5494_v0, %v3065_v28  ;;  %v4149_v62 = vpop.eup %4148  ;;  %v3066_v57 = vmul.f32 %v5488_v15, %v5962_v43 }
 0x497   : > { %3878 = vmatmul.mubr.bf16.gmra.mrb[40].mxu1 %v3149_v27  ;;  %4152 = vrsqrt.f32 %v2971_v24  ;;  %v3131_v26 = vmax.f32 %v3099_v54, 0.0  ;;  %v3067_v3 = vmul.f32 %v5488_v15, %v3031_v41  ;;  %v3132_v44 = vmax.f32 %v3100_v60, 0.0 }
 0x498   : > { %3881 = vmatprep.mubr.bf16.mxu1 %v3150_v8  ;;  %v4151_v12 = vpop.eup %4150  ;;  %v3133_v13 = vmax.f32 %v3101_v52, 0.0  ;;  %v3068_v36 = vmul.f32 %v5488_v15, %v5959_v4  ;;  %v3069_v25 = vmul.f32 %v5488_v15, %v5980_v42  ;;  %v3102_v1 = vadd.f32 %v5494_v0, %v3066_v57 }
 0x499   : > { %v3037_v33 = vmul.f32 %v4151_v12, %v5940_v18  ;;  %v3152_v39 = vpack.c.bf16 %v3131_v26, %v3130_v46  ;;  %v3103_v32 = vadd.f32 %v5494_v0, %v3067_v3  ;;  %v3072_v49 = vmul.f32 %v5488_v15, %v3036_v29 }
 0x49a   : > { %v3153_v5 = vpack.c.bf16 %v3133_v13, %v3132_v44  ;;  %v3104_v43 = vadd.f32 %v5494_v0, %v3068_v36  ;;  %v3105_v38 = vadd.f32 %v5494_v0, %v3069_v25  ;;  %v3134_v50 = vmax.f32 %v3102_v1, 0.0 }
 0x49b   : > { %v3135_v11 = vmax.f32 %v3103_v32, 0.0  ;;  %v3073_v4 = vmul.f32 %v5488_v15, %v3037_v33  ;;  %v3034_v42 = vmul.f32 %v4149_v62, %v5926_v9  ;;  %v3108_v23 = vadd.f32 %v5494_v0, %v3072_v49 }
 0x49c   : > { %v3136_v21 = vmax.f32 %v3104_v43, 0.0  ;;  %v3137_v18 = vmax.f32 %v3105_v38, 0.0 }
 0x49d   : > { %v3154_v61 = vpack.c.bf16 %v3135_v11, %v3134_v50  ;;  %v3109_v14 = vadd.f32 %v5494_v0, %v3073_v4  ;;  %v3140_v6 = vmax.f32 %v3108_v23, 0.0  ;;  %v3070_v2 = vmul.f32 %v5488_v15, %v3034_v42 }
 0x49e   : > { %v3155_v56 = vpack.c.bf16 %v3137_v18, %v3136_v21 }
 0x49f   : > { %3882 = vmatmul.mubr.bf16.gmra.mrb[44].mxu1 %v3151_v20  ;;  %v3141_v30 = vmax.f32 %v3109_v14, 0.0  ;;  %v3106_v58 = vadd.f32 %v5494_v0, %v3070_v2 }
 0x4a0   : > { %3885 = vmatprep.mubr.bf16.mxu1 %v3152_v39 }
 0x4a1   : > { %v4153_v7 = vpop.eup %4152  ;;  %v3157_v34 = vpack.c.bf16 %v3141_v30, %v3140_v6  ;;  %v3138_v41 = vmax.f32 %v3106_v58, 0.0 }
 0x4a2   : > { %v3035_v55 = vmul.f32 %v4153_v7, %v5965_v16  ;;  %v6052_v16 = vrot.slane %v3619_v63, %v6190_v19 }
 0x4a4   : > { %v3071_v9 = vmul.f32 %v5488_v15, %v3035_v55 }
 0x4a6   : > { %v3107_v10 = vadd.f32 %v5494_v0, %v3071_v9 }
 0x4a7   : > { %3886 = vmatmul.mubr.bf16.gmra.mrb[48].mxu1 %v3153_v5 }
 0x4a8   : > { %3889 = vmatprep.mubr.bf16.mxu1 %v3154_v61  ;;  %v3139_v47 = vmax.f32 %v3107_v10, 0.0 }
 0x4aa   : > { %v3156_v17 = vpack.c.bf16 %v3139_v47, %v3138_v41 }
 0x4af   : > { %3890 = vmatmul.mubr.bf16.gmra.mrb[52].mxu1 %v3155_v56 }
 0x4b0   : > { %3893 = vmatprep.mubr.bf16.mxu1 %v3156_v17 }
 0x4b7   : > { %3894 = vmatmul.mubr.bf16.gmra.mrb[56].mxu1 %v3157_v34 }
 0x554   : > { %v3867_v15 = vpop.f32.mrb[64].mxu0 }
 0x555   : > { %v3272_v27 = vadd.f32 %v3867_v15, %v6052_v16  ;;  %v3263_v22 = vpop.f32.mrb[65].mxu0 }
 0x556   : > { %v3264_v0 = vadd.f32 %v3263_v22, %v6052_v16  ;;  %v3868_v35 = vpop.f32.mrb[66].mxu0 }
 0x557   : > { %v3392_v40 = vmax.f32 %v3272_v27, 0.0  ;;  %v3275_v48 = vadd.f32 %v3868_v35, %v6052_v16  ;;  %v3266_v37 = vpop.f32.mrb[67].mxu0 }
 0x558   : > { %v3390_v51 = vmax.f32 %v3264_v0, 0.0  ;;  %v3267_v53 = vadd.f32 %v3266_v37, %v6052_v16 }
 0x559   : > { %3425 = vst.msk [vmem:[%s6059_s5 + $0x10] sm:$0xff] %vm3422_vm1, %v3392_v40  ;;  %v3393_v45 = vmax.f32 %v3275_v48, 0.0 }
 0x55a   : > { %v3871_v59 = vpop.f32.mrb[32].mxu1  ;;  %3423 = vst.msk [vmem:[%s6059_s5] sm:$0xff] %vm3422_vm1, %v3390_v51  ;;  %v3391_v29 = vmax.f32 %v3267_v53, 0.0 }
 0x55b   : > { %v3288_v31 = vadd.f32 %v3871_v59, %v6052_v16  ;;  %v3279_v28 = vpop.f32.mrb[33].mxu1  ;;  %3426 = vst.msk [vmem:[%s6059_s5 + $0x18] sm:$0xff] %vm3422_vm1, %v3393_v45 }
 0x55c   : > { %v3280_v24 = vadd.f32 %v3279_v28, %v6052_v16  ;;  %v3872_v8 = vpop.f32.mrb[34].mxu1  ;;  %3424 = vst.msk [vmem:[%s6059_s5 + $0x8] sm:$0xff] %vm3422_vm1, %v3391_v29 }
 0x55d   : > { %v3396_v54 = vmax.f32 %v3288_v31, 0.0  ;;  %v3291_v20 = vadd.f32 %v3872_v8, %v6052_v16  ;;  %v3282_v46 = vpop.f32.mrb[35].mxu1 }
 0x55e   : > { %v3394_v60 = vmax.f32 %v3280_v24, 0.0  ;;  %v3283_v52 = vadd.f32 %v3282_v46, %v6052_v16 }
 0x55f   : > { %3429 = vst.msk [vmem:[%s6059_s5 + $0x30] sm:$0xff] %vm3422_vm1, %v3396_v54  ;;  %v3397_v62 = vmax.f32 %v3291_v20, 0.0 }
 0x560   : > { %3427 = vst.msk [vmem:[%s6059_s5 + $0x20] sm:$0xff] %vm3422_vm1, %v3394_v60  ;;  %v3395_v26 = vmax.f32 %v3283_v52, 0.0 }
 0x561   : > { %3430 = vst.msk [vmem:[%s6059_s5 + $0x38] sm:$0xff] %vm3422_vm1, %v3397_v62 }
 0x562   : > { %3428 = vst.msk [vmem:[%s6059_s5 + $0x28] sm:$0xff] %vm3422_vm1, %v3395_v26  ;;  %v3875_v57 = vpop.f32.mrb[36].mxu1 }
 0x563   : > { %v3304_v3 = vadd.f32 %v3875_v57, %v6052_v16  ;;  %v3295_v12 = vpop.f32.mrb[37].mxu1 }
 0x564   : > { %v3296_v44 = vadd.f32 %v3295_v12, %v6052_v16  ;;  %v3876_v13 = vpop.f32.mrb[38].mxu1 }
 0x565   : > { %v3400_v36 = vmax.f32 %v3304_v3, 0.0  ;;  %v3307_v25 = vadd.f32 %v3876_v13, %v6052_v16  ;;  %v3298_v33 = vpop.f32.mrb[39].mxu1 }
 0x566   : > { %v3398_v39 = vmax.f32 %v3296_v44, 0.0  ;;  %v3299_v1 = vadd.f32 %v3298_v33, %v6052_v16 }
 0x567   : > { %3433 = vst.msk [vmem:[%s6059_s5 + $0x50] sm:$0xff] %vm3422_vm1, %v3400_v36  ;;  %v3401_v32 = vmax.f32 %v3307_v25, 0.0 }
 0x568   : > { %3431 = vst.msk [vmem:[%s6059_s5 + $0x40] sm:$0xff] %vm3422_vm1, %v3398_v39  ;;  %v3399_v5 = vmax.f32 %v3299_v1, 0.0 }
 0x569   : > { %3434 = vst.msk [vmem:[%s6059_s5 + $0x58] sm:$0xff] %vm3422_vm1, %v3401_v32 }
 0x56a   : > { %3432 = vst.msk [vmem:[%s6059_s5 + $0x48] sm:$0xff] %vm3422_vm1, %v3399_v5  ;;  %v3879_v43 = vpop.f32.mrb[40].mxu1 }
 0x56b   : > { %v3320_v38 = vadd.f32 %v3879_v43, %v6052_v16  ;;  %v3311_v50 = vpop.f32.mrb[41].mxu1 }
 0x56c   : > { %v3312_v11 = vadd.f32 %v3311_v50, %v6052_v16  ;;  %v3880_v49 = vpop.f32.mrb[42].mxu1 }
 0x56d   : > { %v3404_v4 = vmax.f32 %v3320_v38, 0.0  ;;  %v3323_v42 = vadd.f32 %v3880_v49, %v6052_v16  ;;  %v3314_v21 = vpop.f32.mrb[43].mxu1 }
 0x56e   : > { %v3402_v18 = vmax.f32 %v3312_v11, 0.0  ;;  %v3315_v61 = vadd.f32 %v3314_v21, %v6052_v16 }
 0x56f   : > { %3437 = vst.msk [vmem:[%s6059_s5 + $0x70] sm:$0xff] %vm3422_vm1, %v3404_v4  ;;  %v3405_v23 = vmax.f32 %v3323_v42, 0.0 }
 0x570   : > { %3435 = vst.msk [vmem:[%s6059_s5 + $0x60] sm:$0xff] %vm3422_vm1, %v3402_v18  ;;  %v3403_v14 = vmax.f32 %v3315_v61, 0.0 }
 0x571   : > { %3438 = vst.msk [vmem:[%s6059_s5 + $0x78] sm:$0xff] %vm3422_vm1, %v3405_v23 }
 0x572   : > { %3436 = vst.msk [vmem:[%s6059_s5 + $0x68] sm:$0xff] %vm3422_vm1, %v3403_v14  ;;  %v3883_v56 = vpop.f32.mrb[44].mxu1 }
 0x573   : > { %v3336_v6 = vadd.f32 %v3883_v56, %v6052_v16  ;;  %v3327_v30 = vpop.f32.mrb[45].mxu1 }
 0x574   : > { %v3328_v2 = vadd.f32 %v3327_v30, %v6052_v16  ;;  %v3884_v7 = vpop.f32.mrb[46].mxu1 }
 0x575   : > { %v3408_v34 = vmax.f32 %v3336_v6, 0.0  ;;  %v3339_v55 = vadd.f32 %v3884_v7, %v6052_v16  ;;  %v3330_v9 = vpop.f32.mrb[47].mxu1 }
 0x576   : > { %v3406_v58 = vmax.f32 %v3328_v2, 0.0  ;;  %v3331_v10 = vadd.f32 %v3330_v9, %v6052_v16 }
 0x577   : > { %3441 = vst.msk [vmem:[%s6059_s5 + $0x90] sm:$0xff] %vm3422_vm1, %v3408_v34  ;;  %v3409_v41 = vmax.f32 %v3339_v55, 0.0 }
 0x578   : > { %3439 = vst.msk [vmem:[%s6059_s5 + $0x80] sm:$0xff] %vm3422_vm1, %v3406_v58  ;;  %v3407_v47 = vmax.f32 %v3331_v10, 0.0 }
 0x579   : > { %3442 = vst.msk [vmem:[%s6059_s5 + $0x98] sm:$0xff] %vm3422_vm1, %v3409_v41 }
 0x57a   : > { %3440 = vst.msk [vmem:[%s6059_s5 + $0x88] sm:$0xff] %vm3422_vm1, %v3407_v47  ;;  %v3887_v17 = vpop.f32.mrb[48].mxu1 }
 0x57b   : > { %v3352_v63 = vadd.f32 %v3887_v17, %v6052_v16  ;;  %v3343_v19 = vpop.f32.mrb[49].mxu1 }
 0x57c   : > { %v3344_v15 = vadd.f32 %v3343_v19, %v6052_v16  ;;  %v3888_v27 = vpop.f32.mrb[50].mxu1 }
 0x57d   : > { %v3412_v22 = vmax.f32 %v3352_v63, 0.0  ;;  %v3355_v0 = vadd.f32 %v3888_v27, %v6052_v16  ;;  %v3346_v35 = vpop.f32.mrb[51].mxu1 }
 0x57e   : > { %v3410_v40 = vmax.f32 %v3344_v15, 0.0  ;;  %v3347_v48 = vadd.f32 %v3346_v35, %v6052_v16 }
 0x57f   : > { %3445 = vst.msk [vmem:[%s6059_s5 + $0xb0] sm:$0xff] %vm3422_vm1, %v3412_v22  ;;  %v3413_v37 = vmax.f32 %v3355_v0, 0.0 }
 0x580   : > { %3443 = vst.msk [vmem:[%s6059_s5 + $0xa0] sm:$0xff] %vm3422_vm1, %v3410_v40  ;;  %v3411_v51 = vmax.f32 %v3347_v48, 0.0 }
 0x581   : > { %3446 = vst.msk [vmem:[%s6059_s5 + $0xb8] sm:$0xff] %vm3422_vm1, %v3413_v37 }
 0x582   : > { %3444 = vst.msk [vmem:[%s6059_s5 + $0xa8] sm:$0xff] %vm3422_vm1, %v3411_v51  ;;  %v3891_v53 = vpop.f32.mrb[52].mxu1 }
 0x583   : > { %v3368_v59 = vadd.f32 %v3891_v53, %v6052_v16  ;;  %v3359_v45 = vpop.f32.mrb[53].mxu1 }
 0x584   : > { %v3360_v31 = vadd.f32 %v3359_v45, %v6052_v16  ;;  %v3892_v28 = vpop.f32.mrb[54].mxu1 }
 0x585   : > { %v3416_v29 = vmax.f32 %v3368_v59, 0.0  ;;  %v3371_v24 = vadd.f32 %v3892_v28, %v6052_v16  ;;  %v3362_v8 = vpop.f32.mrb[55].mxu1 }
 0x586   : > { %v3414_v54 = vmax.f32 %v3360_v31, 0.0  ;;  %v3363_v20 = vadd.f32 %v3362_v8, %v6052_v16 }
 0x587   : > { %3449 = vst.msk [vmem:[%s6059_s5 + $0xd0] sm:$0xff] %vm3422_vm1, %v3416_v29  ;;  %v3417_v46 = vmax.f32 %v3371_v24, 0.0 }
 0x588   : > { %3447 = vst.msk [vmem:[%s6059_s5 + $0xc0] sm:$0xff] %vm3422_vm1, %v3414_v54  ;;  %v3415_v60 = vmax.f32 %v3363_v20, 0.0 }
 0x589   : > { %3450 = vst.msk [vmem:[%s6059_s5 + $0xd8] sm:$0xff] %vm3422_vm1, %v3417_v46 }
 0x58a   : > { %3448 = vst.msk [vmem:[%s6059_s5 + $0xc8] sm:$0xff] %vm3422_vm1, %v3415_v60  ;;  %v3895_v52 = vpop.f32.mrb[56].mxu1 }
 0x58b   : > { %v3384_v62 = vadd.f32 %v3895_v52, %v6052_v16  ;;  %v3375_v26 = vpop.f32.mrb[57].mxu1 }
 0x58c   : > { %v3376_v57 = vadd.f32 %v3375_v26, %v6052_v16  ;;  %v3896_v3 = vpop.f32.mrb[58].mxu1 }
 0x58d   : > { %v3420_v12 = vmax.f32 %v3384_v62, 0.0  ;;  %v3387_v44 = vadd.f32 %v3896_v3, %v6052_v16  ;;  %v3378_v13 = vpop.f32.mrb[59].mxu1 }
 0x58e   : > { %v3418_v36 = vmax.f32 %v3376_v57, 0.0  ;;  %v3379_v25 = vadd.f32 %v3378_v13, %v6052_v16 }
 0x58f   : > { %3453 = vst.msk [vmem:[%s6059_s5 + $0xf0] sm:$0xff] %vm3422_vm1, %v3420_v12  ;;  %v3421_v33 = vmax.f32 %v3387_v44, 0.0 }
 0x590   : > { %3451 = vst.msk [vmem:[%s6059_s5 + $0xe0] sm:$0xff] %vm3422_vm1, %v3418_v36  ;;  %v3419_v39 = vmax.f32 %v3379_v25, 0.0 }
 0x591   : > { %3454 = vst.msk [vmem:[%s6059_s5 + $0xf8] sm:$0xff] %vm3422_vm1, %v3421_v33 }
 0x592   : > { %3452 = vst.msk [vmem:[%s6059_s5 + $0xe8] sm:$0xff] %vm3422_vm1, %v3419_v39 }
 0x593 PF: > { %s13_s12 = sadd.s32 1, %s4161_s12  }
 0x594   : > { %p10_p4 = scmp.ge.s32.totalorder %s13_s12, 4  }
 0x596   :  { %12 = sbr.rel (!%p10_p4) target bundleno = 1 (0x1), region = 68 }

</bundles_post_ra>
